<compile_context>
chip_gen: v5e
topology: v5e:2x2
jax: 0.10.0
libtpu: 0.0.40
codegen_flags: <defaults>
</compile_context>

<pallas_src>
import functools
from typing import NamedTuple

import numpy as np
import jax
import jax.numpy as jnp
from jax.experimental import pallas as pl
from jax.experimental.pallas import tpu as pltpu


KERNEL_SIZE = 5
STRIDE = 2
N_ACTIONS = 9
HEAD_PAD = 128          # lane-dense padded output width (>= N_ACTIONS)
_BN_EPS = 1e-5


def conv2d_size_out(size, kernel_size=KERNEL_SIZE, stride=STRIDE):
    return (size - (kernel_size - 1) - 1) // stride + 1


class Dims(NamedTuple):
    h: int
    w: int
    c1: int
    oc1: int
    oh1: int
    ow1: int
    oc2: int
    oh2: int
    ow2: int
    oc3: int
    oh3: int
    ow3: int
    n_actions: int


def make_dims(h, w):
    oh1, ow1 = conv2d_size_out(h), conv2d_size_out(w)
    oh2, ow2 = conv2d_size_out(oh1), conv2d_size_out(ow1)
    oh3, ow3 = conv2d_size_out(oh2), conv2d_size_out(ow2)
    assert oh3 >= 1 and ow3 >= 1, "input too small for three 5x5/stride-2 convs"
    assert h % 2 == 0 and w % 2 == 0, "phase decomposition assumes even H, W"
    return Dims(h, w, 3, 16, oh1, ow1, 32, oh2, ow2, 32, oh3, ow3, N_ACTIONS)


# ----------------------------------------------------------------------------
# Fused Pallas kernel: whole DQN forward for B batch elements per grid step.
# ----------------------------------------------------------------------------
def _dqn_fused_kernel(x1_ref, w1_ref, b1_ref, w2_ref, b2_ref, w3_ref, b3_ref,
                      wh_ref, bh_ref, out_ref, *, dims, batch_tile):
    d = dims
    B = batch_tile
    f32 = jnp.float32
    mxu = jnp.bfloat16                     # MXU input dtype; accumulation f32
    n_even = (d.oh1 + 1) // 2              # number of even conv1 output rows

    # --- conv1 + bn1 + relu: ONE banded matmul, M = B*OH1 -------------------
    # x1 rows are ordered (parity, out_row_half, batch); weight prebuilt so all
    # 25 taps are absorbed (exact, disjoint support).
    a1 = jnp.dot(x1_ref[...], w1_ref[...], preferred_element_type=f32)
    a1 = jnp.maximum(a1 + b1_ref[...], 0.0).astype(mxu)     # (B*OH1, OW1*OC1)

    # --- conv2 + bn2 + relu: 5 banded taps, contiguous slices, M = B*OH2 ----
    acc2 = jnp.zeros((d.oh2 * B, d.ow2 * d.oc2), f32)
    for i in range(KERNEL_SIZE):
        start = ((i % 2) * n_even + i // 2) * B              # sublane-aligned
        acc2 = acc2 + jnp.dot(a1[start:start + d.oh2 * B, :], w2_ref[i],
                              preferred_element_type=f32)
    a2 = jnp.maximum(acc2 + b2_ref[...], 0.0).astype(mxu)    # (B*OH2, OW2*OC2)
    # a2 rows are ordered (conv2_row, batch).

    # --- conv3 + bn3 + relu + linear head (per conv3 output row, M = B) -----
    b3v = b3_ref[...]                                        # hoisted bias
    acc_q = jnp.zeros((B, HEAD_PAD), f32)
    for r in range(d.oh3):
        acc3 = jnp.zeros((B, d.ow3 * d.oc3), f32)
        for i in range(KERNEL_SIZE):
            rs = (2 * r + i) * B
            acc3 = acc3 + jnp.dot(a2[rs:rs + B, :], w3_ref[i],
                                  preferred_element_type=f32)
        a3 = jnp.maximum(acc3 + b3v, 0.0).astype(mxu)        # (B, OW3*OC3)
        acc_q = acc_q + jnp.dot(a3, wh_ref[r], preferred_element_type=f32)

    out_ref[...] = (acc_q + bh_ref[...]).astype(out_ref.dtype)   # (B, 128)


# ----------------------------------------------------------------------------
# One-time parameter preparation (BN folding + kernel weight layouts).
# ----------------------------------------------------------------------------
def _fold_bn(w, b, gamma, beta, mean, var, eps=_BN_EPS):
    scale = gamma / jnp.sqrt(var + eps)
    return w * scale[:, None, None, None], (b - mean) * scale + beta


def _tile_bias(b, ow):
    # (OC,) -> (1, OW*OC): lane = ow*OC + oc
    b = np.asarray(b, dtype=np.float32)
    return jnp.asarray(np.tile(b, ow).reshape(1, ow * b.shape[0]))


def _conv1_weight_matrix(w1f, dims):
    """Folded conv1 weight (OC1, C1, 5, 5) -> one banded (12*(W//2)*C1, OW1*OC1)
    matrix absorbing all 25 taps.  Row index encodes (pi, r0, pj, ww, c)
    matching the wrapper-built lhs lane order; entries have disjoint support,
    so folding is exact."""
    d = dims
    w2 = d.w // 2
    k1 = 12 * w2 * d.c1
    wf = np.asarray(w1f, np.float32)
    out = np.zeros((k1, d.ow1 * d.oc1), np.float32)
    for pi in range(2):
        for r0 in range(3):
            i = 2 * r0 + pi
            if i >= KERNEL_SIZE:
                continue
            for pj in range(2):
                for o in range(d.ow1):
                    for dj in range(3):
                        j = 2 * dj + pj
                        if j >= KERNEL_SIZE:
                            continue
                        ww = o + dj
                        if ww >= w2:
                            continue
                        k0 = (((pi * 3 + r0) * 2 + pj) * w2 + ww) * d.c1
                        out[k0:k0 + d.c1,
                            o * d.oc1:(o + 1) * d.oc1] = wf[:, :, i, j].T
    return out


def _banded_conv_weights(wf, w_in, ow, stride=STRIDE):
    """wf: (OC, C, KH, KW) -> (KH, W_in*C, OW*OC); folds the width convolution
    into a banded matrix so out_row[oh] = sum_i in_row[stride*oh + i] @ M[i]."""
    wf = np.asarray(wf, np.float32)
    oc, c, kh, kw = wf.shape
    out = np.zeros((kh, w_in * c, ow * oc), np.float32)
    for i in range(kh):
        for o in range(ow):
            for j in range(kw):
                wc = stride * o + j
                out[i, wc * c:(wc + 1) * c, o * oc:(o + 1) * oc] = wf[:, :, i, j].T
    return out


def _head_weights(wh, oh, ow, c):
    """wh: (A, C*OH*OW) in PyTorch NCHW-flatten order -> (OH, OW*C, HEAD_PAD)
    matching the kernel's (h, (w, c)) activation layout; lanes >= A are zero."""
    wh = np.asarray(wh, np.float32)
    a = wh.shape[0]
    w4 = wh.reshape(a, c, oh, ow).transpose(2, 3, 1, 0)      # (h, w, c, A)
    out = np.zeros((oh, ow * c, HEAD_PAD), np.float32)
    out[:, :, :a] = w4.reshape(oh, ow * c, a)
    return out


def prepare_kernel_params(params, dims, weight_dtype=jnp.bfloat16):
    d = dims
    w1f, b1f = _fold_bn(params["w1"], params["b1"], params["gamma1"],
                        params["beta1"], params["mean1"], params["var1"])
    w2f, b2f = _fold_bn(params["w2"], params["b2"], params["gamma2"],
                        params["beta2"], params["mean2"], params["var2"])
    w3f, b3f = _fold_bn(params["w3"], params["b3"], params["gamma3"],
                        params["beta3"], params["mean3"], params["var3"])
    bh = np.zeros((1, HEAD_PAD), np.float32)
    bh[0, :d.n_actions] = np.asarray(params["bh"], np.float32)
    return {
        "w1": jnp.asarray(_conv1_weight_matrix(w1f, d)).astype(weight_dtype),
        "b1": _tile_bias(b1f, d.ow1),
        "w2": jnp.asarray(_banded_conv_weights(w2f, d.ow1, d.ow2)).astype(weight_dtype),
        "b2": _tile_bias(b2f, d.ow2),
        "w3": jnp.asarray(_banded_conv_weights(w3f, d.ow2, d.ow3)).astype(weight_dtype),
        "b3": _tile_bias(b3f, d.ow3),
        "wh": jnp.asarray(_head_weights(params["wh"], d.oh3, d.ow3, d.oc3)).astype(weight_dtype),
        "bh": jnp.asarray(bh),
    }


# ----------------------------------------------------------------------------
# Wrapper-side layout glue: build the conv1 lhs slab (cheap XLA gather on the
# tiny input).  For large production batches, store frames pre-packed in this
# layout to remove this per-call transform entirely.
# ----------------------------------------------------------------------------
def _build_conv1_lhs(x, dims, batch_tile):
    """x: (n_pad, C1, H, W) f32 with n_pad % batch_tile == 0.
    Returns (n_blocks*OH1*B, 12*(W//2)*C1) bf16; rows ordered
    (block, parity, out_row_half, batch); lanes ordered (pi, r0, pj, ww, c)."""
    d = dims
    n_pad = x.shape[0]
    B = batch_tile
    nb = n_pad // B
    h2, w2 = d.h // 2, d.w // 2
    n_even = (d.oh1 + 1) // 2
    n_odd = d.oh1 // 2
    k1 = 12 * w2 * d.c1

    # NCHW -> (n, hh, pi, ww, pj, c): row/col phase decomposition.
    xr = jnp.transpose(x, (0, 2, 3, 1)).reshape(n_pad, h2, 2, w2, 2, d.c1)

    # conv1 output rows ordered (parity, s): r = 2*s + parity.
    r_list = np.concatenate([2 * np.arange(n_even),
                             2 * np.arange(n_odd) + 1]).astype(np.int32)
    row_idx = r_list[None, :] + np.arange(3, dtype=np.int32)[:, None]   # (3, OH1)

    slabs = xr[:, row_idx]                              # (n, 3, OH1, 2, w2, 2, c)
    slabs = jnp.transpose(slabs, (0, 2, 3, 1, 5, 4, 6))  # (n, OH1, pi, r0, pj, ww, c)
    x1 = slabs.reshape(n_pad, d.oh1, k1)
    # Fold batch into the row (M) dimension: rows within a block = (row, b).
    x1 = x1.reshape(nb, B, d.oh1, k1).transpose(0, 2, 1, 3).reshape(nb * d.oh1 * B, k1)
    return x1.astype(jnp.bfloat16)


# ----------------------------------------------------------------------------
# Forward wrapper: input layout glue + one batch-tiled pallas_call.
# ----------------------------------------------------------------------------
def dqn_forward(kp, x, dims, batch_tile=32):
    """x: (N, 3, H, W) float32 NCHW (like PyTorch). Returns (N, 9) float32."""
    d = dims
    n = x.shape[0]
    assert x.shape == (n, d.c1, d.h, d.w)

    B = max(8, ((int(batch_tile) + 7) // 8) * 8)     # sublane-aligned batch tile
    n_pad = ((n + B - 1) // B) * B
    nb = n_pad // B
    if n_pad != n:
        x = jnp.concatenate(
            [x, jnp.zeros((n_pad - n,) + x.shape[1:], x.dtype)], axis=0)

    x1 = _build_conv1_lhs(x.astype(jnp.float32), d, B)   # (nb*OH1*B, K1) bf16
    k1 = x1.shape[-1]

    operands = (x1, kp["w1"], kp["b1"], kp["w2"], kp["b2"],
                kp["w3"], kp["b3"], kp["wh"], kp["bh"])

    flops = 2 * n_pad * (
        d.oh1 * k1 * (d.ow1 * d.oc1)
        + KERNEL_SIZE * d.oh2 * (d.ow1 * d.oc1) * (d.ow2 * d.oc2)
        + KERNEL_SIZE * d.oh3 * (d.ow2 * d.oc2) * (d.ow3 * d.oc3)
        + d.oh3 * (d.ow3 * d.oc3) * HEAD_PAD)
    bytes_accessed = sum(int(np.prod(a.shape)) * a.dtype.itemsize for a in operands)
    bytes_accessed += n_pad * HEAD_PAD * 4

    def _const_spec(arr):
        nd = arr.ndim
        return pl.BlockSpec(arr.shape, lambda g, _nd=nd: (0,) * _nd)

    out = pl.pallas_call(
        functools.partial(_dqn_fused_kernel, dims=d, batch_tile=B),
        out_shape=jax.ShapeDtypeStruct((n_pad, HEAD_PAD), jnp.float32),
        grid=(nb,),
        in_specs=[
            pl.BlockSpec((d.oh1 * B, k1), lambda g: (g, 0)),
            _const_spec(kp["w1"]), _const_spec(kp["b1"]),
            _const_spec(kp["w2"]), _const_spec(kp["b2"]),
            _const_spec(kp["w3"]), _const_spec(kp["b3"]),
            _const_spec(kp["wh"]), _const_spec(kp["bh"]),
        ],
        out_specs=pl.BlockSpec((B, HEAD_PAD), lambda g: (g, 0)),
        compiler_params=pltpu.CompilerParams(
            dimension_semantics=("parallel",)),
        cost_estimate=pl.CostEstimate(
            flops=flops, transcendentals=0, bytes_accessed=bytes_accessed),
    )(*operands)
    return out[:n, :d.n_actions]


# ----------------------------------------------------------------------------
# Deterministic parameter initialization (PyTorch-default-like bounds).
# ----------------------------------------------------------------------------
def _uniform(key, shape, bound):
    return jax.random.uniform(key, shape, jnp.float32, -bound, bound)


def init_dqn_params(key, h, w):
    d = make_dims(h, w)
    lin = d.oh3 * d.ow3 * d.oc3
    keys = jax.random.split(key, 24)
    p = {}
    k = 0
    for name, cin, cout in (("1", 3, 16), ("2", 16, 32), ("3", 32, 32)):
        bound = 1.0 / float(np.sqrt(cin * KERNEL_SIZE * KERNEL_SIZE))
        p[f"w{name}"] = _uniform(keys[k], (cout, cin, KERNEL_SIZE, KERNEL_SIZE), bound); k += 1
        p[f"b{name}"] = _uniform(keys[k], (cout,), bound); k += 1
        p[f"gamma{name}"] = jax.random.uniform(keys[k], (cout,), jnp.float32, 0.5, 1.5); k += 1
        p[f"beta{name}"] = _uniform(keys[k], (cout,), 0.1); k += 1
        p[f"mean{name}"] = _uniform(keys[k], (cout,), 0.1); k += 1
        p[f"var{name}"] = jax.random.uniform(keys[k], (cout,), jnp.float32, 0.5, 1.5); k += 1
    bound = 1.0 / float(np.sqrt(lin))
    p["wh"] = _uniform(keys[k], (N_ACTIONS, lin), bound); k += 1
    p["bh"] = _uniform(keys[k], (N_ACTIONS,), bound)
    return p


# ----------------------------------------------------------------------------
# Plain-JAX reference (PyTorch semantics, eval-mode BN) for verification.
# ----------------------------------------------------------------------------
def _reference_forward(params, x, eps=_BN_EPS):
    def block(y, w, b, g, beta, mean, var):
        y = jax.lax.conv_general_dilated(
            y, w, window_strides=(STRIDE, STRIDE), padding="VALID",
            dimension_numbers=("NCHW", "OIHW", "NCHW"))
        y = y + b[None, :, None, None]
        scale = (g / jnp.sqrt(var + eps))[None, :, None, None]
        y = (y - mean[None, :, None, None]) * scale + beta[None, :, None, None]
        return jnp.maximum(y, 0.0)

    y = block(x, params["w1"], params["b1"], params["gamma1"],
              params["beta1"], params["mean1"], params["var1"])
    y = block(y, params["w2"], params["b2"], params["gamma2"],
              params["beta2"], params["mean2"], params["var2"])
    y = block(y, params["w3"], params["b3"], params["gamma3"],
              params["beta3"], params["mean3"], params["var3"])
    n = y.shape[0]
    return y.reshape(n, -1) @ params["wh"].T + params["bh"]


if __name__ == "__main__":
    key = jax.random.PRNGKey(0)
    k_param, k_x = jax.random.split(key)

    H = W = 32          # three 5x5/s2 convs -> 1x1 spatial
    N = 13              # deliberately not a multiple of the batch tile
    BATCH_TILE = 8      # small for the demo; use 32-64 on v6e/v7x, 8-16 on v5e
    dims = make_dims(H, W)
    params = init_dqn_params(k_param, H, W)
    kp = prepare_kernel_params(params, dims)

    x = jax.random.normal(k_x, (N, 3, H, W), dtype=jnp.float32)  # NCHW

    fwd = jax.jit(functools.partial(dqn_forward, dims=dims, batch_tile=BATCH_TILE))
    out = jax.block_until_ready(fwd(kp, x))
    assert out.shape == (N, N_ACTIONS), out.shape

    # Numerical check against the plain-JAX reference of the PyTorch forward
    # (eval-mode BN). bf16 MXU inputs => loose tolerance.
    ref = jax.block_until_ready(_reference_forward(params, x))
    np.testing.assert_allclose(np.asarray(out), np.asarray(ref),
                               rtol=5e-2, atol=3e-2)
    print("KERNEL_OK")
</pallas_src>

<mosaic_0001>
module attributes {stable_mosaic.version = 11 : i64} {
  func.func @_dqn_fused_kernel(%arg0: i32, %arg1: memref<112x576xbf16, #tpu.memory_space<vmem>>, %arg2: memref<576x224xbf16, #tpu.memory_space<vmem>>, %arg3: memref<1x224xf32, #tpu.memory_space<vmem>>, %arg4: memref<5x224x160xbf16, #tpu.memory_space<vmem>>, %arg5: memref<1x160xf32, #tpu.memory_space<vmem>>, %arg6: memref<5x160x32xbf16, #tpu.memory_space<vmem>>, %arg7: memref<1x32xf32, #tpu.memory_space<vmem>>, %arg8: memref<1x32x128xbf16, #tpu.memory_space<vmem>>, %arg9: memref<1x128xf32, #tpu.memory_space<vmem>>, %arg10: memref<8x128xf32, #tpu.memory_space<vmem>>) attributes {dimension_semantics = [#tpu.dimension_semantics<parallel>], iteration_bounds = array<i64: 2>, scalar_prefetch = 0 : i64, scratch_operands = 0 : i64, tpu.core_type = #tpu.core_type<tc>, window_params = [{transform_indices = @transform_0, window_bounds = array<i64: 112, 576>}, {pipeline_mode = #tpu.pipeline_mode<synchronous>, transform_indices = @transform_1, window_bounds = array<i64: 576, 224>}, {pipeline_mode = #tpu.pipeline_mode<synchronous>, transform_indices = @transform_2, window_bounds = array<i64: 1, 224>}, {pipeline_mode = #tpu.pipeline_mode<synchronous>, transform_indices = @transform_3, window_bounds = array<i64: 5, 224, 160>}, {pipeline_mode = #tpu.pipeline_mode<synchronous>, transform_indices = @transform_4, window_bounds = array<i64: 1, 160>}, {pipeline_mode = #tpu.pipeline_mode<synchronous>, transform_indices = @transform_5, window_bounds = array<i64: 5, 160, 32>}, {pipeline_mode = #tpu.pipeline_mode<synchronous>, transform_indices = @transform_6, window_bounds = array<i64: 1, 32>}, {pipeline_mode = #tpu.pipeline_mode<synchronous>, transform_indices = @transform_7, window_bounds = array<i64: 1, 32, 128>}, {pipeline_mode = #tpu.pipeline_mode<synchronous>, transform_indices = @transform_8, window_bounds = array<i64: 1, 128>}, {transform_indices = @transform_9, window_bounds = array<i64: 8, 128>}]} {
    %c0 = arith.constant 0 : index
    %c0_0 = arith.constant 0 : index
    %0 = vector.load %arg1[%c0, %c0_0] : memref<112x576xbf16, #tpu.memory_space<vmem>>, vector<112x576xbf16>
    %c0_1 = arith.constant 0 : index
    %c0_2 = arith.constant 0 : index
    %1 = vector.load %arg2[%c0_1, %c0_2] : memref<576x224xbf16, #tpu.memory_space<vmem>>, vector<576x224xbf16>
    %cst = arith.constant dense<0.000000e+00> : vector<112x224xf32>
    %2 = tpu.matmul %0, %1, %cst {dimension_numbers = #tpu.dot_dimension_numbers<[1], [0], [0], [1], [0, 0, 1, 1], [], []>} : vector<112x576xbf16>, vector<576x224xbf16>, vector<112x224xf32> -> vector<112x224xf32>
    %c0_3 = arith.constant 0 : index
    %c0_4 = arith.constant 0 : index
    %3 = vector.load %arg3[%c0_3, %c0_4] : memref<1x224xf32, #tpu.memory_space<vmem>>, vector<1x224xf32>
    %4 = vector.broadcast %3 : vector<1x224xf32> to vector<112x224xf32>
    %5 = arith.addf %2, %4 : vector<112x224xf32>
    %cst_5 = arith.constant 0.000000e+00 : f32
    %6 = vector.broadcast %cst_5 : f32 to vector<112x224xf32>
    %7 = arith.maximumf %5, %6 : vector<112x224xf32>
    %8 = arith.truncf %7 : vector<112x224xf32> to vector<112x224xbf16>
    %cst_6 = arith.constant 0.000000e+00 : f32
    %9 = vector.broadcast %cst_6 : f32 to vector<40x160xf32>
    %10 = vector.extract_strided_slice %8 {offsets = [0, 0], sizes = [40, 224], strides = [1, 1]} : vector<112x224xbf16> to vector<40x224xbf16>
    %c0_7 = arith.constant 0 : index
    %c0_8 = arith.constant 0 : index
    %c0_9 = arith.constant 0 : index
    %11 = vector.load %arg4[%c0_7, %c0_8, %c0_9] : memref<5x224x160xbf16, #tpu.memory_space<vmem>>, vector<1x224x160xbf16>
    %12 = vector.shape_cast %11 : vector<1x224x160xbf16> to vector<224x160xbf16>
    %cst_10 = arith.constant dense<0.000000e+00> : vector<40x160xf32>
    %13 = tpu.matmul %10, %12, %cst_10 {dimension_numbers = #tpu.dot_dimension_numbers<[1], [0], [0], [1], [0, 0, 1, 1], [], []>} : vector<40x224xbf16>, vector<224x160xbf16>, vector<40x160xf32> -> vector<40x160xf32>
    %14 = arith.addf %9, %13 : vector<40x160xf32>
    %15 = vector.extract_strided_slice %8 {offsets = [56, 0], sizes = [40, 224], strides = [1, 1]} : vector<112x224xbf16> to vector<40x224xbf16>
    %c1 = arith.constant 1 : index
    %c0_11 = arith.constant 0 : index
    %c0_12 = arith.constant 0 : index
    %16 = vector.load %arg4[%c1, %c0_11, %c0_12] : memref<5x224x160xbf16, #tpu.memory_space<vmem>>, vector<1x224x160xbf16>
    %17 = vector.shape_cast %16 : vector<1x224x160xbf16> to vector<224x160xbf16>
    %cst_13 = arith.constant dense<0.000000e+00> : vector<40x160xf32>
    %18 = tpu.matmul %15, %17, %cst_13 {dimension_numbers = #tpu.dot_dimension_numbers<[1], [0], [0], [1], [0, 0, 1, 1], [], []>} : vector<40x224xbf16>, vector<224x160xbf16>, vector<40x160xf32> -> vector<40x160xf32>
    %19 = arith.addf %14, %18 : vector<40x160xf32>
    %20 = vector.extract_strided_slice %8 {offsets = [8, 0], sizes = [40, 224], strides = [1, 1]} : vector<112x224xbf16> to vector<40x224xbf16>
    %c2 = arith.constant 2 : index
    %c0_14 = arith.constant 0 : index
    %c0_15 = arith.constant 0 : index
    %21 = vector.load %arg4[%c2, %c0_14, %c0_15] : memref<5x224x160xbf16, #tpu.memory_space<vmem>>, vector<1x224x160xbf16>
    %22 = vector.shape_cast %21 : vector<1x224x160xbf16> to vector<224x160xbf16>
    %cst_16 = arith.constant dense<0.000000e+00> : vector<40x160xf32>
    %23 = tpu.matmul %20, %22, %cst_16 {dimension_numbers = #tpu.dot_dimension_numbers<[1], [0], [0], [1], [0, 0, 1, 1], [], []>} : vector<40x224xbf16>, vector<224x160xbf16>, vector<40x160xf32> -> vector<40x160xf32>
    %24 = arith.addf %19, %23 : vector<40x160xf32>
    %25 = vector.extract_strided_slice %8 {offsets = [64, 0], sizes = [40, 224], strides = [1, 1]} : vector<112x224xbf16> to vector<40x224xbf16>
    %c3 = arith.constant 3 : index
    %c0_17 = arith.constant 0 : index
    %c0_18 = arith.constant 0 : index
    %26 = vector.load %arg4[%c3, %c0_17, %c0_18] : memref<5x224x160xbf16, #tpu.memory_space<vmem>>, vector<1x224x160xbf16>
    %27 = vector.shape_cast %26 : vector<1x224x160xbf16> to vector<224x160xbf16>
    %cst_19 = arith.constant dense<0.000000e+00> : vector<40x160xf32>
    %28 = tpu.matmul %25, %27, %cst_19 {dimension_numbers = #tpu.dot_dimension_numbers<[1], [0], [0], [1], [0, 0, 1, 1], [], []>} : vector<40x224xbf16>, vector<224x160xbf16>, vector<40x160xf32> -> vector<40x160xf32>
    %29 = arith.addf %24, %28 : vector<40x160xf32>
    %30 = vector.extract_strided_slice %8 {offsets = [16, 0], sizes = [40, 224], strides = [1, 1]} : vector<112x224xbf16> to vector<40x224xbf16>
    %c4 = arith.constant 4 : index
    %c0_20 = arith.constant 0 : index
    %c0_21 = arith.constant 0 : index
    %31 = vector.load %arg4[%c4, %c0_20, %c0_21] : memref<5x224x160xbf16, #tpu.memory_space<vmem>>, vector<1x224x160xbf16>
    %32 = vector.shape_cast %31 : vector<1x224x160xbf16> to vector<224x160xbf16>
    %cst_22 = arith.constant dense<0.000000e+00> : vector<40x160xf32>
    %33 = tpu.matmul %30, %32, %cst_22 {dimension_numbers = #tpu.dot_dimension_numbers<[1], [0], [0], [1], [0, 0, 1, 1], [], []>} : vector<40x224xbf16>, vector<224x160xbf16>, vector<40x160xf32> -> vector<40x160xf32>
    %34 = arith.addf %29, %33 : vector<40x160xf32>
    %c0_23 = arith.constant 0 : index
    %c0_24 = arith.constant 0 : index
    %35 = vector.load %arg5[%c0_23, %c0_24] : memref<1x160xf32, #tpu.memory_space<vmem>>, vector<1x160xf32>
    %36 = vector.broadcast %35 : vector<1x160xf32> to vector<40x160xf32>
    %37 = arith.addf %34, %36 : vector<40x160xf32>
    %cst_25 = arith.constant 0.000000e+00 : f32
    %38 = vector.broadcast %cst_25 : f32 to vector<40x160xf32>
    %39 = arith.maximumf %37, %38 : vector<40x160xf32>
    %40 = arith.truncf %39 : vector<40x160xf32> to vector<40x160xbf16>
    %c0_26 = arith.constant 0 : index
    %c0_27 = arith.constant 0 : index
    %41 = vector.load %arg7[%c0_26, %c0_27] : memref<1x32xf32, #tpu.memory_space<vmem>>, vector<1x32xf32>
    %cst_28 = arith.constant 0.000000e+00 : f32
    %42 = vector.broadcast %cst_28 : f32 to vector<8x128xf32>
    %cst_29 = arith.constant 0.000000e+00 : f32
    %43 = vector.broadcast %cst_29 : f32 to vector<8x32xf32>
    %44 = vector.extract_strided_slice %40 {offsets = [0, 0], sizes = [8, 160], strides = [1, 1]} : vector<40x160xbf16> to vector<8x160xbf16>
    %c0_30 = arith.constant 0 : index
    %c0_31 = arith.constant 0 : index
    %c0_32 = arith.constant 0 : index
    %45 = vector.load %arg6[%c0_30, %c0_31, %c0_32] : memref<5x160x32xbf16, #tpu.memory_space<vmem>>, vector<1x160x32xbf16>
    %46 = vector.shape_cast %45 : vector<1x160x32xbf16> to vector<160x32xbf16>
    %cst_33 = arith.constant dense<0.000000e+00> : vector<8x32xf32>
    %47 = tpu.matmul %44, %46, %cst_33 {dimension_numbers = #tpu.dot_dimension_numbers<[1], [0], [0], [1], [0, 0, 1, 1], [], []>} : vector<8x160xbf16>, vector<160x32xbf16>, vector<8x32xf32> -> vector<8x32xf32>
    %48 = arith.addf %43, %47 : vector<8x32xf32>
    %49 = vector.extract_strided_slice %40 {offsets = [8, 0], sizes = [8, 160], strides = [1, 1]} : vector<40x160xbf16> to vector<8x160xbf16>
    %c1_34 = arith.constant 1 : index
    %c0_35 = arith.constant 0 : index
    %c0_36 = arith.constant 0 : index
    %50 = vector.load %arg6[%c1_34, %c0_35, %c0_36] : memref<5x160x32xbf16, #tpu.memory_space<vmem>>, vector<1x160x32xbf16>
    %51 = vector.shape_cast %50 : vector<1x160x32xbf16> to vector<160x32xbf16>
    %cst_37 = arith.constant dense<0.000000e+00> : vector<8x32xf32>
    %52 = tpu.matmul %49, %51, %cst_37 {dimension_numbers = #tpu.dot_dimension_numbers<[1], [0], [0], [1], [0, 0, 1, 1], [], []>} : vector<8x160xbf16>, vector<160x32xbf16>, vector<8x32xf32> -> vector<8x32xf32>
    %53 = arith.addf %48, %52 : vector<8x32xf32>
    %54 = vector.extract_strided_slice %40 {offsets = [16, 0], sizes = [8, 160], strides = [1, 1]} : vector<40x160xbf16> to vector<8x160xbf16>
    %c2_38 = arith.constant 2 : index
    %c0_39 = arith.constant 0 : index
    %c0_40 = arith.constant 0 : index
    %55 = vector.load %arg6[%c2_38, %c0_39, %c0_40] : memref<5x160x32xbf16, #tpu.memory_space<vmem>>, vector<1x160x32xbf16>
    %56 = vector.shape_cast %55 : vector<1x160x32xbf16> to vector<160x32xbf16>
    %cst_41 = arith.constant dense<0.000000e+00> : vector<8x32xf32>
    %57 = tpu.matmul %54, %56, %cst_41 {dimension_numbers = #tpu.dot_dimension_numbers<[1], [0], [0], [1], [0, 0, 1, 1], [], []>} : vector<8x160xbf16>, vector<160x32xbf16>, vector<8x32xf32> -> vector<8x32xf32>
    %58 = arith.addf %53, %57 : vector<8x32xf32>
    %59 = vector.extract_strided_slice %40 {offsets = [24, 0], sizes = [8, 160], strides = [1, 1]} : vector<40x160xbf16> to vector<8x160xbf16>
    %c3_42 = arith.constant 3 : index
    %c0_43 = arith.constant 0 : index
    %c0_44 = arith.constant 0 : index
    %60 = vector.load %arg6[%c3_42, %c0_43, %c0_44] : memref<5x160x32xbf16, #tpu.memory_space<vmem>>, vector<1x160x32xbf16>
    %61 = vector.shape_cast %60 : vector<1x160x32xbf16> to vector<160x32xbf16>
    %cst_45 = arith.constant dense<0.000000e+00> : vector<8x32xf32>
    %62 = tpu.matmul %59, %61, %cst_45 {dimension_numbers = #tpu.dot_dimension_numbers<[1], [0], [0], [1], [0, 0, 1, 1], [], []>} : vector<8x160xbf16>, vector<160x32xbf16>, vector<8x32xf32> -> vector<8x32xf32>
    %63 = arith.addf %58, %62 : vector<8x32xf32>
    %64 = vector.extract_strided_slice %40 {offsets = [32, 0], sizes = [8, 160], strides = [1, 1]} : vector<40x160xbf16> to vector<8x160xbf16>
    %c4_46 = arith.constant 4 : index
    %c0_47 = arith.constant 0 : index
    %c0_48 = arith.constant 0 : index
    %65 = vector.load %arg6[%c4_46, %c0_47, %c0_48] : memref<5x160x32xbf16, #tpu.memory_space<vmem>>, vector<1x160x32xbf16>
    %66 = vector.shape_cast %65 : vector<1x160x32xbf16> to vector<160x32xbf16>
    %cst_49 = arith.constant dense<0.000000e+00> : vector<8x32xf32>
    %67 = tpu.matmul %64, %66, %cst_49 {dimension_numbers = #tpu.dot_dimension_numbers<[1], [0], [0], [1], [0, 0, 1, 1], [], []>} : vector<8x160xbf16>, vector<160x32xbf16>, vector<8x32xf32> -> vector<8x32xf32>
    %68 = arith.addf %63, %67 : vector<8x32xf32>
    %69 = vector.broadcast %41 : vector<1x32xf32> to vector<8x32xf32>
    %70 = arith.addf %68, %69 : vector<8x32xf32>
    %cst_50 = arith.constant 0.000000e+00 : f32
    %71 = vector.broadcast %cst_50 : f32 to vector<8x32xf32>
    %72 = arith.maximumf %70, %71 : vector<8x32xf32>
    %73 = arith.truncf %72 : vector<8x32xf32> to vector<8x32xbf16>
    %c0_51 = arith.constant 0 : index
    %c0_52 = arith.constant 0 : index
    %c0_53 = arith.constant 0 : index
    %74 = vector.load %arg8[%c0_51, %c0_52, %c0_53] : memref<1x32x128xbf16, #tpu.memory_space<vmem>>, vector<1x32x128xbf16>
    %75 = vector.shape_cast %74 : vector<1x32x128xbf16> to vector<32x128xbf16>
    %cst_54 = arith.constant dense<0.000000e+00> : vector<8x128xf32>
    %76 = tpu.matmul %73, %75, %cst_54 {dimension_numbers = #tpu.dot_dimension_numbers<[1], [0], [0], [1], [0, 0, 1, 1], [], []>} : vector<8x32xbf16>, vector<32x128xbf16>, vector<8x128xf32> -> vector<8x128xf32>
    %77 = arith.addf %42, %76 : vector<8x128xf32>
    %c0_55 = arith.constant 0 : index
    %c0_56 = arith.constant 0 : index
    %78 = vector.load %arg9[%c0_55, %c0_56] : memref<1x128xf32, #tpu.memory_space<vmem>>, vector<1x128xf32>
    %79 = vector.broadcast %78 : vector<1x128xf32> to vector<8x128xf32>
    %80 = arith.addf %77, %79 : vector<8x128xf32>
    %c0_57 = arith.constant 0 : index
    %c0_58 = arith.constant 0 : index
    %81 = vector.load %arg10[%c0_57, %c0_58] : memref<8x128xf32, #tpu.memory_space<vmem>>, vector<8x128xf32>
    tpu.vector_store %arg10[%c0_57, %c0_58], %80 {strides = array<i32>} : memref<8x128xf32, #tpu.memory_space<vmem>>, vector<8x128xf32>,
    return
  }
  func.func @transform_0(%arg0: i32) -> (i32, i32) {
    %c0_i32 = arith.constant 0 : i32
    %c0_i32_0 = arith.constant 0 : i32
    return %arg0, %c0_i32 : i32, i32
  }
  func.func @transform_1(%arg0: i32) -> (i32, i32) {
    %c0_i32 = arith.constant 0 : i32
    %c0_i32_0 = arith.constant 0 : i32
    %c0_i32_1 = arith.constant 0 : i32
    return %c0_i32, %c0_i32_0 : i32, i32
  }
  func.func @transform_2(%arg0: i32) -> (i32, i32) {
    %c0_i32 = arith.constant 0 : i32
    %c0_i32_0 = arith.constant 0 : i32
    %c0_i32_1 = arith.constant 0 : i32
    return %c0_i32, %c0_i32_0 : i32, i32
  }
  func.func @transform_3(%arg0: i32) -> (i32, i32, i32) {
    %c0_i32 = arith.constant 0 : i32
    %c0_i32_0 = arith.constant 0 : i32
    %c0_i32_1 = arith.constant 0 : i32
    %c0_i32_2 = arith.constant 0 : i32
    return %c0_i32, %c0_i32_0, %c0_i32_1 : i32, i32, i32
  }
  func.func @transform_4(%arg0: i32) -> (i32, i32) {
    %c0_i32 = arith.constant 0 : i32
    %c0_i32_0 = arith.constant 0 : i32
    %c0_i32_1 = arith.constant 0 : i32
    return %c0_i32, %c0_i32_0 : i32, i32
  }
  func.func @transform_5(%arg0: i32) -> (i32, i32, i32) {
    %c0_i32 = arith.constant 0 : i32
    %c0_i32_0 = arith.constant 0 : i32
    %c0_i32_1 = arith.constant 0 : i32
    %c0_i32_2 = arith.constant 0 : i32
    return %c0_i32, %c0_i32_0, %c0_i32_1 : i32, i32, i32
  }
  func.func @transform_6(%arg0: i32) -> (i32, i32) {
    %c0_i32 = arith.constant 0 : i32
    %c0_i32_0 = arith.constant 0 : i32
    %c0_i32_1 = arith.constant 0 : i32
    return %c0_i32, %c0_i32_0 : i32, i32
  }
  func.func @transform_7(%arg0: i32) -> (i32, i32, i32) {
    %c0_i32 = arith.constant 0 : i32
    %c0_i32_0 = arith.constant 0 : i32
    %c0_i32_1 = arith.constant 0 : i32
    %c0_i32_2 = arith.constant 0 : i32
    return %c0_i32, %c0_i32_0, %c0_i32_1 : i32, i32, i32
  }
  func.func @transform_8(%arg0: i32) -> (i32, i32) {
    %c0_i32 = arith.constant 0 : i32
    %c0_i32_0 = arith.constant 0 : i32
    %c0_i32_1 = arith.constant 0 : i32
    return %c0_i32, %c0_i32_0 : i32, i32
  }
  func.func @transform_9(%arg0: i32) -> (i32, i32) {
    %c0_i32 = arith.constant 0 : i32
    %c0_i32_0 = arith.constant 0 : i32
    return %arg0, %c0_i32 : i32, i32
  }
}

</mosaic_0001>

<bundles_post_ra>
// kernel: dqn_forward.1
= control target key start
LH: loop header
LB: loop body
LE: loop exit
PB: predicated region body
PF: predicated region fallthrough
CT: control target
= control target key end

     0   :  { %s7849_s0 = inlined_call_operand.vmem [shape: bf16[224,576], index: 0, kind: input, shape index: {}]   ;;  %s7850_s1 = inlined_call_operand.vmem [shape: bf16[576,224], index: 1, kind: input, shape index: {}]   ;;  %s7851_s2 = inlined_call_operand.vmem [shape: f32[1,224], index: 2, kind: input, shape index: {}]   ;;  %s7852_s3 = inlined_call_operand.vmem [shape: bf16[5,224,160], index: 3, kind: input, shape index: {}]   ;;  %s7853_s4 = inlined_call_operand.vmem [shape: f32[1,160], index: 4, kind: input, shape index: {}]   ;;  %s7854_s5 = inlined_call_operand.vmem [shape: bf16[5,160,32], index: 5, kind: input, shape index: {}]   ;;  %s7855_s6 = inlined_call_operand.vmem [shape: f32[1,32], index: 6, kind: input, shape index: {}]   ;;  %s7856_s7 = inlined_call_operand.vmem [shape: bf16[1,32,128], index: 7, kind: input, shape index: {}]   ;;  %s7857_s8 = inlined_call_operand.vmem [shape: f32[1,128], index: 8, kind: input, shape index: {}]   ;;  %s7858_s9 = inlined_call_operand.hbm [shape: f32[16,128], index: 9, kind: output, shape index: {}]  }
   0x1   :  { %7859 = sst [smem:[#allocation8_spill]] %s7849_s0 }
   0x2   :  { %14 = vsyncpa [#allocation3], 0 }
   0x3   :  { %16 = vsyncpa [#allocation3 + $0x1], 0  ;;  %s5577_s30 = smov 0   ;;  %s5579_s10 = smov 0  }
   0x4   :  { %s5581_s11 = smov 0   ;;  %s5583_s12 = smov 0  }
   0x5 LB: > { %s5598_s13 = sadd.s32 4294967295, %s5525_s12   ;;  %s3674_s14 = sadd.s32 4294967294, %s5525_s12   ;;  %s5525_s12 = sphi %s5583_s12, %s7872_s12   ;;  %s5521_s11 = sphi %s5581_s11, %s7871_s11   ;;  %s5517_s10 = sphi %s5579_s10, %s7870_s10   ;;  %s5513_s30 = sphi %s5577_s30, %s7869_s30  }
   0x6   : > { %s5602_s15 = sadd.s32 1, %s5525_s12   ;;  %s223_s16 = sadd.s32 1, %s5521_s11 }
   0x7   : > { %s220_s17 = ssub.s32 %s5525_s12, %s5602_s15  ;;  %p233_p0 = scmp.ne.s32.totalorder %s5521_s11, %s5517_s10 }
   0x8   : > { %p221_p1 = scmp.eq.s32.totalorder %s220_s17, 0  ;;  %p234_p2 = scmp.eq.s32.totalorder %s5598_s13, 1 }
   0x9   : > { %p239_p3 = scmp.ne.s32.totalorder %s5517_s10, %s5513_s30  ;;  %p240_p4 = scmp.eq.s32.totalorder %s3674_s14, 1 }
   0xa   : > { %s5613_s18 = scalar_select %p221_p1, %s5521_s11, %s223_s16  }
   0xb   : > { %p5615_p5 = por %p234_p2, %p233_p0  ;;  %p5619_p6 = por %p240_p4, %p239_p3 }
   0xc   : > { %p3677_p7 = scmp.ge.s32.totalorder %s5525_s12, 1  ;;  %p292_p8 = scmp.lt.s32.totalorder %s5525_s12, 3 }
   0xe   : > { %p293_p9 = pnand %p3677_p7, %p292_p8 }
  0x10   : > { %296 = sbr.rel (%p293_p9) target bundleno = 1190 (0x4a6), region = 56 }
  0x15   : > { %v3878_v0 = vld [vmem:[%s7850_s1 + $0x70] sm:$0xf]  ;;  %v5172_v1 = vld [vmem:[%s7850_s1 + $0x74] sm:$0xf0]  ;;  %v3870_v11 = vld [vmem:[%s7850_s1 + $0x60] sm:$0xf] }
  0x16   : > { %v3942_v2 = vld [vmem:[%s7850_s1 + $0xf0] sm:$0xf]  ;;  %v3879_v3 = vor.u32 %v5172_v1, %v3878_v0  ;;  %v5188_v4 = vld [vmem:[%s7850_s1 + $0xf4] sm:$0xf0]  ;;  %v5170_v13 = vld [vmem:[%s7850_s1 + $0x64] sm:$0xf0] }
  0x17   : > { %v4006_v5 = vld [vmem:[%s7850_s1 + $0x170] sm:$0xf]  ;;  %v5204_v6 = vld [vmem:[%s7850_s1 + $0x174] sm:$0xf0]  ;;  %v3943_v7 = vor.u32 %v5188_v4, %v3942_v2  ;;  %v3934_v14 = vld [vmem:[%s7850_s1 + $0xe0] sm:$0xf]  ;;  %v3871_v16 = vor.u32 %v5170_v13, %v3870_v11 }
  0x18   : > { %v4007_v8 = vor.u32 %v5204_v6, %v4006_v5  ;;  %v4070_v9 = vld [vmem:[%s7850_s1 + $0x1f0] sm:$0xf]  ;;  %v5220_v10 = vld [vmem:[%s7850_s1 + $0x1f4] sm:$0xf0]  ;;  %1014 = vmatpush.bf16.msra.mxu0 %v3879_v3  ;;  %v5186_v15 = vld [vmem:[%s7850_s1 + $0xe4] sm:$0xf0] }
  0x19   : > { %v4071_v12 = vor.u32 %v5220_v10, %v4070_v9  ;;  %1057 = vmatpush.bf16.msra.mxu1 %v3943_v7  ;;  %v3935_v17 = vor.u32 %v5186_v15, %v3934_v14  ;;  %v3998_v18 = vld [vmem:[%s7850_s1 + $0x160] sm:$0xf]  ;;  %v5202_v19 = vld [vmem:[%s7850_s1 + $0x164] sm:$0xf0]  ;;  %v3862_v23 = vld [vmem:[%s7850_s1 + $0x50] sm:$0xf] }
  0x1a   : > { %1100 = vmatpush.bf16.msra.mxu2 %v4007_v8  ;;  %v4062_v20 = vld [vmem:[%s7850_s1 + $0x1e0] sm:$0xf]  ;;  %v3999_v21 = vor.u32 %v5202_v19, %v3998_v18  ;;  %v5218_v22 = vld [vmem:[%s7850_s1 + $0x1e4] sm:$0xf0]  ;;  %v5168_v24 = vld [vmem:[%s7850_s1 + $0x54] sm:$0xf0] }
  0x1b   : > { %1143 = vmatpush.bf16.msra.mxu3 %v4071_v12  ;;  %v4063_v25 = vor.u32 %v5218_v22, %v4062_v20  ;;  %v3926_v26 = vld [vmem:[%s7850_s1 + $0xd0] sm:$0xf]  ;;  %v5184_v27 = vld [vmem:[%s7850_s1 + $0xd4] sm:$0xf0]  ;;  %v3863_v29 = vor.u32 %v5168_v24, %v3862_v23  ;;  %v3854_v35 = vld [vmem:[%s7850_s1 + $0x40] sm:$0xf] }
  0x1c   : > { %v3990_v28 = vld [vmem:[%s7850_s1 + $0x150] sm:$0xf]  ;;  %1015 = vmatpush.bf16.msra.mxu0 %v3871_v16  ;;  %v5200_v30 = vld [vmem:[%s7850_s1 + $0x154] sm:$0xf0]  ;;  %v3927_v33 = vor.u32 %v5184_v27, %v3926_v26  ;;  %v5166_v36 = vld [vmem:[%s7850_s1 + $0x44] sm:$0xf0] }
  0x1d   : > { %v4054_v31 = vld [vmem:[%s7850_s1 + $0x1d0] sm:$0xf]  ;;  %v5216_v32 = vld [vmem:[%s7850_s1 + $0x1d4] sm:$0xf0]  ;;  %1058 = vmatpush.bf16.msra.mxu1 %v3935_v17  ;;  %v3991_v34 = vor.u32 %v5200_v30, %v3990_v28  ;;  %v3918_v37 = vld [vmem:[%s7850_s1 + $0xc0] sm:$0xf]  ;;  %v3855_v44 = vor.u32 %v5166_v36, %v3854_v35 }
  0x1e   : > { %1101 = vmatpush.bf16.msra.mxu2 %v3999_v21  ;;  %v4055_v38 = vor.u32 %v5216_v32, %v4054_v31  ;;  %v5182_v39 = vld [vmem:[%s7850_s1 + $0xc4] sm:$0xf0]  ;;  %v3982_v40 = vld [vmem:[%s7850_s1 + $0x140] sm:$0xf]  ;;  %v3846_v47 = vld [vmem:[%s7850_s1 + $0x30] sm:$0xf] }
  0x1f   : > { %1144 = vmatpush.bf16.msra.mxu3 %v4063_v25  ;;  %v5198_v41 = vld [vmem:[%s7850_s1 + $0x144] sm:$0xf0]  ;;  %v4046_v42 = vld [vmem:[%s7850_s1 + $0x1c0] sm:$0xf]  ;;  %v3919_v45 = vor.u32 %v5182_v39, %v3918_v37  ;;  %v5164_v48 = vld [vmem:[%s7850_s1 + $0x34] sm:$0xf0] }
  0x20   : > { %v5214_v43 = vld [vmem:[%s7850_s1 + $0x1c4] sm:$0xf0]  ;;  %1016 = vmatpush.bf16.msra.mxu0 %v3863_v29  ;;  %v3983_v46 = vor.u32 %v5198_v41, %v3982_v40  ;;  %v3910_v49 = vld [vmem:[%s7850_s1 + $0xb0] sm:$0xf]  ;;  %v5180_v51 = vld [vmem:[%s7850_s1 + $0xb4] sm:$0xf0]  ;;  %v3847_v56 = vor.u32 %v5164_v48, %v3846_v47 }
  0x21   : > { %1059 = vmatpush.bf16.msra.mxu1 %v3927_v33  ;;  %v4047_v50 = vor.u32 %v5214_v43, %v4046_v42  ;;  %v3974_v52 = vld [vmem:[%s7850_s1 + $0x130] sm:$0xf]  ;;  %v5196_v53 = vld [vmem:[%s7850_s1 + $0x134] sm:$0xf0]  ;;  %v3911_v57 = vor.u32 %v5180_v51, %v3910_v49  ;;  %v3838_v59 = vld [vmem:[%s7850_s1 + $0x20] sm:$0xf] }
  0x22   : > { %1102 = vmatpush.bf16.msra.mxu2 %v3991_v34  ;;  %v4038_v54 = vld [vmem:[%s7850_s1 + $0x1b0] sm:$0xf]  ;;  %v5212_v55 = vld [vmem:[%s7850_s1 + $0x1b4] sm:$0xf0]  ;;  %v3975_v58 = vor.u32 %v5196_v53, %v3974_v52  ;;  %v5162_v60 = vld [vmem:[%s7850_s1 + $0x24] sm:$0xf0] }
  0x23   : > { %1145 = vmatpush.bf16.msra.mxu3 %v4055_v38  ;;  %v3902_v61 = vld [vmem:[%s7850_s1 + $0xa0] sm:$0xf]  ;;  %v4039_v62 = vor.u32 %v5212_v55, %v4038_v54  ;;  %v5178_v63 = vld [vmem:[%s7850_s1 + $0xa4] sm:$0xf0]  ;;  %v3839_v4 = vor.u32 %v5162_v60, %v3838_v59  ;;  %v3830_v5 = vld [vmem:[%s7850_s1 + $0x10] sm:$0xf] }
  0x24   : > { %1017 = vmatpush.bf16.msra.mxu0 %v3855_v44  ;;  %v3966_v0 = vld [vmem:[%s7850_s1 + $0x120] sm:$0xf]  ;;  %v5194_v1 = vld [vmem:[%s7850_s1 + $0x124] sm:$0xf0]  ;;  %v5160_v6 = vld [vmem:[%s7850_s1 + $0x14] sm:$0xf0]  ;;  %v3903_v7 = vor.u32 %v5178_v63, %v3902_v61 }
  0x25   : > { %1060 = vmatpush.bf16.msra.mxu1 %v3919_v45  ;;  %v4030_v2 = vld [vmem:[%s7850_s1 + $0x1a0] sm:$0xf]  ;;  %v5210_v3 = vld [vmem:[%s7850_s1 + $0x1a4] sm:$0xf0]  ;;  %v3967_v8 = vor.u32 %v5194_v1, %v3966_v0  ;;  %v3894_v9 = vld [vmem:[%s7850_s1 + $0x90] sm:$0xf]  ;;  %v3831_v18 = vor.u32 %v5160_v6, %v3830_v5 }
  0x26   : > { %1103 = vmatpush.bf16.msra.mxu2 %v3983_v46  ;;  %v5176_v10 = vld [vmem:[%s7850_s1 + $0x94] sm:$0xf0]  ;;  %v3958_v11 = vld [vmem:[%s7850_s1 + $0x110] sm:$0xf]  ;;  %v4031_v12 = vor.u32 %v5210_v3, %v4030_v2  ;;  %s329_s23 = smul.u32 14, %s5598_s13  ;;  %s7862_s0 = sld [smem:[#allocation8_spill]] }
  0x27   : > { %1146 = vmatpush.bf16.msra.mxu3 %v4047_v50  ;;  %v5192_v13 = vld [vmem:[%s7850_s1 + $0x114] sm:$0xf0]  ;;  %v4022_v14 = vld [vmem:[%s7850_s1 + $0x190] sm:$0xf]  ;;  %v3822_v16 = vld [vmem:[%s7850_s1] sm:$0xf]  ;;  %v3895_v21 = vor.u32 %v5176_v10, %v3894_v9 }
  0x28   : > { %1018 = vmatpush.bf16.msra.mxu0 %v3847_v56  ;;  %v5208_v15 = vld [vmem:[%s7850_s1 + $0x194] sm:$0xf0]  ;;  %v5158_v17 = vld [vmem:[%s7850_s1 + $0x4] sm:$0xf0]  ;;  %v3886_v19 = vld [vmem:[%s7850_s1 + $0x80] sm:$0xf]  ;;  %v3959_v22 = vor.u32 %v5192_v13, %v3958_v11 }
  0x29   : > { %1061 = vmatpush.bf16.msra.mxu1 %v3911_v57  ;;  %v5174_v20 = vld [vmem:[%s7850_s1 + $0x84] sm:$0xf0]  ;;  %p330_p10 = scmp.lt.s32.totalorder %s329_s23, 27  ;;  %v3950_v23 = vld [vmem:[%s7850_s1 + $0x100] sm:$0xf]  ;;  %v4023_v26 = vor.u32 %v5208_v15, %v4022_v14  ;;  %v3823_v30 = vor.u32 %v5158_v17, %v3822_v16  ;;  %vm992_vm0 = vcmask 523264  }
  0x2a   : > { %1104 = vmatpush.bf16.msra.mxu2 %v3975_v58  ;;  %v5190_v24 = vld [vmem:[%s7850_s1 + $0x104] sm:$0xf0]  ;;  %v4014_v25 = vld [vmem:[%s7850_s1 + $0x180] sm:$0xf]  ;;  %v4102_v28 = vld [vmem:[%s7850_s1 + $0x230] sm:$0xf]  ;;  %v3887_v33 = vor.u32 %v5174_v20, %v3886_v19 }
  0x2b   : > { %1147 = vmatpush.bf16.msra.mxu3 %v4039_v62  ;;  %v5206_v27 = vld [vmem:[%s7850_s1 + $0x184] sm:$0xf0]  ;;  %s7874_s23 = smov (!%p330_p10, %s329_s23), 27  ;;  %v5228_v29 = vld [vmem:[%s7850_s1 + $0x234] sm:$0xf0]  ;;  %v3951_v34 = vor.u32 %v5190_v24, %v3950_v23  ;;  %vm1704_vm1 = vcmask 785408  }
  0x2c   : > { %1019 = vmatpush.bf16.msra.mxu0 %v3839_v4  ;;  %s5421_s24 = smul.u32 20, %s7874_s23  ;;  %v5171_v31 = vld [vmem:[%s7850_s1 + $0x74] sm:$0xf]  ;;  %v3880_v32 = vld [vmem:[%s7850_s1 + $0x78] sm:$0xf0]  ;;  %v4015_v35 = vor.u32 %v5206_v27, %v4014_v25  ;;  %v4103_v36 = vor.u32 %v5228_v29, %v4102_v28  ;;  %vm3080_vm2 = vcmask 261120  }
  0x2d   : > { %1062 = vmatpush.bf16.msra.mxu1 %v3903_v7  ;;  %v5169_v37 = vld [vmem:[%s7850_s1 + $0x64] sm:$0xf]  ;;  %v3872_v38 = vld [vmem:[%s7850_s1 + $0x68] sm:$0xf0]  ;;  %v4094_v39 = vld [vmem:[%s7850_s1 + $0x220] sm:$0xf]  ;;  %v3883_v44 = vor.u32 %v5171_v31, %v3880_v32 }
  0x2e   : > { %1105 = vmatpush.bf16.msra.mxu2 %v3967_v8  ;;  %s5833_s16 = scalar_lea.vmem %s7862_s0, %s5421_s24  ;;  %v5226_v40 = vld [vmem:[%s7850_s1 + $0x224] sm:$0xf0]  ;;  %v3875_v55 = vor.u32 %v5169_v37, %v3872_v38  ;;  %v5167_v56 = vld [vmem:[%s7850_s1 + $0x54] sm:$0xf]  ;;  %v3864_v57 = vld [vmem:[%s7850_s1 + $0x58] sm:$0xf0] }
  0x2f   : > { %1148 = vmatpush.bf16.msra.mxu3 %v4031_v12  ;;  %v3682_v41 = vld [vmem:[%s5833_s16] sm:$0xf]  ;;  %v5124_v42 = vld [vmem:[%s5833_s16 + $0x10] sm:$0xf0]  ;;  %v5122_v43 = vld [vmem:[%s5833_s16 + $0x4] sm:$0xf]  ;;  %v4095_v54 = vor.u32 %v5226_v40, %v4094_v39  ;;  %v3867_v58 = vor.u32 %v5167_v56, %v3864_v57 }
  0x30   : > { %1020 = vmatpush.bf16.msra.mxu0 %v3831_v18  ;;  %v5850_v45 = vor.u32 %v5124_v42, %v3682_v41  ;;  %v3684_v46 = vld [vmem:[%s5833_s16 + $0x14] sm:$0xf0]  ;;  %v3690_v47 = vld [vmem:[%s5833_s16 + $0x8] sm:$0xf]  ;;  %v5125_v48 = vld [vmem:[%s5833_s16 + $0x18] sm:$0xf0] }
  0x31   : > { %1063 = vmatpush.bf16.msra.mxu1 %v3895_v21  ;;  %v5855_v49 = vor.u32 %v5122_v43, %v3684_v46  ;;  %v5857_v50 = vor.u32 %v5125_v48, %v3690_v47  ;;  %v5123_v51 = vld [vmem:[%s5833_s16 + $0xc] sm:$0xf]  ;;  %v3692_v52 = vld [vmem:[%s5833_s16 + $0x1c] sm:$0xf0]  ;;  %v5165_v59 = vld [vmem:[%s7850_s1 + $0x44] sm:$0xf] }
  0x32   : > { %1106 = vmatpush.bf16.msra.mxu2 %v3959_v22  ;;  %v5861_v53 = vor.u32 %v5123_v51, %v3692_v52  ;;  %v3856_v60 = vld [vmem:[%s7850_s1 + $0x48] sm:$0xf0]  ;;  %v3702_v62 = vld [vmem:[%s5833_s16 + $0x28] sm:$0xf]  ;;  %v5129_v63 = vld [vmem:[%s5833_s16 + $0x38] sm:$0xf0] }
  0x33   : > { %1149 = vmatpush.bf16.msra.mxu3 %v4023_v26  ;;  %v3859_v61 = vor.u32 %v5165_v59, %v3856_v60  ;;  %v5127_v0 = vld [vmem:[%s5833_s16 + $0x2c] sm:$0xf]  ;;  %v3704_v1 = vld [vmem:[%s5833_s16 + $0x3c] sm:$0xf0]  ;;  %v3710_v2 = vld [vmem:[%s5833_s16 + $0x30] sm:$0xf]  ;;  %v5887_v6 = vor.u32 %v5129_v63, %v3702_v62 }
  0x34   : > { %1021 = vmatpush.bf16.msra.mxu0 %v3823_v30  ;;  %v5130_v3 = vld [vmem:[%s5833_s16 + $0x40] sm:$0xf0]  ;;  %v5128_v4 = vld [vmem:[%s5833_s16 + $0x34] sm:$0xf]  ;;  %v3712_v5 = vld [vmem:[%s5833_s16 + $0x44] sm:$0xf0]  ;;  %v5889_v7 = vor.u32 %v5127_v0, %v3704_v1 }
  0x35   : > { %1064 = vmatpush.bf16.msra.mxu1 %v3887_v33  ;;  %v5891_v8 = vor.u32 %v5130_v3, %v3710_v2  ;;  %v5893_v9 = vor.u32 %v5128_v4, %v3712_v5  ;;  %v4086_v10 = vld [vmem:[%s7850_s1 + $0x210] sm:$0xf]  ;;  %v5224_v11 = vld [vmem:[%s7850_s1 + $0x214] sm:$0xf0]  ;;  %v5163_v12 = vld [vmem:[%s7850_s1 + $0x34] sm:$0xf] }
  0x36   : > { %1107 = vmatpush.bf16.msra.mxu2 %v3951_v34  ;;  %v4087_v13 = vor.u32 %v5224_v11, %v4086_v10  ;;  %v3848_v14 = vld [vmem:[%s7850_s1 + $0x38] sm:$0xf0]  ;;  %v3722_v16 = vld [vmem:[%s5833_s16 + $0x50] sm:$0xf]  ;;  %v5134_v17 = vld [vmem:[%s5833_s16 + $0x60] sm:$0xf0] }
  0x37   : > { %1150 = vmatpush.bf16.msra.mxu3 %v4015_v35  ;;  %1022 = vmatmul.bf16.vlgmr.msra.gmra.mxu0 %v5850_v45  ;;  %v3851_v15 = vor.u32 %v5163_v12, %v3848_v14  ;;  %v5132_v18 = vld [vmem:[%s5833_s16 + $0x54] sm:$0xf]  ;;  %v3724_v19 = vld [vmem:[%s5833_s16 + $0x64] sm:$0xf0]  ;;  %v3730_v20 = vld [vmem:[%s5833_s16 + $0x58] sm:$0xf]  ;;  %v5919_v24 = vor.u32 %v5134_v17, %v3722_v16 }
  0x38   : > { %1190 = vmatpush.bf16.msrb.mxu0 %v4103_v36  ;;  %1065 = vmatmul.bf16.vlgmr.msra.gmra.mxu1 %v5855_v49  ;;  %v5135_v21 = vld [vmem:[%s5833_s16 + $0x68] sm:$0xf0]  ;;  %v5133_v22 = vld [vmem:[%s5833_s16 + $0x5c] sm:$0xf]  ;;  %v3732_v23 = vld [vmem:[%s5833_s16 + $0x6c] sm:$0xf0]  ;;  %v5921_v25 = vor.u32 %v5132_v18, %v3724_v19 }
  0x39   : > { %1229 = vmatpush.bf16.msrb.mxu1 %v3883_v44  ;;  %1108 = vmatmul.bf16.vlgmr.msra.gmra.mxu2 %v5857_v50  ;;  %v5923_v26 = vor.u32 %v5135_v21, %v3730_v20  ;;  %v5925_v27 = vor.u32 %v5133_v22, %v3732_v23  ;;  %v5161_v28 = vld [vmem:[%s7850_s1 + $0x24] sm:$0xf]  ;;  %v3840_v29 = vld [vmem:[%s7850_s1 + $0x28] sm:$0xf0]  ;;  %v3742_v31 = vld [vmem:[%s5833_s16 + $0x78] sm:$0xf] }
  0x3a   : > { %1151 = vmatmul.bf16.vlgmr.msra.gmra.mxu3 %v5861_v53  ;;  %v3843_v30 = vor.u32 %v5161_v28, %v3840_v29  ;;  %v5139_v32 = vld [vmem:[%s5833_s16 + $0x88] sm:$0xf0]  ;;  %v5137_v33 = vld [vmem:[%s5833_s16 + $0x7c] sm:$0xf]  ;;  %v3744_v34 = vld [vmem:[%s5833_s16 + $0x8c] sm:$0xf0] }
  0x3b   : > { %v3750_v35 = vld [vmem:[%s5833_s16 + $0x80] sm:$0xf]  ;;  %v5140_v36 = vld [vmem:[%s5833_s16 + $0x90] sm:$0xf0]  ;;  %v5138_v37 = vld [vmem:[%s5833_s16 + $0x84] sm:$0xf]  ;;  %v5945_v39 = vor.u32 %v5139_v32, %v3742_v31  ;;  %v5947_v40 = vor.u32 %v5137_v33, %v3744_v34 }
  0x3c   : > { %1191 = vmatpush.bf16.msrb.mxu0 %v4095_v54  ;;  %v3752_v38 = vld [vmem:[%s5833_s16 + $0x94] sm:$0xf0]  ;;  %v5949_v41 = vor.u32 %v5140_v36, %v3750_v35  ;;  %v5187_v43 = vld [vmem:[%s7850_s1 + $0xf4] sm:$0xf]  ;;  %v3944_v44 = vld [vmem:[%s7850_s1 + $0xf8] sm:$0xf0] }
  0x3d   : > { %1230 = vmatpush.bf16.msrb.mxu1 %v3875_v55  ;;  %v5951_v42 = vor.u32 %v5138_v37, %v3752_v38  ;;  %v3947_v46 = vor.u32 %v5187_v43, %v3944_v44  ;;  %v5203_v47 = vld [vmem:[%s7850_s1 + $0x174] sm:$0xf]  ;;  %v4008_v48 = vld [vmem:[%s7850_s1 + $0x178] sm:$0xf0]  ;;  %v4078_v52 = vld [vmem:[%s7850_s1 + $0x200] sm:$0xf] }
  0x3e   : > { %v4011_v51 = vor.u32 %v5203_v47, %v4008_v48  ;;  %v5222_v54 = vld [vmem:[%s7850_s1 + $0x204] sm:$0xf0]  ;;  %v5185_v55 = vld [vmem:[%s7850_s1 + $0xe4] sm:$0xf]  ;;  %v3936_v57 = vld [vmem:[%s7850_s1 + $0xe8] sm:$0xf0] }
  0x3f   : > { %1272 = vmatpush.bf16.msrb.mxu2 %v3947_v46  ;;  %v4079_v56 = vor.u32 %v5222_v54, %v4078_v52  ;;  %v3832_v59 = vld [vmem:[%s7850_s1 + $0x18] sm:$0xf0]  ;;  %v3939_v60 = vor.u32 %v5185_v55, %v3936_v57  ;;  %v5201_v62 = vld [vmem:[%s7850_s1 + $0x164] sm:$0xf]  ;;  %v4000_v63 = vld [vmem:[%s7850_s1 + $0x168] sm:$0xf0] }
  0x40   : > { %1192 = vmatpush.bf16.msrb.mxu0 %v4087_v13  ;;  %1315 = vmatpush.bf16.msrb.mxu3 %v4011_v51  ;;  %v5183_v0 = vld [vmem:[%s7850_s1 + $0xd4] sm:$0xf]  ;;  %v4003_v1 = vor.u32 %v5201_v62, %v4000_v63  ;;  %v3928_v2 = vld [vmem:[%s7850_s1 + $0xd8] sm:$0xf0]  ;;  %v5181_v10 = vld [vmem:[%s7850_s1 + $0xc4] sm:$0xf] }
  0x41   : > { %1231 = vmatpush.bf16.msrb.mxu1 %v3867_v58  ;;  %v5159_v58 = vld [vmem:[%s7850_s1 + $0x14] sm:$0xf]  ;;  %v3992_v4 = vld [vmem:[%s7850_s1 + $0x158] sm:$0xf0]  ;;  %v3931_v5 = vor.u32 %v5183_v0, %v3928_v2  ;;  %v3920_v11 = vld [vmem:[%s7850_s1 + $0xc8] sm:$0xf0] }
  0x42   : > { %v5199_v3 = vld [vmem:[%s7850_s1 + $0x154] sm:$0xf]  ;;  %v3762_v12 = vld [vmem:[%s5833_s16 + $0xa0] sm:$0xf]  ;;  %v5197_v16 = vld [vmem:[%s7850_s1 + $0x144] sm:$0xf]  ;;  %v3923_v21 = vor.u32 %v5181_v10, %v3920_v11 }
  0x43   : > { %1273 = vmatpush.bf16.msrb.mxu2 %v3939_v60  ;;  %v5144_v13 = vld [vmem:[%s5833_s16 + $0xb0] sm:$0xf0]  ;;  %v3995_v14 = vor.u32 %v5199_v3, %v3992_v4  ;;  %v3984_v17 = vld [vmem:[%s7850_s1 + $0x148] sm:$0xf0]  ;;  %v3764_v18 = vld [vmem:[%s5833_s16 + $0xb4] sm:$0xf0] }
  0x44   : > { %1193 = vmatpush.bf16.msrb.mxu0 %v4079_v56  ;;  %1316 = vmatpush.bf16.msrb.mxu3 %v4003_v1  ;;  %v3770_v19 = vld [vmem:[%s5833_s16 + $0xa8] sm:$0xf]  ;;  %v5145_v20 = vld [vmem:[%s5833_s16 + $0xb8] sm:$0xf0]  ;;  %v5143_v22 = vld [vmem:[%s5833_s16 + $0xac] sm:$0xf]  ;;  %v6025_v28 = vor.u32 %v5144_v13, %v3762_v12  ;;  %v3987_v29 = vor.u32 %v5197_v16, %v3984_v17 }
  0x45   : > { %1232 = vmatpush.bf16.msrb.mxu1 %v3859_v61  ;;  %v3835_v61 = vor.u32 %v5159_v58, %v3832_v59  ;;  %v3772_v23 = vld [vmem:[%s5833_s16 + $0xbc] sm:$0xf0]  ;;  %v6029_v31 = vor.u32 %v5145_v20, %v3770_v19  ;;  %v5179_v33 = vld [vmem:[%s7850_s1 + $0xb4] sm:$0xf]  ;;  %v3912_v34 = vld [vmem:[%s7850_s1 + $0xb8] sm:$0xf0] }
  0x46   : > { %v6031_v32 = vor.u32 %v5143_v22, %v3772_v23  ;;  %v3915_v35 = vor.u32 %v5179_v33, %v3912_v34  ;;  %v5195_v36 = vld [vmem:[%s7850_s1 + $0x134] sm:$0xf]  ;;  %v3976_v37 = vld [vmem:[%s7850_s1 + $0x138] sm:$0xf0]  ;;  %v5157_v43 = vld [vmem:[%s7850_s1 + $0x4] sm:$0xf] }
  0x47   : > { %1027 = vmatmul.bf16.gmra.mxu0 %v5887_v6  ;;  %1274 = vmatpush.bf16.msrb.mxu2 %v3931_v5  ;;  %v3979_v38 = vor.u32 %v5195_v36, %v3976_v37  ;;  %v3824_v44 = vld [vmem:[%s7850_s1 + $0x8] sm:$0xf0]  ;;  %v5177_v46 = vld [vmem:[%s7850_s1 + $0xa4] sm:$0xf]  ;;  %v5175_v56 = vld [vmem:[%s7850_s1 + $0x94] sm:$0xf] }
  0x48   : > { %1070 = vmatmul.bf16.gmra.mxu1 %v5889_v7  ;;  %1317 = vmatpush.bf16.msrb.mxu3 %v3995_v14  ;;  %v3827_v47 = vor.u32 %v5157_v43, %v3824_v44  ;;  %v3904_v48 = vld [vmem:[%s7850_s1 + $0xa8] sm:$0xf0]  ;;  %v5193_v51 = vld [vmem:[%s7850_s1 + $0x124] sm:$0xf]  ;;  %v3896_v57 = vld [vmem:[%s7850_s1 + $0x98] sm:$0xf0] }
  0x49   : > { %1113 = vmatmul.bf16.gmra.mxu2 %v5891_v8  ;;  %1233 = vmatpush.bf16.msrb.mxu1 %v3851_v15  ;;  %v5142_v15 = vld [vmem:[%s5833_s16 + $0xa4] sm:$0xf]  ;;  %v3968_v52 = vld [vmem:[%s7850_s1 + $0x128] sm:$0xf0]  ;;  %v3907_v54 = vor.u32 %v5177_v46, %v3904_v48  ;;  %v5191_v58 = vld [vmem:[%s7850_s1 + $0x114] sm:$0xf]  ;;  %v3899_v60 = vor.u32 %v5175_v56, %v3896_v57 }
  0x4a   : > { %1156 = vmatmul.bf16.gmra.mxu3 %v5893_v9  ;;  %v3971_v55 = vor.u32 %v5193_v51, %v3968_v52  ;;  %v3960_v59 = vld [vmem:[%s7850_s1 + $0x118] sm:$0xf0]  ;;  %v3888_v62 = vld [vmem:[%s7850_s1 + $0x88] sm:$0xf0]  ;;  %v3782_v63 = vld [vmem:[%s5833_s16 + $0xc8] sm:$0xf] }
  0x4b   : > { %1275 = vmatpush.bf16.msrb.mxu2 %v3923_v21  ;;  %v5149_v0 = vld [vmem:[%s5833_s16 + $0xd8] sm:$0xf0]  ;;  %v3963_v1 = vor.u32 %v5191_v58, %v3960_v59  ;;  %v5147_v2 = vld [vmem:[%s5833_s16 + $0xcc] sm:$0xf]  ;;  %v5189_v3 = vld [vmem:[%s7850_s1 + $0x104] sm:$0xf] }
  0x4c   : > { %1318 = vmatpush.bf16.msrb.mxu3 %v3987_v29  ;;  %v3952_v4 = vld [vmem:[%s7850_s1 + $0x108] sm:$0xf0]  ;;  %v3784_v5 = vld [vmem:[%s5833_s16 + $0xdc] sm:$0xf0]  ;;  %v3790_v10 = vld [vmem:[%s5833_s16 + $0xd0] sm:$0xf] }
  0x4d   : > { %1234 = vmatpush.bf16.msrb.mxu1 %v3843_v30  ;;  %v6027_v30 = vor.u32 %v5142_v15, %v3764_v18  ;;  %v5150_v11 = vld [vmem:[%s5833_s16 + $0xe0] sm:$0xf0]  ;;  %v5148_v13 = vld [vmem:[%s5833_s16 + $0xd4] sm:$0xf]  ;;  %v3792_v14 = vld [vmem:[%s5833_s16 + $0xe4] sm:$0xf0]  ;;  %v6099_v15 = vor.u32 %v5149_v0, %v3782_v63  ;;  %v3955_v16 = vor.u32 %v5189_v3, %v3952_v4  ;;  %v6101_v17 = vor.u32 %v5147_v2, %v3784_v5 }
  0x4e   : > { %v6103_v18 = vor.u32 %v5150_v11, %v3790_v10  ;;  %v6105_v19 = vor.u32 %v5148_v13, %v3792_v14  ;;  %v5219_v20 = vld [vmem:[%s7850_s1 + $0x1f4] sm:$0xf]  ;;  %v4072_v21 = vld [vmem:[%s7850_s1 + $0x1f8] sm:$0xf0]  ;;  %v3802_v34 = vld [vmem:[%s5833_s16 + $0xf0] sm:$0xf] }
  0x4f   : > { %1276 = vmatpush.bf16.msrb.mxu2 %v3915_v35  ;;  %v4075_v22 = vor.u32 %v5219_v20, %v4072_v21  ;;  %v5227_v23 = vld [vmem:[%s7850_s1 + $0x234] sm:$0xf]  ;;  %v4104_v29 = vld [vmem:[%s7850_s1 + $0x238] sm:$0xf0]  ;;  %v5154_v35 = vld [vmem:[%s5833_s16 + $0x100] sm:$0xf0] }
  0x50   : > { %1319 = vmatpush.bf16.msrb.mxu3 %v3979_v38  ;;  %v4107_v33 = vor.u32 %v5227_v23, %v4104_v29  ;;  %v5152_v36 = vld [vmem:[%s5833_s16 + $0xf4] sm:$0xf]  ;;  %v3804_v37 = vld [vmem:[%s5833_s16 + $0x104] sm:$0xf0]  ;;  %v3810_v38 = vld [vmem:[%s5833_s16 + $0xf8] sm:$0xf] }
  0x51   : > { %1235 = vmatpush.bf16.msrb.mxu1 %v3835_v61  ;;  %v5173_v61 = vld [vmem:[%s7850_s1 + $0x84] sm:$0xf]  ;;  %1358 = vmatpush.bf16.msra.mxu0 %v4075_v22  ;;  %v5155_v43 = vld [vmem:[%s5833_s16 + $0x108] sm:$0xf0]  ;;  %v5153_v44 = vld [vmem:[%s5833_s16 + $0xfc] sm:$0xf]  ;;  %v6133_v48 = vor.u32 %v5152_v36, %v3804_v37 }
  0x52   : > { %v3891_v12 = vor.u32 %v5173_v61, %v3888_v62  ;;  %v3812_v46 = vld [vmem:[%s5833_s16 + $0x10c] sm:$0xf0]  ;;  %v6135_v51 = vor.u32 %v5155_v43, %v3810_v38  ;;  %v5126_v58 = vld [vmem:[%s5833_s16 + $0x20] sm:$0xf0]  ;;  %v4056_v61 = vld [vmem:[%s7850_s1 + $0x1d8] sm:$0xf0] }
  0x53   : > { %1277 = vmatpush.bf16.msrb.mxu2 %v3907_v54  ;;  %v6137_v52 = vor.u32 %v5153_v44, %v3812_v46  ;;  %v5217_v54 = vld [vmem:[%s7850_s1 + $0x1e4] sm:$0xf]  ;;  %v3698_v57 = vld [vmem:[%s5833_s16 + $0x10] sm:$0xf]  ;;  %v4096_v0 = vld [vmem:[%s7850_s1 + $0x228] sm:$0xf0] }
  0x54   : > { %1320 = vmatpush.bf16.msrb.mxu3 %v3971_v55  ;;  %v4064_v55 = vld [vmem:[%s7850_s1 + $0x1e8] sm:$0xf0]  ;;  %v6151_v59 = vor.u32 %v5126_v58, %v3698_v57  ;;  %v5225_v63 = vld [vmem:[%s7850_s1 + $0x224] sm:$0xf]  ;;  %v6173_v2 = vld [vmem:[%s7851_s2] sm:$0x3] }
  0x55   : > { %1236 = vmatpush.bf16.msrb.mxu1 %v3827_v47  ;;  %v6131_v47 = vor.u32 %v5154_v35, %v3802_v34  ;;  %v4067_v56 = vor.u32 %v5217_v54, %v4064_v55  ;;  %v5213_v3 = vld [vmem:[%s7850_s1 + $0x1c4] sm:$0xf]  ;;  %v3718_v4 = vld [vmem:[%s5833_s16 + $0x38] sm:$0xf]  ;;  %v5211_v35 = vld [vmem:[%s7850_s1 + $0x1b4] sm:$0xf] }
  0x56   : > { %v5136_v36 = vld [vmem:[%s5833_s16 + $0x70] sm:$0xf0]  ;;  %v4088_v38 = vld [vmem:[%s7850_s1 + $0x218] sm:$0xf0]  ;;  %s326_s27 = sand.u32 1, %s5517_s10   ;;  %s5119_s28 = sshll.u32 %s5598_s13, 3 }
  0x57   : > { %1032 = vmatmul.bf16.gmra.mxu0 %v5919_v24  ;;  %1278 = vmatpush.bf16.msrb.mxu2 %v3899_v60  ;;  %v5215_v60 = vld [vmem:[%s7850_s1 + $0x1d4] sm:$0xf]  ;;  %s3678_s29 = sshll.u32 %s326_s27, 3  ;;  %s3610_s23 = scalar_lea.hbm %s7858_s9, %s5119_s28 }
  0x58   : > { %1075 = vmatmul.bf16.gmra.mxu1 %v5921_v25  ;;  %1321 = vmatpush.bf16.msrb.mxu3 %v3963_v1  ;;  %v4059_v62 = vor.u32 %v5215_v60, %v4056_v61  ;;  %v4099_v1 = vor.u32 %v5225_v63, %v4096_v0  ;;  %s328_s22 = scalar_lea.vmem [#allocation2], %s3678_s29  ;;  %s3614_s26 = sshll.u32 %s3610_s23, 4  ;;  %s3615_s26 = int_to_ptr.hbm [resolvable:$true] %s3614_s26 }
  0x59   : > { %1118 = vmatmul.bf16.gmra.mxu2 %v5923_v26  ;;  %1405 = vmatpush.bf16.msra.mxu1 %v4107_v33  ;;  %s3612_s25 = sshll.u32 %s328_s22, 4  ;;  %s3600_s24 = scalar_lea.sflag [#allocation3], %s326_s27  ;;  %s3613_s25 = int_to_ptr.vmem [resolvable:$true] %s3612_s25 }
  0x5a   : > { %1161 = vmatmul.bf16.gmra.mxu3 %v5925_v27  ;;  %1359 = vmatpush.bf16.msra.mxu0 %v4067_v56  ;;  %s5477_s13 = sshra.s32 %s3615_s26, 4  ;;  %s5478_s13 = int_to_ptr.hbm [resolvable:$true] %s5477_s13 }
  0x5b   : > { %1279 = vmatpush.bf16.msrb.mxu2 %v3891_v12  ;;  %s5479_s0 = scalar_lea.hbm %s5478_s13, 8  ;;  %p5484_p0 = scmp.lt.s32.totalorder %s5478_s13, %s7858_s9 }
  0x5c   : > { %1322 = vmatpush.bf16.msrb.mxu3 %v3955_v16  ;;  %p5480_p11 = scmp.ne.s32.totalorder %s5478_s13, %s5479_s0 }
  0x5d   : > { %1406 = vmatpush.bf16.msra.mxu1 %v4099_v1 }
  0x5e   : > { %1360 = vmatpush.bf16.msra.mxu0 %v4059_v62  ;;  %p5481_p12 = pnand %p5480_p11, %p5615_p5 }
  0x60   : > { %p5482_p13 = pneg %p5481_p12 }
  0x67   : > { %1037 = vmatmul.bf16.gmra.mxu0 %v5945_v39 }
  0x68   : > { %1080 = vmatmul.bf16.gmra.mxu1 %v5947_v40 }
  0x69   : > { %1123 = vmatmul.bf16.gmra.mxu2 %v5949_v41 }
  0x6a   : > { %1166 = vmatmul.bf16.gmra.mxu3 %v5951_v42 }
  0x77   : > { %1042 = vmatmul.bf16.gmra.mxu0 %v6025_v28 }
  0x78   : > { %1085 = vmatmul.bf16.gmra.mxu1 %v6027_v30 }
  0x79   : > { %1128 = vmatmul.bf16.gmra.mxu2 %v6029_v31 }
  0x7a   : > { %1171 = vmatmul.bf16.gmra.mxu3 %v6031_v32 }
  0x87   : > { %1047 = vmatmul.bf16.gmra.mxu0 %v6099_v15 }
  0x88   : > { %1090 = vmatmul.bf16.gmra.mxu1 %v6101_v17 }
  0x89   : > { %1133 = vmatmul.bf16.gmra.mxu2 %v6103_v18 }
  0x8a   : > { %1176 = vmatmul.bf16.gmra.mxu3 %v6105_v19 }
  0x97   : > { %1052 = vmatmul.bf16.gmra.mxu0 %v6131_v47 }
  0x98   : > { %1095 = vmatmul.bf16.gmra.mxu1 %v6133_v48 }
  0x99   : > { %1138 = vmatmul.bf16.gmra.mxu2 %v6135_v51 }
  0x9a   : > { %1181 = vmatmul.bf16.gmra.mxu3 %v6137_v52 }
  0xa7   : > { %4108 = vmatmul.msk.bf16.vlgmr.msrb.gmra.mxu0 %vm992_vm0, %v6151_v59 }
  0xa8   : > { %1237 = vmatmul.bf16.vlgmr.msrb.gmra.mxu1 %v5850_v45  ;;  %v4048_v45 = vld [vmem:[%s7850_s1 + $0x1c8] sm:$0xf0] }
  0xa9   : > { %1280 = vmatmul.bf16.vlgmr.msrb.gmra.mxu2 %v5855_v49  ;;  %v5131_v49 = vld [vmem:[%s5833_s16 + $0x48] sm:$0xf0]  ;;  %v4051_v5 = vor.u32 %v5213_v3, %v4048_v45 }
  0xaa   : > { %1323 = vmatmul.bf16.vlgmr.msrb.gmra.mxu3 %v5857_v50  ;;  %v6184_v50 = vperm.slane %v6173_v2, 0  ;;  %v6186_v10 = vor.u32 %v5131_v49, %v3718_v4 }
  0xab   : > { %1361 = vmatpush.bf16.msra.mxu0 %v4051_v5  ;;  %v5209_v5 = vld [vmem:[%s7850_s1 + $0x1a4] sm:$0xf] }
  0xb4   : > { %v1023_v11 = vpop.f32.mrf.mxu0 }
  0xb5   : > { %v1024_v12 = vadd.f32 %v1023_v11, %v6184_v50  ;;  %v1066_v13 = vpop.f32.mrf.mxu1 }
  0xb7   : > { %v1067_v14 = vadd.f32 %v1066_v13, %v1024_v12  ;;  %4109 = vmatmul.msk.bf16.gmra.mxu0 %vm992_vm0, %v6186_v10 }
  0xb8   : > { %1242 = vmatmul.bf16.gmra.mxu1 %v5887_v6  ;;  %v4040_v6 = vld [vmem:[%s7850_s1 + $0x1b8] sm:$0xf0] }
  0xb9   : > { %1285 = vmatmul.bf16.gmra.mxu2 %v5889_v7  ;;  %v5223_v7 = vld [vmem:[%s7850_s1 + $0x214] sm:$0xf]  ;;  %v4043_v37 = vor.u32 %v5211_v35, %v4040_v6 }
  0xba   : > { %1328 = vmatmul.bf16.gmra.mxu3 %v5891_v8  ;;  %v3738_v8 = vld [vmem:[%s5833_s16 + $0x60] sm:$0xf]  ;;  %v4091_v43 = vor.u32 %v5223_v7, %v4088_v38 }
  0xbb   : > { %1362 = vmatpush.bf16.msra.mxu0 %v4043_v37  ;;  %v6211_v46 = vor.u32 %v5136_v36, %v3738_v8  ;;  %v5207_v8 = vld [vmem:[%s7850_s1 + $0x194] sm:$0xf]  ;;  %v4024_v36 = vld [vmem:[%s7850_s1 + $0x198] sm:$0xf0] }
  0xbc   : > { %v1109_v16 = vpop.f32.mrf.mxu2  ;;  %v1025_v21 = vpop.f32.mrf.mxu0  ;;  %1407 = vmatpush.bf16.msra.mxu1 %v4091_v43  ;;  %v5221_v43 = vld [vmem:[%s7850_s1 + $0x204] sm:$0xf] }
  0xbd   : > { %v1110_v20 = vadd.f32 %v1109_v16, %v1067_v14  ;;  %v1152_v22 = vpop.f32.mrf.mxu3  ;;  %v1026_v23 = vadd.f32 %v1025_v21, %v6184_v50  ;;  %v1068_v29 = vpop.f32.mrf.mxu1 }
  0xbf   : > { %v6195_v33 = vadd.f32 %v1152_v22, %v1110_v20  ;;  %v1069_v34 = vadd.f32 %v1068_v29, %v1026_v23 }
  0xc4   : > { %v1111_v44 = vpop.f32.mrf.mxu2  ;;  %v1028_v55 = vpop.f32.mrf.mxu0 }
  0xc5   : > { %v1112_v54 = vadd.f32 %v1111_v44, %v1069_v34  ;;  %v1154_v56 = vpop.f32.mrf.mxu3  ;;  %v1029_v57 = vadd.f32 %v1028_v55, %v6184_v50  ;;  %v1071_v58 = vpop.f32.mrf.mxu1  ;;  %v4080_v44 = vld [vmem:[%s7850_s1 + $0x208] sm:$0xf0]  ;;  %v5146_v55 = vld [vmem:[%s5833_s16 + $0xc0] sm:$0xf0] }
  0xc7   : > { %v6214_v60 = vadd.f32 %v1154_v56, %v1112_v54  ;;  %v1072_v61 = vadd.f32 %v1071_v58, %v1029_v57  ;;  %4110 = vmatmul.msk.bf16.gmra.mxu0 %vm992_vm0, %v6211_v46  ;;  %v3778_v54 = vld [vmem:[%s5833_s16 + $0xb0] sm:$0xf]  ;;  %v4083_v56 = vor.u32 %v5221_v43, %v4080_v44  ;;  %v3818_v44 = vld [vmem:[%s5833_s16 + $0x100] sm:$0xf] }
  0xc8   : > { %1247 = vmatmul.bf16.gmra.mxu1 %v5919_v24  ;;  %v4032_v24 = vld [vmem:[%s7850_s1 + $0x1a8] sm:$0xf0]  ;;  %v6263_v58 = vor.u32 %v5146_v55, %v3778_v54  ;;  %v5156_v54 = vld [vmem:[%s5833_s16 + $0x110] sm:$0xf0] }
  0xc9   : > { %1290 = vmatmul.bf16.gmra.mxu2 %v5921_v25  ;;  %v3758_v25 = vld [vmem:[%s5833_s16 + $0x88] sm:$0xf]  ;;  %v4035_v11 = vor.u32 %v5209_v5, %v4032_v24  ;;  %1408 = vmatpush.bf16.msra.mxu1 %v4083_v56 }
  0xca   : > { %1333 = vmatmul.bf16.gmra.mxu3 %v5923_v26  ;;  %v5141_v26 = vld [vmem:[%s5833_s16 + $0x98] sm:$0xf0] }
  0xcb   : > { %1363 = vmatpush.bf16.msra.mxu0 %v4035_v11  ;;  %v6232_v13 = vor.u32 %v5141_v26, %v3758_v25 }
  0xcc   : > { %v1114_v62 = vpop.f32.mrf.mxu2  ;;  %v1030_v0 = vpop.f32.mrf.mxu0 }
  0xcd   : > { %v1115_v63 = vadd.f32 %v1114_v62, %v1072_v61  ;;  %v1157_v1 = vpop.f32.mrf.mxu3  ;;  %v1031_v3 = vadd.f32 %v1030_v0, %v6184_v50  ;;  %v1073_v45 = vpop.f32.mrf.mxu1 }
  0xcf   : > { %v6222_v4 = vadd.f32 %v1157_v1, %v1115_v63  ;;  %v1074_v49 = vadd.f32 %v1073_v45, %v1031_v3  ;;  %v5205_v3 = vld [vmem:[%s7850_s1 + $0x184] sm:$0xf]  ;;  %v4016_v45 = vld [vmem:[%s7850_s1 + $0x188] sm:$0xf0] }
  0xd4   : > { %v1116_v12 = vpop.f32.mrf.mxu2  ;;  %v1033_v16 = vpop.f32.mrf.mxu0 }
  0xd5   : > { %v1117_v14 = vadd.f32 %v1116_v12, %v1074_v49  ;;  %v1159_v20 = vpop.f32.mrf.mxu3  ;;  %v1034_v21 = vadd.f32 %v1033_v16, %v6184_v50  ;;  %v1076_v22 = vpop.f32.mrf.mxu1  ;;  %v4019_v49 = vor.u32 %v5205_v3, %v4016_v45  ;;  %v3798_v12 = vld [vmem:[%s5833_s16 + $0xd8] sm:$0xf] }
  0xd7   : > { %v6235_v23 = vadd.f32 %v1159_v20, %v1117_v14  ;;  %v1077_v29 = vadd.f32 %v1076_v22, %v1034_v21  ;;  %4111 = vmatmul.msk.bf16.gmra.mxu0 %vm992_vm0, %v6232_v13  ;;  %v5151_v14 = vld [vmem:[%s5833_s16 + $0xe8] sm:$0xf0]  ;;  %s5483_s16 = scalar_lea.hbm %s7858_s9, 16 }
  0xd8   : > { %1252 = vmatmul.bf16.gmra.mxu1 %v5945_v39  ;;  %v6288_v20 = vor.u32 %v5151_v14, %v3798_v12  ;;  %p5485_p1 = scmp.lt.s32.totalorder %s5483_s16, %s5479_s0 }
  0xd9   : > { %1295 = vmatmul.bf16.gmra.mxu2 %v5947_v40  ;;  %v4027_v40 = vor.u32 %v5207_v8, %v4024_v36 }
  0xda   : > { %1338 = vmatmul.bf16.gmra.mxu3 %v5949_v41  ;;  %p5486_p2 = por %p5485_p1, %p5484_p0 }
  0xdb   : > { %1364 = vmatpush.bf16.msra.mxu0 %v4027_v40 }
  0xdc   : > { %v1119_v34 = vpop.f32.mrf.mxu2  ;;  %v1035_v6 = vpop.f32.mrf.mxu0  ;;  %p5487_p3 = pnand %p5486_p2, %p5482_p13 }
  0xdd   : > { %v1120_v35 = vadd.f32 %v1119_v34, %v1077_v29  ;;  %v1162_v7 = vpop.f32.mrf.mxu3  ;;  %v1036_v39 = vadd.f32 %v1035_v6, %v6184_v50  ;;  %v1078_v37 = vpop.f32.mrf.mxu1 }
  0xdf   : > { %v6249_v38 = vadd.f32 %v1162_v7, %v1120_v35  ;;  %v6251_v41 = vadd.f32 %v1078_v37, %v1036_v39  ;;  %1365 = vmatpush.bf16.msra.mxu0 %v4019_v49 }
  0xe4   : > { %v6261_v57 = vpop.f32.mrf.mxu2  ;;  %v1038_v61 = vpop.f32.mrf.mxu0 }
  0xe5   : > { %v6265_v62 = vpop.f32.mrf.mxu3  ;;  %v1039_v63 = vadd.f32 %v1038_v61, %v6184_v50  ;;  %v1081_v0 = vpop.f32.mrf.mxu1 }
  0xe7   : > { %v1082_v1 = vadd.f32 %v1081_v0, %v1039_v63  ;;  %4112 = vmatmul.msk.bf16.gmra.mxu0 %vm992_vm0, %v6263_v58 }
  0xe8   : > { %1257 = vmatmul.bf16.gmra.mxu1 %v6025_v28 }
  0xe9   : > { %1300 = vmatmul.bf16.gmra.mxu2 %v6027_v30 }
  0xea   : > { %1343 = vmatmul.bf16.gmra.mxu3 %v6029_v31 }
  0xec   : > { %v1124_v5 = vpop.f32.mrf.mxu2  ;;  %v1040_v25 = vpop.f32.mrf.mxu0 }
  0xed   : > { %v1125_v24 = vadd.f32 %v1124_v5, %v1082_v1  ;;  %v1167_v26 = vpop.f32.mrf.mxu3  ;;  %v1041_v28 = vadd.f32 %v1040_v25, %v6184_v50  ;;  %v1083_v11 = vpop.f32.mrf.mxu1 }
  0xef   : > { %v6280_v30 = vadd.f32 %v1167_v26, %v1125_v24  ;;  %v6282_v31 = vadd.f32 %v1083_v11, %v1041_v28 }
  0xf4   : > { %v6286_v16 = vpop.f32.mrf.mxu2  ;;  %v1043_v21 = vpop.f32.mrf.mxu0 }
  0xf5   : > { %v6290_v22 = vpop.f32.mrf.mxu3  ;;  %v1044_v29 = vadd.f32 %v1043_v21, %v6184_v50  ;;  %v1086_v34 = vpop.f32.mrf.mxu1 }
  0xf7   : > { %v1087_v35 = vadd.f32 %v1086_v34, %v1044_v29  ;;  %4113 = vmatmul.msk.bf16.gmra.mxu0 %vm992_vm0, %v6288_v20 }
  0xf8   : > { %1262 = vmatmul.bf16.gmra.mxu1 %v6099_v15  ;;  %v6307_v15 = vor.u32 %v5156_v54, %v3818_v44 }
  0xf9   : > { %1305 = vmatmul.bf16.gmra.mxu2 %v6101_v17 }
  0xfa   : > { %1348 = vmatmul.bf16.gmra.mxu3 %v6103_v18 }
  0xfc   : > { %v1129_v6 = vpop.f32.mrf.mxu2  ;;  %v1045_v8 = vpop.f32.mrf.mxu0 }
  0xfd   : > { %v1130_v7 = vadd.f32 %v1129_v6, %v1087_v35  ;;  %v1172_v36 = vpop.f32.mrf.mxu3  ;;  %v1046_v39 = vadd.f32 %v1045_v8, %v6184_v50  ;;  %v1088_v37 = vpop.f32.mrf.mxu1 }
  0xff   : > { %v6299_v40 = vadd.f32 %v1172_v36, %v1130_v7  ;;  %v6301_v43 = vadd.f32 %v1088_v37, %v1046_v39  ;;  %v6336_v39 = vperm.slane %v6173_v2, 1 }
 0x104   : > { %v6305_v55 = vpop.f32.mrf.mxu2  ;;  %v1048_v17 = vpop.f32.mrf.mxu0 }
 0x105   : > { %v6309_v56 = vpop.f32.mrf.mxu3  ;;  %v1049_v18 = vadd.f32 %v1048_v17, %v6184_v50  ;;  %v1091_v61 = vpop.f32.mrf.mxu1 }
 0x107   : > { %v1092_v63 = vadd.f32 %v1091_v61, %v1049_v18  ;;  %4114 = vmatmul.msk.bf16.gmra.mxu0 %vm992_vm0, %v6307_v15 }
 0x108   : > { %1267 = vmatmul.bf16.gmra.mxu1 %v6131_v47 }
 0x109   : > { %1310 = vmatmul.bf16.gmra.mxu2 %v6133_v48 }
 0x10a   : > { %1353 = vmatmul.bf16.gmra.mxu3 %v6135_v51 }
 0x10c   : > { %v1134_v0 = vpop.f32.mrf.mxu2  ;;  %v1050_v3 = vpop.f32.mrf.mxu0 }
 0x10d   : > { %v1135_v1 = vadd.f32 %v1134_v0, %v1092_v63  ;;  %v1177_v45 = vpop.f32.mrf.mxu3  ;;  %v1051_v49 = vadd.f32 %v1050_v3, %v6184_v50  ;;  %v1093_v5 = vpop.f32.mrf.mxu1 }
 0x10f   : > { %v6318_v24 = vadd.f32 %v1177_v45, %v1135_v1  ;;  %v6320_v25 = vadd.f32 %v1093_v5, %v1051_v49 }
 0x114   : > { %v6322_v26 = vpop.f32.mrf.mxu2  ;;  %v1053_v28 = vpop.f32.mrf.mxu0 }
 0x115   : > { %v6324_v11 = vpop.f32.mrf.mxu3  ;;  %v1054_v47 = vadd.f32 %v1053_v28, %v6184_v50  ;;  %v1096_v48 = vpop.f32.mrf.mxu1 }
 0x116   : > { %7863 = vst [vmem:[#allocation5_spill] sm:$0xff] %v6324_v11 }
 0x117   : > { %v1097_v51 = vadd.f32 %v1096_v48, %v1054_v47  ;;  %1366 = vmatmul.bf16.vlgmr.msra.gmra.mxu0 %v5861_v53 }
 0x118   : > { %4115 = vmatmul.msk.bf16.vlgmr.msra.gmra.mxu1 %vm992_vm0, %v6151_v59 }
 0x11c   : > { %v1139_v12 = vpop.f32.mrf.mxu2  ;;  %v1055_v21 = vpop.f32.mrf.mxu0 }
 0x11d   : > { %v1140_v14 = vadd.f32 %v1139_v12, %v1097_v51  ;;  %v1182_v29 = vpop.f32.mrf.mxu3  ;;  %v1098_v34 = vpop.f32.mrf.mxu1 }
 0x11f   : > { %v6330_v35 = vadd.f32 %v1182_v29, %v1140_v14 }
 0x124   : > { %v1141_v6 = vpop.f32.mrf.mxu2  ;;  %v1195_v8 = vpop.f32.mrf.mxu0 }
 0x125   : > { %v1184_v7 = vpop.f32.mrf.mxu3  ;;  %v6333_v36 = vadd.f32 %v1195_v8, %v6195_v33  ;;  %v1238_v50 = vpop.f32.mrf.mxu1  ;;  %v4256_v6 = vld [vmem:[%s7852_s3 + $0x1b0] sm:$0xf] }
 0x126   : > { %v1239_v53 = vadd.f32 %v1238_v50, %v6336_v39  ;;  %v5284_v7 = vld [vmem:[%s7852_s3 + $0x1b4] sm:$0xf0] }
 0x127   : > { %1371 = vmatmul.bf16.gmra.mxu0 %v5893_v9  ;;  %v4257_v8 = vor.u32 %v5284_v7, %v4256_v6 }
 0x128   : > { %4116 = vmatmul.msk.bf16.gmra.mxu1 %vm992_vm0, %v6186_v10 }
 0x129   : > { %1739 = vmatpush.bf16.msra.mxu3 %v4257_v8 }
 0x12c   : > { %v1281_v59 = vpop.f32.mrf.mxu2  ;;  %v1197_v44 = vpop.f32.mrf.mxu0 }
 0x12d   : > { %v1282_v37 = vadd.f32 %v1281_v59, %v1239_v53  ;;  %v1324_v54 = vpop.f32.mrf.mxu3  ;;  %v6343_v17 = vadd.f32 %v1197_v44, %v6214_v60  ;;  %v6345_v33 = vpop.f32.mrf.mxu1 }
 0x12f   : > { %v6347_v18 = vadd.f32 %v1324_v54, %v1282_v37 }
 0x134   : > { %v6349_v2 = vpop.f32.mrf.mxu2  ;;  %v1200_v61 = vpop.f32.mrf.mxu0 }
 0x135   : > { %v6351_v9 = vpop.f32.mrf.mxu3  ;;  %v6354_v10 = vadd.f32 %v1200_v61, %v6222_v4  ;;  %v1243_v63 = vpop.f32.mrf.mxu1 }
 0x136   : > { %v1244_v60 = vadd.f32 %v1243_v63, %v6336_v39 }
 0x137   : > { %1376 = vmatmul.bf16.gmra.mxu0 %v5925_v27 }
 0x138   : > { %4117 = vmatmul.msk.bf16.gmra.mxu1 %vm992_vm0, %v6211_v46 }
 0x13c   : > { %v1286_v0 = vpop.f32.mrf.mxu2  ;;  %v1202_v3 = vpop.f32.mrf.mxu0 }
 0x13d   : > { %v1287_v1 = vadd.f32 %v1286_v0, %v1244_v60  ;;  %v1329_v45 = vpop.f32.mrf.mxu3  ;;  %v6361_v49 = vadd.f32 %v1202_v3, %v6235_v23  ;;  %v6363_v5 = vpop.f32.mrf.mxu1 }
 0x13f   : > { %v6365_v28 = vadd.f32 %v1329_v45, %v1287_v1 }
 0x144   : > { %v6367_v4 = vpop.f32.mrf.mxu2  ;;  %v1205_v47 = vpop.f32.mrf.mxu0 }
 0x145   : > { %v6369_v27 = vpop.f32.mrf.mxu3  ;;  %v6372_v46 = vadd.f32 %v1205_v47, %v6249_v38  ;;  %v1248_v48 = vpop.f32.mrf.mxu1  ;;  %v4208_v38 = vld [vmem:[%s7852_s3 + $0x150] sm:$0xf] }
 0x146   : > { %v1249_v23 = vadd.f32 %v1248_v48, %v6336_v39 }
 0x147   : > { %1381 = vmatmul.bf16.gmra.mxu0 %v5951_v42  ;;  %v5272_v42 = vld [vmem:[%s7852_s3 + $0x154] sm:$0xf0] }
 0x148   : > { %4118 = vmatmul.msk.bf16.gmra.mxu1 %vm992_vm0, %v6232_v13  ;;  %v4209_v13 = vor.u32 %v5272_v42, %v4208_v38 }
 0x14a   : > { %1714 = vmatpush.bf16.msra.mxu2 %v4209_v13 }
 0x14c   : > { %v1291_v51 = vpop.f32.mrf.mxu2  ;;  %v6378_v14 = vpop.f32.mrf.mxu0 }
 0x14d   : > { %v1292_v12 = vadd.f32 %v1291_v51, %v1249_v23  ;;  %v1334_v21 = vpop.f32.mrf.mxu3  ;;  %v6380_v29 = vpop.f32.mrf.mxu1 }
 0x14f   : > { %v6382_v34 = vadd.f32 %v1334_v21, %v1292_v12  ;;  %v4248_v12 = vld [vmem:[%s7852_s3 + $0x1a0] sm:$0xf]  ;;  %v5282_v21 = vld [vmem:[%s7852_s3 + $0x1a4] sm:$0xf0] }
 0x150   : > { %v4249_v38 = vor.u32 %v5282_v21, %v4248_v12  ;;  %v4376_v21 = vld [vmem:[%s7852_s3 + $0xd8] sm:$0xf0] }
 0x152   : > { %1740 = vmatpush.bf16.msra.mxu3 %v4249_v38 }
 0x154   : > { %v6396_v50 = vpop.f32.mrf.mxu2  ;;  %v1210_v53 = vpop.f32.mrf.mxu0 }
 0x155   : > { %v6398_v59 = vpop.f32.mrf.mxu3  ;;  %v6401_v37 = vadd.f32 %v1210_v53, %v6280_v30  ;;  %v1253_v44 = vpop.f32.mrf.mxu1  ;;  %v4200_v30 = vld [vmem:[%s7852_s3 + $0x140] sm:$0xf] }
 0x156   : > { %v1254_v54 = vadd.f32 %v1253_v44, %v6336_v39  ;;  %v4320_v44 = vld [vmem:[%s7852_s3 + $0x68] sm:$0xf0] }
 0x157   : > { %1386 = vmatmul.bf16.gmra.mxu0 %v6031_v32  ;;  %v5270_v32 = vld [vmem:[%s7852_s3 + $0x144] sm:$0xf0] }
 0x158   : > { %4119 = vmatmul.msk.bf16.gmra.mxu1 %vm992_vm0, %v6263_v58  ;;  %v4201_v58 = vor.u32 %v5270_v32, %v4200_v30  ;;  %v5268_v30 = vld [vmem:[%s7852_s3 + $0x134] sm:$0xf0]  ;;  %v5239_v32 = vld [vmem:[%s7852_s3 + $0x54] sm:$0xf] }
 0x15a   : > { %1715 = vmatpush.bf16.msra.mxu2 %v4201_v58 }
 0x15c   : > { %v1296_v61 = vpop.f32.mrf.mxu2  ;;  %v6407_v60 = vpop.f32.mrf.mxu0 }
 0x15d   : > { %v1297_v63 = vadd.f32 %v1296_v61, %v1254_v54  ;;  %v1339_v0 = vpop.f32.mrf.mxu3  ;;  %v6409_v1 = vpop.f32.mrf.mxu1 }
 0x15f   : > { %v6411_v3 = vadd.f32 %v1339_v0, %v1297_v63  ;;  %v4192_v0 = vld [vmem:[%s7852_s3 + $0x130] sm:$0xf] }
 0x160   : > { %v4193_v58 = vor.u32 %v5268_v30, %v4192_v0  ;;  %v5235_v30 = vld [vmem:[%s7852_s3 + $0x34] sm:$0xf] }
 0x162   : > { %1716 = vmatpush.bf16.msra.mxu2 %v4193_v58 }
 0x164   : > { %v6419_v45 = vpop.f32.mrf.mxu2  ;;  %v1215_v47 = vpop.f32.mrf.mxu0 }
 0x165   : > { %v6421_v48 = vpop.f32.mrf.mxu3  ;;  %v6424_v23 = vadd.f32 %v1215_v47, %v6299_v40  ;;  %v1258_v51 = vpop.f32.mrf.mxu1  ;;  %v5243_v40 = vld [vmem:[%s7852_s3 + $0x74] sm:$0xf]  ;;  %v4312_v47 = vld [vmem:[%s7852_s3 + $0x58] sm:$0xf0] }
 0x166   : > { %v1259_v13 = vadd.f32 %v1258_v51, %v6336_v39  ;;  %v5255_v51 = vld [vmem:[%s7852_s3 + $0xd4] sm:$0xf]  ;;  %v4315_v12 = vor.u32 %v5239_v32, %v4312_v47 }
 0x167   : > { %1391 = vmatmul.bf16.gmra.mxu0 %v6105_v19  ;;  %v4328_v19 = vld [vmem:[%s7852_s3 + $0x78] sm:$0xf0]  ;;  %v4379_v38 = vor.u32 %v5255_v51, %v4376_v21  ;;  %v5251_v32 = vld [vmem:[%s7852_s3 + $0xb4] sm:$0xf] }
 0x168   : > { %4120 = vmatmul.msk.bf16.gmra.mxu1 %vm992_vm0, %v6288_v20  ;;  %v4331_v42 = vor.u32 %v5243_v40, %v4328_v19  ;;  %v5241_v20 = vld [vmem:[%s7852_s3 + $0x64] sm:$0xf] }
 0x169   : > { %v4323_v61 = vor.u32 %v5241_v20, %v4320_v44  ;;  %2050 = vmatpush.bf16.msrb.mxu1 %v4379_v38 }
 0x16a   : > { %2025 = vmatpush.bf16.msrb.mxu0 %v4331_v42 }
 0x16c   : > { %v1301_v6 = vpop.f32.mrf.mxu2  ;;  %v6442_v8 = vpop.f32.mrf.mxu0 }
 0x16d   : > { %v1302_v7 = vadd.f32 %v1301_v6, %v1259_v13  ;;  %v1344_v53 = vpop.f32.mrf.mxu3  ;;  %v6450_v54 = vpop.f32.mrf.mxu1  ;;  %v5237_v13 = vld [vmem:[%s7852_s3 + $0x44] sm:$0xf]  ;;  %v4304_v6 = vld [vmem:[%s7852_s3 + $0x48] sm:$0xf0] }
 0x16e   : > { %2026 = vmatpush.bf16.msrb.mxu0 %v4323_v61  ;;  %v4307_v44 = vor.u32 %v5237_v13, %v4304_v6  ;;  %v4368_v61 = vld [vmem:[%s7852_s3 + $0xc8] sm:$0xf0]  ;;  %v5249_v6 = vld [vmem:[%s7852_s3 + $0xa4] sm:$0xf] }
 0x16f   : > { %v6452_v63 = vadd.f32 %v1344_v53, %v1302_v7  ;;  %v5253_v7 = vld [vmem:[%s7852_s3 + $0xc4] sm:$0xf]  ;;  %v4288_v13 = vld [vmem:[%s7852_s3 + $0x28] sm:$0xf0] }
 0x170   : > { %v4371_v0 = vor.u32 %v5253_v7, %v4368_v61  ;;  %v4184_v61 = vld [vmem:[%s7852_s3 + $0x120] sm:$0xf] }
 0x172   : > { %2027 = vmatpush.bf16.msrb.mxu0 %v4315_v12  ;;  %2051 = vmatpush.bf16.msrb.mxu1 %v4371_v0 }
 0x174   : > { %v6472_v40 = vpop.f32.mrf.mxu2  ;;  %v1220_v19 = vpop.f32.mrf.mxu0 }
 0x175   : > { %v6474_v42 = vpop.f32.mrf.mxu3  ;;  %v6486_v53 = vadd.f32 %v1220_v19, %v6318_v24  ;;  %v1263_v20 = vpop.f32.mrf.mxu1  ;;  %v4296_v24 = vld [vmem:[%s7852_s3 + $0x38] sm:$0xf0]  ;;  %v5233_v19 = vld [vmem:[%s7852_s3 + $0x24] sm:$0xf] }
 0x176   : > { %2028 = vmatpush.bf16.msrb.mxu0 %v4307_v44  ;;  %v4299_v58 = vor.u32 %v5235_v30, %v4296_v24  ;;  %v5280_v44 = vld [vmem:[%s7852_s3 + $0x194] sm:$0xf0]  ;;  %v4291_v0 = vor.u32 %v5233_v19, %v4288_v13  ;;  %v4344_v19 = vld [vmem:[%s7852_s3 + $0x98] sm:$0xf0] }
 0x177   : > { %1396 = vmatmul.bf16.gmra.mxu0 %v6137_v52  ;;  %v4360_v52 = vld [vmem:[%s7852_s3 + $0xb8] sm:$0xf0] }
 0x178   : > { %4121 = vmatmul.msk.bf16.gmra.mxu1 %vm992_vm0, %v6307_v15  ;;  %v1264_v15 = vadd.f32 %v1263_v20, %v6336_v39  ;;  %v4363_v47 = vor.u32 %v5251_v32, %v4360_v52  ;;  %v4240_v20 = vld [vmem:[%s7852_s3 + $0x190] sm:$0xf]  ;;  %v5266_v32 = vld [vmem:[%s7852_s3 + $0x124] sm:$0xf0] }
 0x179   : > { %v4241_v24 = vor.u32 %v5280_v44, %v4240_v20  ;;  %v4185_v52 = vor.u32 %v5266_v32, %v4184_v61  ;;  %v5229_v61 = vld [vmem:[%s7852_s3 + $0x4] sm:$0xf] }
 0x17a   : > { %2029 = vmatpush.bf16.msrb.mxu0 %v4299_v58  ;;  %2052 = vmatpush.bf16.msrb.mxu1 %v4363_v47  ;;  %v4352_v58 = vld [vmem:[%s7852_s3 + $0xa8] sm:$0xf0]  ;;  %v5231_v47 = vld [vmem:[%s7852_s3 + $0x14] sm:$0xf] }
 0x17b   : > { %1741 = vmatpush.bf16.msra.mxu3 %v4241_v24  ;;  %1717 = vmatpush.bf16.msra.mxu2 %v4185_v52  ;;  %v5245_v24 = vld [vmem:[%s7852_s3 + $0x84] sm:$0xf] }
 0x17c   : > { %v1306_v51 = vpop.f32.mrf.mxu2  ;;  %v6507_v21 = vpop.f32.mrf.mxu0 }
 0x17d   : > { %v1307_v12 = vadd.f32 %v1306_v51, %v1264_v15  ;;  %7864 = vst [vmem:[#allocation6_spill] sm:$0xff] %v6507_v21  ;;  %v1349_v38 = vpop.f32.mrf.mxu3  ;;  %v6518_v7 = vpop.f32.mrf.mxu1  ;;  %v4355_v15 = vor.u32 %v5249_v6, %v4352_v58  ;;  %v4280_v51 = vld [vmem:[%s7852_s3 + $0x18] sm:$0xf0] }
 0x17e   : > { %2030 = vmatpush.bf16.msrb.mxu0 %v4291_v0  ;;  %v4272_v0 = vld [vmem:[%s7852_s3 + $0x8] sm:$0xf0] }
 0x17f   : > { %v6529_v30 = vadd.f32 %v1349_v38, %v1307_v12  ;;  %v5247_v12 = vld [vmem:[%s7852_s3 + $0x94] sm:$0xf]  ;;  %2053 = vmatpush.bf16.msrb.mxu1 %v4355_v15  ;;  %v4283_v38 = vor.u32 %v5231_v47, %v4280_v51  ;;  %v4275_v52 = vor.u32 %v5229_v61, %v4272_v0  ;;  %v4336_v15 = vld [vmem:[%s7852_s3 + $0x88] sm:$0xf0]  ;;  %v5278_v0 = vld [vmem:[%s7852_s3 + $0x184] sm:$0xf0] }
 0x180   : > { %v4347_v13 = vor.u32 %v5247_v12, %v4344_v19  ;;  %v4339_v47 = vor.u32 %v5245_v24, %v4336_v15 }
 0x182   : > { %2031 = vmatpush.bf16.msrb.mxu0 %v4283_v38 }
 0x183   : > { %2054 = vmatpush.bf16.msrb.mxu1 %v4347_v13  ;;  %v5264_v13 = vld [vmem:[%s7852_s3 + $0x114] sm:$0xf0] }
 0x184   : > { %v6549_v6 = vpop.f32.mrf.mxu2  ;;  %v1225_v20 = vpop.f32.mrf.mxu0 }
 0x185   : > { %v6551_v44 = vpop.f32.mrf.mxu3  ;;  %v6563_v32 = vadd.f32 %v1225_v20, %v6330_v35  ;;  %v1268_v58 = vpop.f32.mrf.mxu1  ;;  %v4176_v35 = vld [vmem:[%s7852_s3 + $0x110] sm:$0xf]  ;;  %v4232_v20 = vld [vmem:[%s7852_s3 + $0x180] sm:$0xf] }
 0x186   : > { %7865 = vst [vmem:[#allocation7_spill] sm:$0xff] %v6551_v44  ;;  %2032 = vmatpush.bf16.msrb.mxu0 %v4275_v52  ;;  %v1269_v51 = vadd.f32 %v1268_v58, %v6336_v39  ;;  %v4177_v61 = vor.u32 %v5264_v13, %v4176_v35  ;;  %v1241_v52 = vadd.f32 %v6345_v33, %v6336_v39  ;;  %v1444_v35 = vmax.f32 %v6333_v36, 0.0  ;;  %v4168_v36 = vld [vmem:[%s7852_s3 + $0x100] sm:$0xf] }
 0x187   : > { %2055 = vmatpush.bf16.msrb.mxu1 %v4339_v47 }
 0x188   : > { %1718 = vmatpush.bf16.msra.mxu2 %v4177_v61 }
 0x18c   : > { %v1311_v12 = vpop.f32.mrf.mxu2  ;;  %v1227_v19 = vpop.f32.mrf.mxu0 }
 0x18d   : > { %v1312_v38 = vadd.f32 %v1311_v12, %v1269_v51  ;;  %v1354_v21 = vpop.f32.mrf.mxu3  ;;  %v1270_v44 = vpop.f32.mrf.mxu1  ;;  %v1284_v51 = vadd.f32 %v6349_v2, %v1241_v52  ;;  %v4474_v19 = vld [vmem:[%s7852_s3 + $0x238] sm:$0xf0]  ;;  %v5297_v2 = vld [vmem:[%s7852_s3 + $0x224] sm:$0xf] }
 0x18e   : > { %v4233_v44 = vor.u32 %v5278_v0, %v4232_v20  ;;  %v4466_v0 = vld [vmem:[%s7852_s3 + $0x228] sm:$0xf0] }
 0x18f   : > { %v6569_v11 = vadd.f32 %v1354_v21, %v1312_v38  ;;  %v5299_v38 = vld [vmem:[%s7852_s3 + $0x234] sm:$0xf]  ;;  %v1327_v33 = vadd.f32 %v6351_v9, %v1284_v51  ;;  %v5262_v9 = vld [vmem:[%s7852_s3 + $0x104] sm:$0xf0] }
 0x190   : > { %1742 = vmatpush.bf16.msra.mxu3 %v4233_v44  ;;  %v4477_v20 = vor.u32 %v5299_v38, %v4474_v19  ;;  %v5311_v51 = vld [vmem:[%s7852_s3 + $0x294] sm:$0xf] }
 0x192   : > { %2307 = vmatpush.bf16.msra.mxu0 %v4477_v20 }
 0x194   : > { %v1313_v21 = vpop.f32.mrf.mxu2  ;;  %v1367_v24 = vpop.f32.mrf.mxu0 }
 0x195   : > { %v1356_v58 = vpop.f32.mrf.mxu3  ;;  %v1368_v15 = vadd.f32 %v1367_v24, %v6347_v18  ;;  %v1410_v47 = vpop.f32.mrf.mxu1  ;;  %v4469_v24 = vor.u32 %v5297_v2, %v4466_v0 }
 0x196   : > { %v4169_v58 = vor.u32 %v5262_v9, %v4168_v36 }
 0x197   : > { %v1411_v12 = vadd.f32 %v1410_v47, %v1368_v15  ;;  %2308 = vmatpush.bf16.msra.mxu0 %v4469_v24  ;;  %v5295_v15 = vld [vmem:[%s7852_s3 + $0x214] sm:$0xf]  ;;  %v4458_v47 = vld [vmem:[%s7852_s3 + $0x218] sm:$0xf0] }
 0x198   : > { %1719 = vmatpush.bf16.msra.mxu2 %v4169_v58  ;;  %v4461_v19 = vor.u32 %v5295_v15, %v4458_v47  ;;  %v5276_v58 = vld [vmem:[%s7852_s3 + $0x174] sm:$0xf0]  ;;  %v4514_v15 = vld [vmem:[%s7852_s3 + $0x288] sm:$0xf0] }
 0x199   : > { %v1445_v13 = vmax.f32 %v1411_v12, 0.0  ;;  %v1446_v12 = vmax.f32 %v6343_v17, 0.0  ;;  %v5293_v17 = vld [vmem:[%s7852_s3 + $0x204] sm:$0xf] }
 0x19b   : > { %v1470_v61 = vpack.c.bf16 %v1445_v13, %v1444_v35  ;;  %v4522_v35 = vld [vmem:[%s7852_s3 + $0x298] sm:$0xf0]  ;;  %2309 = vmatpush.bf16.msra.mxu0 %v4461_v19 }
 0x19c   : > { %v1369_v18 = vpop.f32.mrf.mxu0  ;;  %v4525_v13 = vor.u32 %v5311_v51, %v4522_v35  ;;  %v5291_v35 = vld [vmem:[%s7852_s3 + $0x1f4] sm:$0xf] }
 0x19d   : > { %v1370_v44 = vadd.f32 %v1369_v18, %v1327_v33  ;;  %v1412_v21 = vpop.f32.mrf.mxu1  ;;  %v1246_v33 = vadd.f32 %v6363_v5, %v6336_v39  ;;  %v1811_v18 = vunpack.c.l.b16 %v1470_v61  ;;  %v1812_v2 = vunpack.c.h.b16 %v1470_v61  ;;  %v4224_v61 = vld [vmem:[%s7852_s3 + $0x170] sm:$0xf] }
 0x19e   : > { %2332 = vmatpush.bf16.msra.mxu1 %v4525_v13  ;;  %v4225_v47 = vor.u32 %v5276_v58, %v4224_v61  ;;  %v4442_v13 = vld [vmem:[%s7852_s3 + $0x1f8] sm:$0xf0] }
 0x19f   : > { %v1413_v52 = vadd.f32 %v1412_v21, %v1370_v44  ;;  %v4450_v44 = vld [vmem:[%s7852_s3 + $0x208] sm:$0xf0]  ;;  %v5309_v21 = vld [vmem:[%s7852_s3 + $0x284] sm:$0xf] }
 0x1a0   : > { %v4517_v51 = vor.u32 %v5309_v21, %v4514_v15  ;;  %1743 = vmatpush.bf16.msra.mxu3 %v4225_v47  ;;  %v4498_v47 = vld [vmem:[%s7852_s3 + $0x268] sm:$0xf0] }
 0x1a1   : > { %v1447_v38 = vmax.f32 %v1413_v52, 0.0  ;;  %v4453_v52 = vor.u32 %v5293_v17, %v4450_v44 }
 0x1a2   : > { %2333 = vmatpush.bf16.msra.mxu1 %v4517_v51 }
 0x1a3   : > { %v1471_v20 = vpack.c.bf16 %v1447_v38, %v1446_v12  ;;  %v1289_v12 = vadd.f32 %v6367_v4, %v1246_v33  ;;  %2310 = vmatpush.bf16.msra.mxu0 %v4453_v52  ;;  %v5307_v4 = vld [vmem:[%s7852_s3 + $0x274] sm:$0xf] }
 0x1a4   : > { %v1372_v0 = vpop.f32.mrf.mxu0 }
 0x1a5   : > { %v1813_v36 = vunpack.c.l.b16 %v1471_v20  ;;  %v1814_v9 = vunpack.c.h.b16 %v1471_v20  ;;  %v1373_v5 = vadd.f32 %v1372_v0, %v6365_v28  ;;  %v1415_v24 = vpop.f32.mrf.mxu1  ;;  %v1448_v20 = vmax.f32 %v6354_v10, 0.0  ;;  %v5289_v10 = vld [vmem:[%s7852_s3 + $0x1e4] sm:$0xf] }
 0x1a6   : > { %v1332_v17 = vadd.f32 %v6369_v27, %v1289_v12 }
 0x1a7   : > { %v6642_v28 = vpack.c.b16 %v1813_v36, %v1811_v18  ;;  %v6644_v38 = vpack.c.b16 %v1814_v9, %v1812_v2  ;;  %v1416_v19 = vadd.f32 %v1415_v24, %v1373_v5  ;;  %v4445_v18 = vor.u32 %v5291_v35, %v4442_v13  ;;  %v4506_v2 = vld [vmem:[%s7852_s3 + $0x278] sm:$0xf0]  ;;  %v4434_v5 = vld [vmem:[%s7852_s3 + $0x1e8] sm:$0xf0]  ;;  %v5305_v24 = vld [vmem:[%s7852_s3 + $0x264] sm:$0xf] }
 0x1a8   : > { %v4509_v0 = vor.u32 %v5307_v4, %v4506_v2  ;;  %v4437_v15 = vor.u32 %v5289_v10, %v4434_v5  ;;  %v4501_v51 = vor.u32 %v5305_v24, %v4498_v47  ;;  %v4160_v13 = vld [vmem:[%s7852_s3 + $0xf0] sm:$0xf]  ;;  %v5260_v4 = vld [vmem:[%s7852_s3 + $0xf4] sm:$0xf0]  ;;  %v1251_v10 = vadd.f32 %v6380_v29, %v6336_v39  ;;  %v5285_v24 = vld [vmem:[%s7852_s3 + $0x1c4] sm:$0xf] }
 0x1a9   : > { %v1449_v33 = vmax.f32 %v1416_v19, 0.0  ;;  %2033 = vmatmul.bf16.vlgmr.msrb.gmra.mxu0 %v6642_v28  ;;  %4383 = vmatmul.msk.bf16.vlgmr.msrb.gmra.mxu1 %vm1704_vm1, %v6644_v38  ;;  %v4216_v29 = vld [vmem:[%s7852_s3 + $0x160] sm:$0xf] }
 0x1aa   : > { %2311 = vmatpush.bf16.msra.mxu0 %v4445_v18  ;;  %2334 = vmatpush.bf16.msra.mxu1 %v4509_v0  ;;  %v1450_v18 = vmax.f32 %v6361_v49, 0.0  ;;  %v4418_v49 = vld [vmem:[%s7852_s3 + $0x1c8] sm:$0xf0] }
 0x1ab   : > { %v1472_v44 = vpack.c.bf16 %v1449_v33, %v1448_v20  ;;  %v4161_v20 = vor.u32 %v5260_v4, %v4160_v13  ;;  %v5287_v33 = vld [vmem:[%s7852_s3 + $0x1d4] sm:$0xf]  ;;  %v4152_v13 = vld [vmem:[%s7852_s3 + $0xe0] sm:$0xf]  ;;  %v4421_v4 = vor.u32 %v5285_v24, %v4418_v49 }
 0x1ac   : > { %v1374_v21 = vpop.f32.mrf.mxu0 }
 0x1ad   : > { %v1815_v61 = vunpack.c.l.b16 %v1472_v44  ;;  %v1816_v58 = vunpack.c.h.b16 %v1472_v44  ;;  %v1375_v52 = vadd.f32 %v1374_v21, %v1332_v17  ;;  %v1417_v27 = vpop.f32.mrf.mxu1  ;;  %v4490_v17 = vld [vmem:[%s7852_s3 + $0x258] sm:$0xf0]  ;;  %1720 = vmatpush.bf16.msra.mxu2 %v4161_v20  ;;  %v1122_v20 = vadd.f32 %v6261_v57, %v6251_v41 }
 0x1ae   : > { %2312 = vmatpush.bf16.msra.mxu0 %v4437_v15  ;;  %2335 = vmatpush.bf16.msra.mxu1 %v4501_v51  ;;  %v1452_v57 = vmax.f32 %v6372_v46, 0.0 }
 0x1af   : > { %v6675_v12 = vpack.c.b16 %v1815_v61, %v1813_v36  ;;  %v6677_v19 = vpack.c.b16 %v1816_v58, %v1814_v9  ;;  %v1418_v35 = vadd.f32 %v1417_v27, %v1375_v52  ;;  %v4426_v36 = vld [vmem:[%s7852_s3 + $0x1d8] sm:$0xf0]  ;;  %v5303_v9 = vld [vmem:[%s7852_s3 + $0x254] sm:$0xf]  ;;  %v5301_v52 = vld [vmem:[%s7852_s3 + $0x244] sm:$0xf] }
 0x1b0   : > { %v4429_v0 = vor.u32 %v5287_v33, %v4426_v36  ;;  %v4493_v44 = vor.u32 %v5303_v9, %v4490_v17  ;;  %v1294_v33 = vadd.f32 %v6396_v50, %v1251_v10  ;;  %v5258_v36 = vld [vmem:[%s7852_s3 + $0xe4] sm:$0xf0]  ;;  %v4482_v9 = vld [vmem:[%s7852_s3 + $0x248] sm:$0xf0] }
 0x1b1   : > { %v1451_v2 = vmax.f32 %v1418_v35, 0.0  ;;  %v5274_v35 = vld [vmem:[%s7852_s3 + $0x164] sm:$0xf0]  ;;  %v4153_v17 = vor.u32 %v5258_v36, %v4152_v13  ;;  %v4485_v41 = vor.u32 %v5301_v52, %v4482_v9  ;;  %v5271_v9 = vld [vmem:[%s7852_s3 + $0x154] sm:$0xf] }
 0x1b2   : > { %2313 = vmatpush.bf16.msra.mxu0 %v4429_v0  ;;  %2336 = vmatpush.bf16.msra.mxu1 %v4493_v44  ;;  %v1165_v44 = vadd.f32 %v6265_v62, %v1122_v20  ;;  %v1256_v62 = vadd.f32 %v6409_v1, %v6336_v39  ;;  %v4210_v1 = vld [vmem:[%s7852_s3 + $0x158] sm:$0xf0] }
 0x1b3   : > { %v1473_v21 = vpack.c.bf16 %v1451_v2, %v1450_v18  ;;  %1721 = vmatpush.bf16.msra.mxu2 %v4153_v17  ;;  %v4213_v17 = vor.u32 %v5271_v9, %v4210_v1  ;;  %v5339_v9 = vld [vmem:[%s7852_s3 + $0x374] sm:$0xf]  ;;  %v4668_v1 = vld [vmem:[%s7852_s3 + $0x378] sm:$0xf0] }
 0x1b4   : > { %v1377_v5 = vpop.f32.mrf.mxu0  ;;  %v1208_v10 = vadd.f32 %v6378_v14, %v1165_v44 }
 0x1b5   : > { %v1817_v27 = vunpack.c.l.b16 %v1473_v21  ;;  %v1818_v15 = vunpack.c.h.b16 %v1473_v21  ;;  %v1378_v47 = vadd.f32 %v1377_v5, %v6382_v34  ;;  %v1420_v51 = vpop.f32.mrf.mxu1  ;;  %v4217_v34 = vor.u32 %v5274_v35, %v4216_v29 }
 0x1b6   : > { %2314 = vmatpush.bf16.msra.mxu0 %v4421_v4  ;;  %2337 = vmatpush.bf16.msra.mxu1 %v4485_v41  ;;  %v1454_v29 = vmax.f32 %v1208_v10, 0.0  ;;  %v4258_v41 = vld [vmem:[%s7852_s3 + $0x1b8] sm:$0xf0] }
 0x1b7   : > { %v1421_v18 = vadd.f32 %v1420_v51, %v1378_v47  ;;  %v6728_v2 = vpack.c.b16 %v1817_v27, %v1815_v61  ;;  %v6730_v0 = vpack.c.b16 %v1818_v15, %v1816_v58  ;;  %1744 = vmatpush.bf16.msra.mxu3 %v4217_v34  ;;  %v1337_v61 = vadd.f32 %v6398_v59, %v1294_v33 }
 0x1b8   : > { %v1299_v34 = vadd.f32 %v6419_v45, %v1256_v62  ;;  %v1127_v45 = vadd.f32 %v6286_v16, %v6282_v31  ;;  %1760 = vmatpush.bf16.msrb.mxu2 %v4213_v17  ;;  %v4202_v62 = vld [vmem:[%s7852_s3 + $0x148] sm:$0xf0] }
 0x1b9   : > { %v1453_v50 = vmax.f32 %v1421_v18, 0.0  ;;  %2038 = vmatmul.bf16.gmra.mxu0 %v6728_v2  ;;  %4384 = vmatmul.msk.bf16.gmra.mxu1 %vm1704_vm1, %v6730_v0 }
 0x1bb   : > { %v1474_v58 = vpack.c.bf16 %v1453_v50, %v1452_v57  ;;  %v5327_v57 = vld [vmem:[%s7852_s3 + $0x314] sm:$0xf]  ;;  %v4620_v50 = vld [vmem:[%s7852_s3 + $0x318] sm:$0xf0] }
 0x1bc   : > { %v1379_v21 = vpop.f32.mrf.mxu0  ;;  %v4623_v16 = vor.u32 %v5327_v57, %v4620_v50  ;;  %v5321_v57 = vld [vmem:[%s7852_s3 + $0x2e4] sm:$0xf]  ;;  %v4596_v50 = vld [vmem:[%s7852_s3 + $0x2e8] sm:$0xf0] }
 0x1bd   : > { %v1819_v5 = vunpack.c.l.b16 %v1474_v58  ;;  %v1820_v24 = vunpack.c.h.b16 %v1474_v58  ;;  %v1380_v49 = vadd.f32 %v1379_v21, %v1337_v61  ;;  %v1422_v46 = vpop.f32.mrf.mxu1  ;;  %v1456_v61 = vmax.f32 %v6401_v37, 0.0  ;;  %v5325_v37 = vld [vmem:[%s7852_s3 + $0x304] sm:$0xf] }
 0x1be   : > { %v1342_v21 = vadd.f32 %v6421_v48, %v1299_v34  ;;  %2599 = vmatpush.bf16.msrb.mxu0 %v4623_v16 }
 0x1bf   : > { %v1423_v52 = vadd.f32 %v1422_v46, %v1380_v49  ;;  %v6739_v47 = vpack.c.b16 %v1819_v5, %v1817_v27  ;;  %v6741_v51 = vpack.c.b16 %v1820_v24, %v1818_v15  ;;  %v6751_v36 = vpack.c.b16 %v1819_v5, %v1819_v5 }
 0x1c0   : > { %v6753_v15 = vpack.c.b16 %v1820_v24, %v1820_v24  ;;  %v1170_v49 = vadd.f32 %v6290_v22, %v1127_v45 }
 0x1c1   : > { %v1455_v35 = vmax.f32 %v1423_v52, 0.0 }
 0x1c2   : > { %v1213_v48 = vadd.f32 %v6407_v60, %v1170_v49  ;;  %v5323_v60 = vld [vmem:[%s7852_s3 + $0x2f4] sm:$0xf]  ;;  %v1132_v49 = vadd.f32 %v6305_v55, %v6301_v43  ;;  %v4660_v43 = vld [vmem:[%s7852_s3 + $0x368] sm:$0xf0] }
 0x1c3   : > { %v1475_v13 = vpack.c.bf16 %v1455_v35, %v1454_v29 }
 0x1c4   : > { %v1382_v59 = vpop.f32.mrf.mxu0  ;;  %v1458_v45 = vmax.f32 %v1213_v48, 0.0 }
 0x1c5   : > { %v6745_v4 = vunpack.c.h.b16 %v1475_v13  ;;  %v1383_v14 = vadd.f32 %v1382_v59, %v6411_v3  ;;  %v1425_v20 = vpop.f32.mrf.mxu1  ;;  %v6748_v33 = vunpack.c.l.b16 %v1475_v13  ;;  %v5283_v3 = vld [vmem:[%s7852_s3 + $0x1b4] sm:$0xf]  ;;  %v5269_v13 = vld [vmem:[%s7852_s3 + $0x144] sm:$0xf] }
 0x1c6   : > { %v4261_v31 = vor.u32 %v5283_v3, %v4258_v41  ;;  %v5281_v59 = vld [vmem:[%s7852_s3 + $0x1a4] sm:$0xf]  ;;  %v4205_v22 = vor.u32 %v5269_v13, %v4202_v62  ;;  %v4671_v3 = vor.u32 %v5339_v9, %v4668_v1 }
 0x1c7   : > { %v1426_v27 = vadd.f32 %v1425_v20, %v1383_v14  ;;  %v6765_v18 = vpack.c.b16 %v6748_v33, %v1819_v5  ;;  %v6779_v44 = vpack.c.b16 %v6745_v4, %v1820_v24  ;;  %v4612_v24 = vld [vmem:[%s7852_s3 + $0x308] sm:$0xf0]  ;;  %v4604_v20 = vld [vmem:[%s7852_s3 + $0x2f8] sm:$0xf0] }
 0x1c8   : > { %1785 = vmatpush.bf16.msrb.mxu3 %v4261_v31  ;;  %v4615_v29 = vor.u32 %v5325_v37, %v4612_v24  ;;  %v4250_v14 = vld [vmem:[%s7852_s3 + $0x1a8] sm:$0xf0]  ;;  %1761 = vmatpush.bf16.msrb.mxu2 %v4205_v22  ;;  %v5279_v37 = vld [vmem:[%s7852_s3 + $0x194] sm:$0xf]  ;;  %v4599_v24 = vor.u32 %v5321_v57, %v4596_v50  ;;  %v4588_v22 = vld [vmem:[%s7852_s3 + $0x2d8] sm:$0xf0] }
 0x1c9   : > { %v1457_v58 = vmax.f32 %v1426_v27, 0.0  ;;  %2043 = vmatmul.bf16.gmra.mxu0 %v6751_v36  ;;  %4385 = vmatmul.msk.bf16.gmra.mxu1 %vm1704_vm1, %v6753_v15  ;;  %v4253_v34 = vor.u32 %v5281_v59, %v4250_v14  ;;  %v4607_v27 = vor.u32 %v5323_v60, %v4604_v20  ;;  %v5319_v59 = vld [vmem:[%s7852_s3 + $0x2d4] sm:$0xf]  ;;  %v1460_v14 = vmax.f32 %v6424_v23, 0.0  ;;  %v5317_v57 = vld [vmem:[%s7852_s3 + $0x2c4] sm:$0xf] }
 0x1ca   : > { %2600 = vmatpush.bf16.msrb.mxu0 %v4615_v29  ;;  %2624 = vmatpush.bf16.msrb.mxu1 %v4671_v3  ;;  %v4591_v20 = vor.u32 %v5319_v59, %v4588_v22  ;;  %v5315_v22 = vld [vmem:[%s7852_s3 + $0x2b4] sm:$0xf] }
 0x1cb   : > { %v6786_v10 = vpack.c.bf16 %v1457_v58, %v1456_v61  ;;  %v5337_v61 = vld [vmem:[%s7852_s3 + $0x364] sm:$0xf]  ;;  %v1261_v58 = vadd.f32 %v6450_v54, %v6336_v39 }
 0x1cc   : > { %v1384_v5 = vpop.f32.mrf.mxu0  ;;  %1786 = vmatpush.bf16.msrb.mxu3 %v4253_v34  ;;  %v4663_v62 = vor.u32 %v5337_v61, %v4660_v43  ;;  %v4652_v34 = vld [vmem:[%s7852_s3 + $0x358] sm:$0xf0] }
 0x1cd   : > { %v1385_v46 = vadd.f32 %v1384_v5, %v1342_v21  ;;  %v1427_v52 = vpop.f32.mrf.mxu1  ;;  %v5267_v21 = vld [vmem:[%s7852_s3 + $0x134] sm:$0xf]  ;;  %v4194_v5 = vld [vmem:[%s7852_s3 + $0x138] sm:$0xf0]  ;;  %v1304_v29 = vadd.f32 %v6472_v40, %v1261_v58 }
 0x1ce   : > { %2601 = vmatpush.bf16.msrb.mxu0 %v4607_v27  ;;  %v4197_v54 = vor.u32 %v5267_v21, %v4194_v5  ;;  %v5335_v40 = vld [vmem:[%s7852_s3 + $0x354] sm:$0xf]  ;;  %v1175_v27 = vadd.f32 %v6309_v56, %v1132_v49  ;;  %2625 = vmatpush.bf16.msrb.mxu1 %v4663_v62  ;;  %v4580_v56 = vld [vmem:[%s7852_s3 + $0x2c8] sm:$0xf0]  ;;  %v4226_v62 = vld [vmem:[%s7852_s3 + $0x178] sm:$0xf0] }
 0x1cf   : > { %v1428_v35 = vadd.f32 %v1427_v52, %v1385_v46  ;;  %v5265_v46 = vld [vmem:[%s7852_s3 + $0x124] sm:$0xf]  ;;  %v4186_v52 = vld [vmem:[%s7852_s3 + $0x128] sm:$0xf0]  ;;  %v4655_v9 = vor.u32 %v5335_v40, %v4652_v34  ;;  %v1347_v1 = vadd.f32 %v6474_v42, %v1304_v29  ;;  %v5263_v49 = vld [vmem:[%s7852_s3 + $0x114] sm:$0xf] }
 0x1d0   : > { %1762 = vmatpush.bf16.msrb.mxu2 %v4197_v54  ;;  %v4189_v13 = vor.u32 %v5265_v46, %v4186_v52  ;;  %v1218_v23 = vadd.f32 %v6442_v8, %v1175_v27  ;;  %v5333_v42 = vld [vmem:[%s7852_s3 + $0x344] sm:$0xf]  ;;  %v4178_v54 = vld [vmem:[%s7852_s3 + $0x118] sm:$0xf0]  ;;  %v4234_v52 = vld [vmem:[%s7852_s3 + $0x188] sm:$0xf0] }
 0x1d1   : > { %v1459_v17 = vmax.f32 %v1428_v35, 0.0  ;;  %v4181_v46 = vor.u32 %v5263_v49, %v4178_v54  ;;  %v5261_v29 = vld [vmem:[%s7852_s3 + $0x104] sm:$0xf]  ;;  %v4572_v40 = vld [vmem:[%s7852_s3 + $0x2b8] sm:$0xf0] }
 0x1d2   : > { %2602 = vmatpush.bf16.msrb.mxu0 %v4599_v24  ;;  %2626 = vmatpush.bf16.msrb.mxu1 %v4655_v9  ;;  %v4575_v27 = vor.u32 %v5315_v22, %v4572_v40  ;;  %v4636_v9 = vld [vmem:[%s7852_s3 + $0x338] sm:$0xf0] }
 0x1d3   : > { %v1477_v55 = vpack.c.bf16 %v1459_v17, %v1458_v45 }
 0x1d4   : > { %v1387_v41 = vpop.f32.mrf.mxu0  ;;  %1763 = vmatpush.bf16.msrb.mxu2 %v4189_v13  ;;  %v5275_v13 = vld [vmem:[%s7852_s3 + $0x174] sm:$0xf] }
 0x1d5   : > { %v1388_v31 = vadd.f32 %v1387_v41, %v6452_v63  ;;  %v1430_v16 = vpop.f32.mrf.mxu1  ;;  %v4242_v63 = vld [vmem:[%s7852_s3 + $0x198] sm:$0xf0]  ;;  %v1545_v45 = vunpack.c.l.b16 %v1477_v55  ;;  %v1546_v17 = vunpack.c.h.b16 %v1477_v55  ;;  %v4229_v34 = vor.u32 %v5275_v13, %v4226_v62 }
 0x1d6   : > { %v4245_v35 = vor.u32 %v5279_v37, %v4242_v63  ;;  %2603 = vmatpush.bf16.msrb.mxu0 %v4591_v20  ;;  %v5277_v63 = vld [vmem:[%s7852_s3 + $0x184] sm:$0xf]  ;;  %v7868_v13 = vld [vmem:[#allocation6_spill] sm:$0xff] }
 0x1d7   : > { %v1431_v48 = vadd.f32 %v1430_v16, %v1388_v31  ;;  %v4583_v31 = vor.u32 %v5317_v57, %v4580_v56  ;;  %v4644_v16 = vld [vmem:[%s7852_s3 + $0x348] sm:$0xf0]  ;;  %v4237_v55 = vor.u32 %v5277_v63, %v4234_v52  ;;  %v1464_v63 = vmax.f32 %v6486_v53, 0.0  ;;  %v5257_v52 = vld [vmem:[%s7852_s3 + $0xe4] sm:$0xf] }
 0x1d8   : > { %1787 = vmatpush.bf16.msrb.mxu3 %v4245_v35  ;;  %v4647_v21 = vor.u32 %v5333_v42, %v4644_v16  ;;  %v1462_v35 = vmax.f32 %v1218_v23, 0.0  ;;  %1764 = vmatpush.bf16.msrb.mxu2 %v4181_v46  ;;  %v1137_v23 = vadd.f32 %v6322_v26, %v6320_v25  ;;  %v7867_v53 = vld [vmem:[#allocation7_spill] sm:$0xff] }
 0x1d9   : > { %v1461_v60 = vmax.f32 %v1431_v48, 0.0  ;;  %2315 = vmatmul.bf16.vlgmr.msra.gmra.mxu0 %v6675_v12  ;;  %4529 = vmatmul.msk.bf16.vlgmr.msra.gmra.mxu1 %vm1704_vm1, %v6677_v19  ;;  %v4170_v48 = vld [vmem:[%s7852_s3 + $0x108] sm:$0xf0] }
 0x1da   : > { %2604 = vmatpush.bf16.msrb.mxu0 %v4583_v31  ;;  %2627 = vmatpush.bf16.msrb.mxu1 %v4647_v21  ;;  %v4173_v59 = vor.u32 %v5261_v29, %v4170_v48  ;;  %v4218_v31 = vld [vmem:[%s7852_s3 + $0x168] sm:$0xf0]  ;;  %v7866_v29 = vld [vmem:[#allocation5_spill] sm:$0xff] }
 0x1db   : > { %v6874_v3 = vpack.c.bf16 %v1461_v60, %v1460_v14  ;;  %v5331_v14 = vld [vmem:[%s7852_s3 + $0x334] sm:$0xf]  ;;  %v1266_v60 = vadd.f32 %v6518_v7, %v6336_v39  ;;  %v1180_v48 = vadd.f32 %v7866_v29, %v1137_v23  ;;  %v5240_v29 = vld [vmem:[%s7852_s3 + $0x54] sm:$0xf0] }
 0x1dc   : > { %v1389_v41 = vpop.f32.mrf.mxu0  ;;  %1788 = vmatpush.bf16.msrb.mxu3 %v4237_v55  ;;  %v4639_v7 = vor.u32 %v5331_v14, %v4636_v9  ;;  %1765 = vmatpush.bf16.msrb.mxu2 %v4173_v59 }
 0x1dd   : > { %v1547_v50 = vunpack.c.l.b16 %v6874_v3  ;;  %v1548_v8 = vunpack.c.h.b16 %v6874_v3  ;;  %v1390_v61 = vadd.f32 %v1389_v41, %v1347_v1  ;;  %v1432_v58 = vpop.f32.mrf.mxu1  ;;  %v5259_v1 = vld [vmem:[%s7852_s3 + $0xf4] sm:$0xf]  ;;  %v4162_v3 = vld [vmem:[%s7852_s3 + $0xf8] sm:$0xf0]  ;;  %v5329_v41 = vld [vmem:[%s7852_s3 + $0x324] sm:$0xf]  ;;  %v1309_v57 = vadd.f32 %v6549_v6, %v1266_v60 }
 0x1de   : > { %2605 = vmatpush.bf16.msrb.mxu0 %v4575_v27  ;;  %2628 = vmatpush.bf16.msrb.mxu1 %v4639_v7  ;;  %v4165_v6 = vor.u32 %v5259_v1, %v4162_v3  ;;  %v1223_v62 = vadd.f32 %v7868_v13, %v1180_v48  ;;  %v4326_v1 = vld [vmem:[%s7852_s3 + $0x70] sm:$0xf]  ;;  %v5244_v3 = vld [vmem:[%s7852_s3 + $0x74] sm:$0xf0] }
 0x1df   : > { %v6891_v5 = vpack.c.b16 %v1547_v50, %v1545_v45  ;;  %v6893_v37 = vpack.c.b16 %v1548_v8, %v1546_v17  ;;  %v1433_v24 = vadd.f32 %v1432_v58, %v1390_v61  ;;  %v5313_v45 = vld [vmem:[%s7852_s3 + $0x2a4] sm:$0xf]  ;;  %v4564_v17 = vld [vmem:[%s7852_s3 + $0x2a8] sm:$0xf0]  ;;  %v4327_v23 = vor.u32 %v5244_v3, %v4326_v1  ;;  %v5256_v7 = vld [vmem:[%s7852_s3 + $0xd4] sm:$0xf0] }
 0x1e0   : > { %v4628_v61 = vld [vmem:[%s7852_s3 + $0x328] sm:$0xf0]  ;;  %v5273_v58 = vld [vmem:[%s7852_s3 + $0x164] sm:$0xf]  ;;  %v4567_v16 = vor.u32 %v5313_v45, %v4564_v17  ;;  %1789 = vmatpush.bf16.msrb.mxu3 %v4229_v34  ;;  %1766 = vmatpush.bf16.msrb.mxu2 %v4165_v6  ;;  %v1466_v27 = vmax.f32 %v1223_v62, 0.0 }
 0x1e1   : > { %v1463_v43 = vmax.f32 %v1433_v24, 0.0  ;;  %1722 = vmatmul.bf16.vlgmr.msra.gmra.mxu2 %v6891_v5  ;;  %4262 = vmatmul.msk.bf16.vlgmr.msra.gmra.mxu3 %vm1704_vm1, %v6893_v37  ;;  %v4221_v54 = vor.u32 %v5273_v58, %v4218_v31  ;;  %v4318_v45 = vld [vmem:[%s7852_s3 + $0x60] sm:$0xf]  ;;  %v4814_v1 = vld [vmem:[%s7852_s3 + $0x458] sm:$0xf0] }
 0x1e2   : > { %2606 = vmatpush.bf16.msrb.mxu0 %v4567_v16 }
 0x1e3   : > { %v1479_v20 = vpack.c.bf16 %v1463_v43, %v1462_v35  ;;  %v1352_v35 = vadd.f32 %v7867_v53, %v1309_v57  ;;  %v5242_v57 = vld [vmem:[%s7852_s3 + $0x64] sm:$0xf0]  ;;  %v4758_v53 = vld [vmem:[%s7852_s3 + $0x3e8] sm:$0xf0] }
 0x1e4   : > { %v1392_v39 = vpop.f32.mrf.mxu0  ;;  %1790 = vmatpush.bf16.msrb.mxu3 %v4221_v54  ;;  %v7019_v54 = vpack.c.b16 %v6745_v4, %v6745_v4 }
 0x1e5   : > { %v1550_v56 = vunpack.c.h.b16 %v1479_v20  ;;  %v1393_v42 = vadd.f32 %v1392_v39, %v6529_v30  ;;  %v1435_v25 = vpop.f32.mrf.mxu1  ;;  %v1549_v26 = vunpack.c.l.b16 %v1479_v20  ;;  %v4631_v30 = vor.u32 %v5329_v41, %v4628_v61  ;;  %v4374_v39 = vld [vmem:[%s7852_s3 + $0xd0] sm:$0xf] }
 0x1e6   : > { %v4375_v41 = vor.u32 %v5256_v7, %v4374_v39  ;;  %v4302_v39 = vld [vmem:[%s7852_s3 + $0x40] sm:$0xf]  ;;  %v5238_v7 = vld [vmem:[%s7852_s3 + $0x44] sm:$0xf0] }
 0x1e7   : > { %v6964_v21 = vpack.c.b16 %v1550_v56, %v1548_v8  ;;  %v1436_v24 = vadd.f32 %v1435_v25, %v1393_v42  ;;  %v6966_v49 = vpack.c.b16 %v1549_v26, %v1547_v50  ;;  %v4154_v8 = vld [vmem:[%s7852_s3 + $0xe8] sm:$0xf0]  ;;  %2629 = vmatpush.bf16.msrb.mxu1 %v4631_v30  ;;  %v5254_v42 = vld [vmem:[%s7852_s3 + $0xc4] sm:$0xf0] }
 0x1e8   : > { %v4157_v50 = vor.u32 %v5257_v52, %v4154_v8  ;;  %2004 = vmatpush.bf16.msra.mxu3 %v4375_v41  ;;  %v4766_v52 = vld [vmem:[%s7852_s3 + $0x3f8] sm:$0xf0]  ;;  %v4742_v41 = vld [vmem:[%s7852_s3 + $0x3c8] sm:$0xf0] }
 0x1e9   : > { %v1465_v46 = vmax.f32 %v1436_v24, 0.0  ;;  %2320 = vmatmul.bf16.gmra.mxu0 %v6739_v47  ;;  %4530 = vmatmul.msk.bf16.gmra.mxu1 %vm1704_vm1, %v6741_v51  ;;  %v7015_v24 = vpack.c.b16 %v6748_v33, %v6748_v33  ;;  %v1468_v33 = vmax.f32 %v6563_v32, 0.0  ;;  %v5353_v32 = vld [vmem:[%s7852_s3 + $0x3e4] sm:$0xf] }
 0x1ea   : > { %1767 = vmatpush.bf16.msrb.mxu2 %v4157_v50  ;;  %v4310_v50 = vld [vmem:[%s7852_s3 + $0x50] sm:$0xf] }
 0x1eb   : > { %v1480_v43 = vpack.c.bf16 %v1465_v46, %v1464_v63  ;;  %v4311_v48 = vor.u32 %v5240_v29, %v4310_v50  ;;  %v5345_v50 = vld [vmem:[%s7852_s3 + $0x3a4] sm:$0xf]  ;;  %v4726_v29 = vld [vmem:[%s7852_s3 + $0x3a8] sm:$0xf0] }
 0x1ec   : > { %v1394_v55 = vpop.f32.mrf.mxu0 }
 0x1ed   : > { %v1551_v59 = vunpack.c.l.b16 %v1480_v43  ;;  %v1552_v22 = vunpack.c.h.b16 %v1480_v43  ;;  %v1395_v40 = vadd.f32 %v1394_v55, %v1352_v35  ;;  %v1437_v14 = vpop.f32.mrf.mxu1  ;;  %v4761_v43 = vor.u32 %v5353_v32, %v4758_v53  ;;  %v4790_v53 = vld [vmem:[%s7852_s3 + $0x428] sm:$0xf0] }
 0x1ee   : > { %1979 = vmatpush.bf16.msra.mxu2 %v4327_v23  ;;  %v4729_v32 = vor.u32 %v5345_v50, %v4726_v29  ;;  %v4464_v29 = vld [vmem:[%s7852_s3 + $0x220] sm:$0xf] }
 0x1ef   : > { %v6981_v60 = vpack.c.b16 %v1552_v22, %v1550_v56  ;;  %v1438_v20 = vadd.f32 %v1437_v14, %v1395_v40  ;;  %v6983_v34 = vpack.c.b16 %v1551_v59, %v1549_v26  ;;  %v4366_v56 = vld [vmem:[%s7852_s3 + $0xc0] sm:$0xf]  ;;  %v4319_v26 = vor.u32 %v5242_v57, %v4318_v45  ;;  %v4750_v40 = vld [vmem:[%s7852_s3 + $0x3d8] sm:$0xf0]  ;;  %v5367_v14 = vld [vmem:[%s7852_s3 + $0x454] sm:$0xf] }
 0x1f0   : > { %v4367_v16 = vor.u32 %v5254_v42, %v4366_v56  ;;  %v4817_v23 = vor.u32 %v5367_v14, %v4814_v1  ;;  %v4303_v45 = vor.u32 %v5238_v7, %v4302_v39  ;;  %v5365_v57 = vld [vmem:[%s7852_s3 + $0x444] sm:$0xf]  ;;  %v4806_v42 = vld [vmem:[%s7852_s3 + $0x448] sm:$0xf0]  ;;  %v4718_v14 = vld [vmem:[%s7852_s3 + $0x398] sm:$0xf0] }
 0x1f1   : > { %v1467_v9 = vmax.f32 %v1438_v20, 0.0  ;;  %1727 = vmatmul.bf16.gmra.mxu2 %v6983_v34  ;;  %4263 = vmatmul.msk.bf16.gmra.mxu3 %vm1704_vm1, %v6981_v60  ;;  %v4358_v20 = vld [vmem:[%s7852_s3 + $0xb0] sm:$0xf] }
 0x1f2   : > { %1980 = vmatpush.bf16.msra.mxu2 %v4319_v26  ;;  %2005 = vmatpush.bf16.msra.mxu3 %v4367_v16  ;;  %v4294_v26 = vld [vmem:[%s7852_s3 + $0x30] sm:$0xf] }
 0x1f3   : > { %v1481_v17 = vpack.c.bf16 %v1467_v9, %v1466_v27  ;;  %v5252_v27 = vld [vmem:[%s7852_s3 + $0xb4] sm:$0xf0]  ;;  %2910 = vmatpush.bf16.msra.mxu1 %v4817_v23 }
 0x1f4   : > { %v1397_v25 = vpop.f32.mrf.mxu0  ;;  %v4359_v3 = vor.u32 %v5252_v27, %v4358_v20  ;;  %v5359_v20 = vld [vmem:[%s7852_s3 + $0x414] sm:$0xf]  ;;  %v4342_v27 = vld [vmem:[%s7852_s3 + $0x90] sm:$0xf] }
 0x1f5   : > { %v1554_v61 = vunpack.c.h.b16 %v1481_v17  ;;  %v1398_v58 = vadd.f32 %v1397_v25, %v6569_v11  ;;  %v1440_v31 = vpop.f32.mrf.mxu1  ;;  %v1553_v6 = vunpack.c.l.b16 %v1481_v17  ;;  %v5355_v11 = vld [vmem:[%s7852_s3 + $0x3f4] sm:$0xf]  ;;  %v5349_v17 = vld [vmem:[%s7852_s3 + $0x3c4] sm:$0xf]  ;;  %v4809_v25 = vor.u32 %v5365_v57, %v4806_v42 }
 0x1f6   : > { %v4769_v4 = vor.u32 %v5355_v11, %v4766_v52  ;;  %1981 = vmatpush.bf16.msra.mxu2 %v4311_v48  ;;  %2006 = vmatpush.bf16.msra.mxu3 %v4359_v3  ;;  %v4745_v56 = vor.u32 %v5349_v17, %v4742_v41  ;;  %v4734_v11 = vld [vmem:[%s7852_s3 + $0x3b8] sm:$0xf0]  ;;  %v5363_v52 = vld [vmem:[%s7852_s3 + $0x434] sm:$0xf]  ;;  %v5361_v48 = vld [vmem:[%s7852_s3 + $0x424] sm:$0xf] }
 0x1f7   : > { %v1441_v30 = vadd.f32 %v1440_v31, %v1398_v58  ;;  %v7021_v63 = vpack.c.b16 %v1553_v6, %v1551_v59  ;;  %v7023_v46 = vpack.c.b16 %v1554_v61, %v1552_v22  ;;  %v7049_v62 = vpack.c.b16 %v1553_v6, %v1553_v6  ;;  %v5351_v22 = vld [vmem:[%s7852_s3 + $0x3d4] sm:$0xf]  ;;  %v4350_v58 = vld [vmem:[%s7852_s3 + $0xa0] sm:$0xf]  ;;  %v5250_v6 = vld [vmem:[%s7852_s3 + $0xa4] sm:$0xf0]  ;;  %2911 = vmatpush.bf16.msra.mxu1 %v4809_v25 }
 0x1f8   : > { %2885 = vmatpush.bf16.msra.mxu0 %v4769_v4  ;;  %v7051_v59 = vpack.c.b16 %v1554_v61, %v1554_v61  ;;  %v4753_v9 = vor.u32 %v5351_v22, %v4750_v40  ;;  %v5236_v61 = vld [vmem:[%s7852_s3 + $0x34] sm:$0xf0]  ;;  %v4351_v16 = vor.u32 %v5250_v6, %v4350_v58  ;;  %v5343_v40 = vld [vmem:[%s7852_s3 + $0x394] sm:$0xf]  ;;  %v4782_v3 = vld [vmem:[%s7852_s3 + $0x418] sm:$0xf0] }
 0x1f9   : > { %v1469_v8 = vmax.f32 %v1441_v30, 0.0  ;;  %2325 = vmatmul.bf16.gmra.mxu0 %v7015_v24  ;;  %4531 = vmatmul.msk.bf16.gmra.mxu1 %vm1704_vm1, %v7019_v54  ;;  %v4295_v31 = vor.u32 %v5236_v61, %v4294_v26  ;;  %v5347_v30 = vld [vmem:[%s7852_s3 + $0x3b4] sm:$0xf]  ;;  %v4721_v1 = vor.u32 %v5343_v40, %v4718_v14  ;;  %v4785_v39 = vor.u32 %v5359_v20, %v4782_v3  ;;  %v4710_v17 = vld [vmem:[%s7852_s3 + $0x388] sm:$0xf0] }
 0x1fa   : > { %1982 = vmatpush.bf16.msra.mxu2 %v4303_v45  ;;  %2007 = vmatpush.bf16.msra.mxu3 %v4351_v16  ;;  %v5341_v45 = vld [vmem:[%s7852_s3 + $0x384] sm:$0xf]  ;;  %v4334_v25 = vld [vmem:[%s7852_s3 + $0x80] sm:$0xf]  ;;  %v5246_v26 = vld [vmem:[%s7852_s3 + $0x84] sm:$0xf0] }
 0x1fb   : > { %v7047_v35 = vpack.c.bf16 %v1469_v8, %v1468_v33  ;;  %v4737_v33 = vor.u32 %v5347_v30, %v4734_v11  ;;  %v4798_v8 = vld [vmem:[%s7852_s3 + $0x438] sm:$0xf0]  ;;  %v5357_v41 = vld [vmem:[%s7852_s3 + $0x404] sm:$0xf]  ;;  %v4713_v57 = vor.u32 %v5341_v45, %v4710_v17  ;;  %v4335_v61 = vor.u32 %v5246_v26, %v4334_v25  ;;  %v4270_v58 = vld [vmem:[%s7852_s3] sm:$0xf] }
 0x1fc   : > { %v1399_v55 = vpop.f32.mrf.mxu0  ;;  %2886 = vmatpush.bf16.msra.mxu0 %v4761_v43  ;;  %v4801_v4 = vor.u32 %v5363_v52, %v4798_v8  ;;  %v4793_v43 = vor.u32 %v5361_v48, %v4790_v53  ;;  %v4472_v16 = vld [vmem:[%s7852_s3 + $0x230] sm:$0xf]  ;;  %v5300_v30 = vld [vmem:[%s7852_s3 + $0x234] sm:$0xf0]  ;;  %v5298_v48 = vld [vmem:[%s7852_s3 + $0x224] sm:$0xf0] }
 0x1fd   : > { %v1442_v13 = vpop.f32.mrf.mxu1  ;;  %v4286_v55 = vld [vmem:[%s7852_s3 + $0x20] sm:$0xf]  ;;  %v4520_v11 = vld [vmem:[%s7852_s3 + $0x290] sm:$0xf]  ;;  %v4473_v52 = vor.u32 %v5300_v30, %v4472_v16  ;;  %v5296_v40 = vld [vmem:[%s7852_s3 + $0x214] sm:$0xf0] }
 0x1fe   : > { %1983 = vmatpush.bf16.msra.mxu2 %v4295_v31  ;;  %2912 = vmatpush.bf16.msra.mxu1 %v4801_v4  ;;  %v5234_v13 = vld [vmem:[%s7852_s3 + $0x24] sm:$0xf0]  ;;  %v4448_v3 = vld [vmem:[%s7852_s3 + $0x200] sm:$0xf]  ;;  %v4424_v16 = vld [vmem:[%s7852_s3 + $0x1d0] sm:$0xf] }
 0x1ff   : > { %v4287_v22 = vor.u32 %v5234_v13, %v4286_v55  ;;  %v5230_v31 = vld [vmem:[%s7852_s3 + $0x4] sm:$0xf0]  ;;  %v4496_v45 = vld [vmem:[%s7852_s3 + $0x260] sm:$0xf] }
 0x200   : > { %2887 = vmatpush.bf16.msra.mxu0 %v4753_v9  ;;  %v5248_v9 = vld [vmem:[%s7852_s3 + $0x94] sm:$0xf0]  ;;  %v4271_v6 = vor.u32 %v5230_v31, %v4270_v58  ;;  %v5310_v55 = vld [vmem:[%s7852_s3 + $0x284] sm:$0xf0]  ;;  %v4432_v25 = vld [vmem:[%s7852_s3 + $0x1e0] sm:$0xf] }
 0x201   : > { %1732 = vmatmul.bf16.gmra.mxu2 %v7049_v62  ;;  %4264 = vmatmul.msk.bf16.gmra.mxu3 %vm1704_vm1, %v7051_v59  ;;  %v4343_v23 = vor.u32 %v5248_v9, %v4342_v27  ;;  %v4504_v9 = vld [vmem:[%s7852_s3 + $0x270] sm:$0xf]  ;;  %v5290_v26 = vld [vmem:[%s7852_s3 + $0x1e4] sm:$0xf0]  ;;  %v5304_v31 = vld [vmem:[%s7852_s3 + $0x254] sm:$0xf0] }
 0x202   : > { %2913 = vmatpush.bf16.msra.mxu1 %v4793_v43  ;;  %1984 = vmatpush.bf16.msra.mxu2 %v4287_v22  ;;  %v4465_v43 = vor.u32 %v5298_v48, %v4464_v29  ;;  %v4456_v22 = vld [vmem:[%s7852_s3 + $0x210] sm:$0xf] }
 0x203   : > { %2008 = vmatpush.bf16.msra.mxu3 %v4343_v23  ;;  %v4457_v14 = vor.u32 %v5296_v40, %v4456_v22  ;;  %v4488_v58 = vld [vmem:[%s7852_s3 + $0x250] sm:$0xf]  ;;  %v5340_v40 = vld [vmem:[%s7852_s3 + $0x374] sm:$0xf0] }
 0x204   : > { %2888 = vmatpush.bf16.msra.mxu0 %v4745_v56  ;;  %v4774_v56 = vld [vmem:[%s7852_s3 + $0x408] sm:$0xf0] }
 0x205   : > { %v4777_v42 = vor.u32 %v5357_v41, %v4774_v56  ;;  %v5306_v41 = vld [vmem:[%s7852_s3 + $0x264] sm:$0xf0] }
 0x206   : > { %2914 = vmatpush.bf16.msra.mxu1 %v4785_v39 }
 0x207   : > { %2009 = vmatpush.bf16.msra.mxu3 %v4335_v61  ;;  %v4433_v61 = vor.u32 %v5290_v26, %v4432_v25  ;;  %v4602_v25 = vld [vmem:[%s7852_s3 + $0x2f0] sm:$0xf]  ;;  %v5324_v26 = vld [vmem:[%s7852_s3 + $0x2f4] sm:$0xf0] }
 0x208   : > { %2889 = vmatpush.bf16.msra.mxu0 %v4737_v33  ;;  %v2394_v33 = vunpack.c.h.b16 %v7047_v35 }
 0x209   : > { %2607 = vmatmul.bf16.vlgmr.msrb.gmra.mxu0 %v6966_v49  ;;  %4675 = vmatmul.msk.bf16.vlgmr.msrb.gmra.mxu1 %vm1704_vm1, %v6964_v21 }
 0x20a   : > { %2915 = vmatpush.bf16.msra.mxu1 %v4777_v42 }
 0x20c   : > { %2890 = vmatpush.bf16.msra.mxu0 %v4729_v32  ;;  %v4512_v32 = vld [vmem:[%s7852_s3 + $0x280] sm:$0xf] }
 0x20d   : > { %v4513_v13 = vor.u32 %v5310_v55, %v4512_v32  ;;  %v5328_v55 = vld [vmem:[%s7852_s3 + $0x314] sm:$0xf0] }
 0x210   : > { %2891 = vmatpush.bf16.msra.mxu0 %v4721_v1  ;;  %v5308_v1 = vld [vmem:[%s7852_s3 + $0x274] sm:$0xf0] }
 0x211   : > { %1768 = vmatmul.bf16.vlgmr.msrb.gmra.mxu2 %v6891_v5  ;;  %4265 = vmatmul.msk.bf16.vlgmr.msrb.gmra.mxu3 %vm1704_vm1, %v6893_v37  ;;  %v4278_v5 = vld [vmem:[%s7852_s3 + $0x10] sm:$0xf]  ;;  %v5232_v37 = vld [vmem:[%s7852_s3 + $0x14] sm:$0xf0]  ;;  %v4505_v23 = vor.u32 %v5308_v1, %v4504_v9  ;;  %v2685_v9 = vunpack.c.l.b16 %v6786_v10 }
 0x212   : > { %v4279_v7 = vor.u32 %v5232_v37, %v4278_v5  ;;  %v4440_v37 = vld [vmem:[%s7852_s3 + $0x1f0] sm:$0xf] }
 0x214   : > { %1985 = vmatpush.bf16.msra.mxu2 %v4279_v7  ;;  %2892 = vmatpush.bf16.msra.mxu0 %v4713_v57  ;;  %v5292_v7 = vld [vmem:[%s7852_s3 + $0x1f4] sm:$0xf0]  ;;  %v4497_v57 = vor.u32 %v5306_v41, %v4496_v45  ;;  %v5326_v45 = vld [vmem:[%s7852_s3 + $0x304] sm:$0xf0] }
 0x215   : > { %v4441_v17 = vor.u32 %v5292_v7, %v4440_v37  ;;  %v7340_v37 = vpack.c.b16 %v2685_v9, %v2685_v9  ;;  %v4610_v7 = vld [vmem:[%s7852_s3 + $0x300] sm:$0xf]  ;;  %v5338_v41 = vld [vmem:[%s7852_s3 + $0x364] sm:$0xf0] }
 0x218   : > { %1986 = vmatpush.bf16.msra.mxu2 %v4271_v6  ;;  %v4489_v6 = vor.u32 %v5304_v31, %v4488_v58  ;;  %v4603_v31 = vor.u32 %v5324_v26, %v4602_v25 }
 0x219   : > { %2612 = vmatmul.bf16.gmra.mxu0 %v7021_v63  ;;  %4676 = vmatmul.msk.bf16.gmra.mxu1 %vm1704_vm1, %v7023_v46 }
 0x21c   : > { %2261 = vmatpush.bf16.msrb.mxu2 %v4473_v52  ;;  %v4480_v52 = vld [vmem:[%s7852_s3 + $0x240] sm:$0xf] }
 0x220   : > { %2262 = vmatpush.bf16.msrb.mxu2 %v4465_v43  ;;  %v4618_v43 = vld [vmem:[%s7852_s3 + $0x310] sm:$0xf] }
 0x221   : > { %1773 = vmatmul.bf16.gmra.mxu2 %v6983_v34  ;;  %4266 = vmatmul.msk.bf16.gmra.mxu3 %vm1704_vm1, %v6981_v60  ;;  %v5312_v34 = vld [vmem:[%s7852_s3 + $0x294] sm:$0xf0]  ;;  %v2393_v60 = vunpack.c.l.b16 %v7047_v35  ;;  %v7221_v35 = vpack.c.b16 %v2394_v33, %v2394_v33  ;;  %v4416_v33 = vld [vmem:[%s7852_s3 + $0x1c0] sm:$0xf]  ;;  %v4619_v22 = vor.u32 %v5328_v55, %v4618_v43 }
 0x222   : > { %v4521_v8 = vor.u32 %v5312_v34, %v4520_v11  ;;  %v5302_v34 = vld [vmem:[%s7852_s3 + $0x244] sm:$0xf0]  ;;  %v5320_v43 = vld [vmem:[%s7852_s3 + $0x2d4] sm:$0xf0]  ;;  %v4642_v55 = vld [vmem:[%s7852_s3 + $0x340] sm:$0xf] }
 0x223   : > { %v7223_v53 = vpack.c.b16 %v2393_v60, %v2393_v60  ;;  %v4481_v60 = vor.u32 %v5302_v34, %v4480_v52 }
 0x224   : > { %2286 = vmatpush.bf16.msrb.mxu3 %v4521_v8  ;;  %2263 = vmatpush.bf16.msrb.mxu2 %v4457_v14  ;;  %v5286_v8 = vld [vmem:[%s7852_s3 + $0x1c4] sm:$0xf0]  ;;  %v2686_v14 = vunpack.c.h.b16 %v6786_v10  ;;  %v4658_v10 = vld [vmem:[%s7852_s3 + $0x360] sm:$0xf] }
 0x225   : > { %v4417_v29 = vor.u32 %v5286_v8, %v4416_v33 }
 0x226   : > { %v7208_v4 = vpop.f32.mrf.mxu0  ;;  %v7210_v50 = vpop.f32.mrf.mxu1 }
 0x228   : > { %2287 = vmatpush.bf16.msrb.mxu3 %v4513_v13  ;;  %v4666_v13 = vld [vmem:[%s7852_s3 + $0x370] sm:$0xf] }
 0x229   : > { %2617 = vmatmul.bf16.gmra.mxu0 %v7223_v53  ;;  %4677 = vmatmul.msk.bf16.gmra.mxu1 %vm1704_vm1, %v7221_v35  ;;  %v4667_v1 = vor.u32 %v5340_v40, %v4666_v13 }
 0x22c   : > { %2288 = vmatpush.bf16.msrb.mxu3 %v4505_v23 }
 0x22e   : > { %v7237_v20 = vpop.f32.mrf.mxu0  ;;  %v7239_v27 = vpop.f32.mrf.mxu1 }
 0x230   : > { %2289 = vmatpush.bf16.msrb.mxu3 %v4497_v57  ;;  %v4659_v57 = vor.u32 %v5338_v41, %v4658_v10  ;;  %v5318_v10 = vld [vmem:[%s7852_s3 + $0x2c4] sm:$0xf0]  ;;  %v4634_v41 = vld [vmem:[%s7852_s3 + $0x330] sm:$0xf] }
 0x231   : > { %1778 = vmatmul.bf16.gmra.mxu2 %v7049_v62  ;;  %4267 = vmatmul.msk.bf16.gmra.mxu3 %vm1704_vm1, %v7051_v59  ;;  %v5294_v62 = vld [vmem:[%s7852_s3 + $0x204] sm:$0xf0] }
 0x232   : > { %v4449_v39 = vor.u32 %v5294_v62, %v4448_v3  ;;  %v7336_v62 = vpack.c.b16 %v2686_v14, %v2686_v14 }
 0x234   : > { %2264 = vmatpush.bf16.msrb.mxu2 %v4449_v39  ;;  %2290 = vmatpush.bf16.msrb.mxu3 %v4489_v6 }
 0x236   : > { %v7256_v59 = vpop.f32.mrf.mxu0  ;;  %v7258_v5 = vpop.f32.mrf.mxu1 }
 0x238   : > { %2265 = vmatpush.bf16.msrb.mxu2 %v4441_v17  ;;  %2291 = vmatpush.bf16.msrb.mxu3 %v4481_v60  ;;  %v4611_v17 = vor.u32 %v5326_v45, %v4610_v7  ;;  %v4578_v45 = vld [vmem:[%s7852_s3 + $0x2c0] sm:$0xf] }
 0x239   : > { %2893 = vmatmul.bf16.vlgmr.msra.gmra.mxu0 %v6728_v2  ;;  %4821 = vmatmul.msk.bf16.vlgmr.msra.gmra.mxu1 %vm1704_vm1, %v6730_v0 }
 0x23c   : > { %2266 = vmatpush.bf16.msrb.mxu2 %v4433_v61 }
 0x23e   : > { %v7275_v56 = vpop.f32.mrf.mxu0  ;;  %v7277_v42 = vpop.f32.mrf.mxu1 }
 0x241   : > { %1987 = vmatmul.bf16.vlgmr.msra.gmra.mxu2 %v6642_v28  ;;  %4380 = vmatmul.msk.bf16.vlgmr.msra.gmra.mxu3 %vm1704_vm1, %v6644_v38  ;;  %v5288_v28 = vld [vmem:[%s7852_s3 + $0x1d4] sm:$0xf0] }
 0x242   : > { %v4425_v11 = vor.u32 %v5288_v28, %v4424_v16  ;;  %2578 = vmatpush.bf16.msra.mxu3 %v4667_v1  ;;  %v4650_v16 = vld [vmem:[%s7852_s3 + $0x350] sm:$0xf]  ;;  %v5336_v28 = vld [vmem:[%s7852_s3 + $0x354] sm:$0xf0] }
 0x243   : > { %v4651_v52 = vor.u32 %v5336_v28, %v4650_v16  ;;  %v5316_v28 = vld [vmem:[%s7852_s3 + $0x2b4] sm:$0xf0] }
 0x244   : > { %2267 = vmatpush.bf16.msrb.mxu2 %v4425_v11  ;;  %v4594_v11 = vld [vmem:[%s7852_s3 + $0x2e0] sm:$0xf] }
 0x246   : > { %v7300_v38 = vpop.f32.mrf.mxu0  ;;  %v7302_v30 = vpop.f32.mrf.mxu1  ;;  %2579 = vmatpush.bf16.msra.mxu3 %v4659_v57  ;;  %v5332_v57 = vld [vmem:[%s7852_s3 + $0x334] sm:$0xf0] }
 0x247   : > { %v4635_v25 = vor.u32 %v5332_v57, %v4634_v41  ;;  %v4756_v57 = vld [vmem:[%s7852_s3 + $0x3e0] sm:$0xf] }
 0x248   : > { %2268 = vmatpush.bf16.msrb.mxu2 %v4417_v29 }
 0x249   : > { %2898 = vmatmul.bf16.gmra.mxu0 %v6765_v18  ;;  %4822 = vmatmul.msk.bf16.gmra.mxu1 %vm1704_vm1, %v6779_v44 }
 0x24a   : > { %2580 = vmatpush.bf16.msra.mxu3 %v4651_v52  ;;  %v4626_v52 = vld [vmem:[%s7852_s3 + $0x320] sm:$0xf] }
 0x24c   : > { %2553 = vmatpush.bf16.msra.mxu2 %v4619_v22  ;;  %v5334_v22 = vld [vmem:[%s7852_s3 + $0x344] sm:$0xf0] }
 0x24d   : > { %v4643_v40 = vor.u32 %v5334_v22, %v4642_v55  ;;  %v4764_v22 = vld [vmem:[%s7852_s3 + $0x3f0] sm:$0xf] }
 0x24e   : > { %v2046_v48 = vpop.f32.mrf.mxu0  ;;  %v2069_v32 = vpop.f32.mrf.mxu1 }
 0x24f   : > { %v4586_v32 = vld [vmem:[%s7852_s3 + $0x2d0] sm:$0xf]  ;;  %2581 = vmatpush.bf16.msra.mxu3 %v4643_v40  ;;  %v5356_v40 = vld [vmem:[%s7852_s3 + $0x3f4] sm:$0xf0] }
 0x250   : > { %2554 = vmatpush.bf16.msra.mxu2 %v4611_v17  ;;  %v4587_v13 = vor.u32 %v5320_v43, %v4586_v32  ;;  %v4579_v17 = vor.u32 %v5318_v10, %v4578_v45 }
 0x251   : > { %1992 = vmatmul.bf16.gmra.mxu2 %v6728_v2  ;;  %4381 = vmatmul.msk.bf16.gmra.mxu3 %vm1704_vm1, %v6730_v0 }
 0x253   : > { %2582 = vmatpush.bf16.msra.mxu3 %v4635_v25  ;;  %v5354_v25 = vld [vmem:[%s7852_s3 + $0x3e4] sm:$0xf0] }
 0x254   : > { %2555 = vmatpush.bf16.msra.mxu2 %v4603_v31 }
 0x256   : > { %v2316_v3 = vpop.f32.mrf.mxu0  ;;  %v2339_v23 = vpop.f32.mrf.mxu1 }
 0x257   : > { %v7338_v39 = vadd.f32 %v2339_v23, %v2316_v3 }
 0x259   : > { %2903 = vmatmul.bf16.gmra.mxu0 %v7340_v37  ;;  %4823 = vmatmul.msk.bf16.gmra.mxu1 %vm1704_vm1, %v7336_v62 }
 0x25e   : > { %v2318_v61 = vpop.f32.mrf.mxu0  ;;  %v2341_v58 = vpop.f32.mrf.mxu1 }
 0x25f   : > { %v7363_v6 = vadd.f32 %v2341_v58, %v2318_v61 }
 0x261   : > { %1997 = vmatmul.bf16.gmra.mxu2 %v6751_v36  ;;  %4382 = vmatmul.msk.bf16.gmra.mxu3 %vm1704_vm1, %v6753_v15  ;;  %v5322_v36 = vld [vmem:[%s7852_s3 + $0x2e4] sm:$0xf0] }
 0x262   : > { %v4595_v34 = vor.u32 %v5322_v36, %v4594_v11  ;;  %v5330_v36 = vld [vmem:[%s7852_s3 + $0x324] sm:$0xf0] }
 0x264   : > { %v1723_v33 = vpop.f32.mrf.mxu2  ;;  %v1746_v15 = vpop.f32.mrf.mxu3  ;;  %2556 = vmatpush.bf16.msra.mxu2 %v4595_v34  ;;  %v4562_v34 = vld [vmem:[%s7852_s3 + $0x2a0] sm:$0xf] }
 0x265   : > { %v7380_v60 = vadd.f32 %v1746_v15, %v1723_v33  ;;  %v4627_v33 = vor.u32 %v5330_v36, %v4626_v52  ;;  %v5314_v15 = vld [vmem:[%s7852_s3 + $0x2a4] sm:$0xf0] }
 0x266   : > { %v2321_v8 = vpop.f32.mrf.mxu0  ;;  %v2344_v29 = vpop.f32.mrf.mxu1 }
 0x267   : > { %v7382_v48 = vadd.f32 %v2344_v29, %v2321_v8  ;;  %v4563_v8 = vor.u32 %v5314_v15, %v4562_v34  ;;  %2583 = vmatpush.bf16.msra.mxu3 %v4627_v33  ;;  %v4748_v34 = vld [vmem:[%s7852_s3 + $0x3d0] sm:$0xf]  ;;  %v5352_v33 = vld [vmem:[%s7852_s3 + $0x3d4] sm:$0xf0] }
 0x268   : > { %2557 = vmatpush.bf16.msra.mxu2 %v4587_v13  ;;  %v4796_v15 = vld [vmem:[%s7852_s3 + $0x430] sm:$0xf] }
 0x26c   : > { %v1725_v14 = vpop.f32.mrf.mxu2  ;;  %v1748_v9 = vpop.f32.mrf.mxu3  ;;  %2558 = vmatpush.bf16.msra.mxu2 %v4579_v17 }
 0x26d   : > { %v7396_v1 = vadd.f32 %v1748_v9, %v1725_v14  ;;  %v4812_v14 = vld [vmem:[%s7852_s3 + $0x450] sm:$0xf]  ;;  %v4765_v9 = vor.u32 %v5356_v40, %v4764_v22 }
 0x26e   : > { %v2323_v3 = vpop.f32.mrf.mxu0  ;;  %v2346_v23 = vpop.f32.mrf.mxu1 }
 0x26f   : > { %v7398_v7 = vadd.f32 %v2346_v23, %v2323_v3 }
 0x271   : > { %2269 = vmatmul.bf16.vlgmr.msrb.gmra.mxu2 %v6675_v12  ;;  %4526 = vmatmul.msk.bf16.vlgmr.msrb.gmra.mxu3 %vm1704_vm1, %v6677_v19  ;;  %v4570_v19 = vld [vmem:[%s7852_s3 + $0x2b0] sm:$0xf] }
 0x272   : > { %v4571_v11 = vor.u32 %v5316_v28, %v4570_v19 }
 0x274   : > { %v1728_v26 = vpop.f32.mrf.mxu2  ;;  %v1751_v61 = vpop.f32.mrf.mxu3  ;;  %2559 = vmatpush.bf16.msra.mxu2 %v4571_v11 }
 0x275   : > { %v7415_v58 = vadd.f32 %v1751_v61, %v1728_v26  ;;  %v4804_v26 = vld [vmem:[%s7852_s3 + $0x440] sm:$0xf]  ;;  %v4757_v61 = vor.u32 %v5354_v25, %v4756_v57 }
 0x276   : > { %v2326_v31 = vpop.f32.mrf.mxu0  ;;  %v2349_v12 = vpop.f32.mrf.mxu1 }
 0x277   : > { %v7417_v16 = vadd.f32 %v2349_v12, %v2326_v31  ;;  %v5366_v31 = vld [vmem:[%s7852_s3 + $0x444] sm:$0xf0] }
 0x278   : > { %2560 = vmatpush.bf16.msra.mxu2 %v4563_v8  ;;  %v4805_v12 = vor.u32 %v5366_v31, %v4804_v26  ;;  %v4749_v8 = vor.u32 %v5352_v33, %v4748_v34  ;;  %v4732_v26 = vld [vmem:[%s7852_s3 + $0x3b0] sm:$0xf] }
 0x27c   : > { %v1730_v29 = vpop.f32.mrf.mxu2  ;;  %v1753_v32 = vpop.f32.mrf.mxu3  ;;  %2839 = vmatpush.bf16.msrb.mxu2 %v4765_v9 }
 0x27d   : > { %v7437_v43 = vadd.f32 %v1753_v32, %v1730_v29  ;;  %v5350_v29 = vld [vmem:[%s7852_s3 + $0x3c4] sm:$0xf0] }
 0x27e   : > { %v2328_v55 = vpop.f32.mrf.mxu0  ;;  %v2351_v13 = vpop.f32.mrf.mxu1 }
 0x280   : > { %2840 = vmatpush.bf16.msrb.mxu2 %v4757_v61  ;;  %v5348_v61 = vld [vmem:[%s7852_s3 + $0x3b4] sm:$0xf0] }
 0x281   : > { %2274 = vmatmul.bf16.gmra.mxu2 %v6739_v47  ;;  %4527 = vmatmul.msk.bf16.gmra.mxu3 %vm1704_vm1, %v6741_v51  ;;  %v5368_v47 = vld [vmem:[%s7852_s3 + $0x454] sm:$0xf0] }
 0x282   : > { %v4813_v3 = vor.u32 %v5368_v47, %v4812_v14 }
 0x284   : > { %v1733_v23 = vpop.f32.mrf.mxu2  ;;  %v1756_v51 = vpop.f32.mrf.mxu3  ;;  %2864 = vmatpush.bf16.msrb.mxu3 %v4813_v3  ;;  %2841 = vmatpush.bf16.msrb.mxu2 %v4749_v8 }
 0x285   : > { %v7454_v45 = vadd.f32 %v1756_v51, %v1733_v23 }
 0x286   : > { %v2608_v10 = vpop.f32.mrf.mxu0  ;;  %v2631_v17 = vpop.f32.mrf.mxu1 }
 0x287   : > { %v2632_v41 = vadd.f32 %v2631_v17, %v2608_v10 }
 0x288   : > { %2865 = vmatpush.bf16.msrb.mxu3 %v4805_v12 }
 0x28c   : > { %v1735_v19 = vpop.f32.mrf.mxu2  ;;  %v1758_v28 = vpop.f32.mrf.mxu3 }
 0x28e   : > { %v2610_v11 = vpop.f32.mrf.mxu0  ;;  %v2633_v52 = vpop.f32.mrf.mxu1 }
 0x28f   : > { %v2634_v36 = vadd.f32 %v2633_v52, %v2610_v11 }
 0x291   : > { %2279 = vmatmul.bf16.gmra.mxu2 %v7015_v24  ;;  %4528 = vmatmul.msk.bf16.gmra.mxu3 %vm1704_vm1, %v7019_v54  ;;  %v5364_v24 = vld [vmem:[%s7852_s3 + $0x434] sm:$0xf0]  ;;  %v4740_v54 = vld [vmem:[%s7852_s3 + $0x3c0] sm:$0xf] }
 0x292   : > { %v4797_v32 = vor.u32 %v5364_v24, %v4796_v15  ;;  %v4741_v22 = vor.u32 %v5350_v29, %v4740_v54  ;;  %v4724_v15 = vld [vmem:[%s7852_s3 + $0x3a0] sm:$0xf] }
 0x294   : > { %v1769_v55 = vpop.f32.mrf.mxu2  ;;  %v1792_v13 = vpop.f32.mrf.mxu3  ;;  %2866 = vmatpush.bf16.msrb.mxu3 %v4797_v32  ;;  %2842 = vmatpush.bf16.msrb.mxu2 %v4741_v22 }
 0x295   : > { %v1793_v40 = vadd.f32 %v1792_v13, %v1769_v55  ;;  %v5344_v13 = vld [vmem:[%s7852_s3 + $0x394] sm:$0xf0] }
 0x296   : > { %v2613_v14 = vpop.f32.mrf.mxu0  ;;  %v2636_v9 = vpop.f32.mrf.mxu1 }
 0x297   : > { %v2035_v47 = vadd.f32 %v7208_v4, %v1793_v40  ;;  %v2637_v3 = vadd.f32 %v2636_v9, %v2613_v14  ;;  %v4788_v4 = vld [vmem:[%s7852_s3 + $0x420] sm:$0xf] }
 0x299   : > { %v2058_v23 = vadd.f32 %v7210_v50, %v2035_v47 }
 0x29b   : > { %v2354_v51 = vadd.f32 %v7338_v39, %v2058_v23  ;;  %v4733_v39 = vor.u32 %v5348_v61, %v4732_v26  ;;  %v5358_v23 = vld [vmem:[%s7852_s3 + $0x404] sm:$0xf0] }
 0x29c   : > { %v1771_v10 = vpop.f32.mrf.mxu2  ;;  %v1794_v17 = vpop.f32.mrf.mxu3 }
 0x29d   : > { %v1795_v57 = vadd.f32 %v1794_v17, %v1771_v10  ;;  %v7492_v25 = vadd.f32 %v2632_v41, %v2354_v51  ;;  %v5362_v41 = vld [vmem:[%s7852_s3 + $0x424] sm:$0xf0]  ;;  %2843 = vmatpush.bf16.msrb.mxu2 %v4733_v39  ;;  %v4708_v51 = vld [vmem:[%s7852_s3 + $0x380] sm:$0xf] }
 0x29e   : > { %v2615_v50 = vpop.f32.mrf.mxu0  ;;  %v2638_v31 = vpop.f32.mrf.mxu1  ;;  %v4789_v28 = vor.u32 %v5362_v41, %v4788_v4 }
 0x29f   : > { %v2037_v12 = vadd.f32 %v7237_v20, %v1795_v57  ;;  %v2639_v19 = vadd.f32 %v2638_v31, %v2615_v50  ;;  %v5346_v20 = vld [vmem:[%s7852_s3 + $0x3a4] sm:$0xf0] }
 0x2a0   : > { %2867 = vmatpush.bf16.msrb.mxu3 %v4789_v28  ;;  %v4725_v24 = vor.u32 %v5346_v20, %v4724_v15 }
 0x2a1   : > { %v2060_v11 = vadd.f32 %v7239_v27, %v2037_v12  ;;  %2561 = vmatmul.bf16.vlgmr.msra.gmra.mxu2 %v6966_v49  ;;  %4672 = vmatmul.msk.bf16.vlgmr.msra.gmra.mxu3 %vm1704_vm1, %v6964_v21  ;;  %v4780_v21 = vld [vmem:[%s7852_s3 + $0x410] sm:$0xf]  ;;  %v5360_v49 = vld [vmem:[%s7852_s3 + $0x414] sm:$0xf0] }
 0x2a2   : > { %v4781_v29 = vor.u32 %v5360_v49, %v4780_v21  ;;  %2844 = vmatpush.bf16.msrb.mxu2 %v4725_v24 }
 0x2a3   : > { %v2356_v52 = vadd.f32 %v7363_v6, %v2060_v11 }
 0x2a4   : > { %v1774_v34 = vpop.f32.mrf.mxu2  ;;  %v1797_v33 = vpop.f32.mrf.mxu3  ;;  %2868 = vmatpush.bf16.msrb.mxu3 %v4781_v29 }
 0x2a5   : > { %v1798_v8 = vadd.f32 %v1797_v33, %v1774_v34  ;;  %v2648_v27 = vadd.f32 %v2634_v36, %v2356_v52  ;;  %v4716_v36 = vld [vmem:[%s7852_s3 + $0x390] sm:$0xf] }
 0x2a6   : > { %v2618_v6 = vpop.f32.mrf.mxu0  ;;  %v2641_v54 = vpop.f32.mrf.mxu1  ;;  %v4717_v22 = vor.u32 %v5344_v13, %v4716_v36 }
 0x2a7   : > { %v2040_v32 = vadd.f32 %v7256_v59, %v1798_v8  ;;  %v2642_v55 = vadd.f32 %v2641_v54, %v2618_v6  ;;  %v4772_v59 = vld [vmem:[%s7852_s3 + $0x400] sm:$0xf] }
 0x2a8   : > { %2845 = vmatpush.bf16.msrb.mxu2 %v4717_v22 }
 0x2a9   : > { %v2063_v40 = vadd.f32 %v7258_v5, %v2040_v32  ;;  %v4773_v5 = vor.u32 %v5358_v23, %v4772_v59 }
 0x2ab   : > { %v2358_v14 = vadd.f32 %v7382_v48, %v2063_v40  ;;  %v5342_v48 = vld [vmem:[%s7852_s3 + $0x384] sm:$0xf0]  ;;  %2869 = vmatpush.bf16.msrb.mxu3 %v4773_v5 }
 0x2ac   : > { %v1776_v9 = vpop.f32.mrf.mxu2  ;;  %v1799_v47 = vpop.f32.mrf.mxu3  ;;  %v4709_v61 = vor.u32 %v5342_v48, %v4708_v51 }
 0x2ad   : > { %v1800_v10 = vadd.f32 %v1799_v47, %v1776_v9  ;;  %v2650_v17 = vadd.f32 %v2637_v3, %v2358_v14 }
 0x2ae   : > { %v2620_v57 = vpop.f32.mrf.mxu0  ;;  %v2643_v26 = vpop.f32.mrf.mxu1  ;;  %2846 = vmatpush.bf16.msrb.mxu2 %v4709_v61 }
 0x2af   : > { %v2042_v4 = vadd.f32 %v7275_v56, %v1800_v10 }
 0x2b1   : > { %v2065_v50 = vadd.f32 %v7277_v42, %v2042_v4  ;;  %2566 = vmatmul.bf16.gmra.mxu2 %v7021_v63  ;;  %4673 = vmatmul.msk.bf16.gmra.mxu3 %vm1704_vm1, %v7023_v46 }
 0x2b3   : > { %v2360_v3 = vadd.f32 %v7398_v7, %v2065_v50 }
 0x2b4   : > { %v1779_v31 = vpop.f32.mrf.mxu2  ;;  %v1802_v39 = vpop.f32.mrf.mxu3 }
 0x2b5   : > { %v1803_v41 = vadd.f32 %v1802_v39, %v1779_v31  ;;  %v2652_v12 = vadd.f32 %v2639_v19, %v2360_v3 }
 0x2b6   : > { %v2894_v28 = vpop.f32.mrf.mxu0  ;;  %v2917_v11 = vpop.f32.mrf.mxu1 }
 0x2b7   : > { %v2045_v52 = vadd.f32 %v7300_v38, %v1803_v41  ;;  %v2918_v56 = vadd.f32 %v2917_v11, %v2894_v28 }
 0x2b9   : > { %v2068_v34 = vadd.f32 %v7302_v30, %v2045_v52  ;;  %v7554_v42 = vadd.f32 %v2918_v56, %v7492_v25 }
 0x2bb   : > { %v2362_v63 = vadd.f32 %v7417_v16, %v2068_v34 }
 0x2bc   : > { %v1781_v33 = vpop.f32.mrf.mxu2  ;;  %v1804_v46 = vpop.f32.mrf.mxu3 }
 0x2bd   : > { %v2654_v15 = vadd.f32 %v2642_v55, %v2362_v63  ;;  %v5388_v46 = vld [vmem:[%s7854_s5 + $0x98] sm:$0xff] }
 0x2be   : > { %v2896_v7 = vpop.f32.mrf.mxu0  ;;  %v2919_v20 = vpop.f32.mrf.mxu1  ;;  %3103 = vmatpush.bf16.msra.mxu3 %v5388_v46 }
 0x2bf   : > { %v2920_v8 = vadd.f32 %v2919_v20, %v2896_v7  ;;  %v5376_v20 = vld [vmem:[%s7854_s5 + $0x38] sm:$0xff] }
 0x2c0   : > { %3179 = vmatpush.bf16.msrb.mxu0 %v5376_v20 }
 0x2c1   : > { %v7557_v24 = vadd.f32 %v2920_v8, %v2648_v27  ;;  %2571 = vmatmul.bf16.gmra.mxu2 %v7223_v53  ;;  %4674 = vmatmul.msk.bf16.gmra.mxu3 %vm1704_vm1, %v7221_v35  ;;  %v5378_v8 = vld [vmem:[%s7854_s5 + $0x48] sm:$0xff] }
 0x2c2   : > { %3198 = vmatpush.bf16.msrb.mxu1 %v5378_v8 }
 0x2c4   : > { %v1988_v38 = vpop.f32.mrf.mxu2  ;;  %v2011_v30 = vpop.f32.mrf.mxu3 }
 0x2c5   : > { %v1989_v25 = vadd.f32 %v1988_v38, %v7380_v60  ;;  %v5385_v38 = vld [vmem:[%s7854_s5 + $0x80] sm:$0xff] }
 0x2c6   : > { %v2899_v19 = vpop.f32.mrf.mxu0  ;;  %v2922_v21 = vpop.f32.mrf.mxu1 }
 0x2c7   : > { %v2012_v16 = vadd.f32 %v2011_v30, %v1989_v25  ;;  %v2923_v49 = vadd.f32 %v2922_v21, %v2899_v19  ;;  %v5375_v30 = vld [vmem:[%s7854_s5 + $0x30] sm:$0xff]  ;;  %v5384_v21 = vld [vmem:[%s7854_s5 + $0x78] sm:$0xff] }
 0x2c8   : > { %3180 = vmatpush.bf16.msrb.mxu0 %v5375_v30  ;;  %v5389_v30 = vld [vmem:[%s7854_s5 + $0xa0] sm:$0xff] }
 0x2c9   : > { %v7563_v6 = vadd.f32 %v2923_v49, %v2650_v17  ;;  %v5383_v49 = vld [vmem:[%s7854_s5 + $0x70] sm:$0xff] }
 0x2cc   : > { %v1990_v54 = vpop.f32.mrf.mxu2  ;;  %v2013_v29 = vpop.f32.mrf.mxu3 }
 0x2ce   : > { %v2901_v32 = vpop.f32.mrf.mxu0  ;;  %v2924_v27 = vpop.f32.mrf.mxu1 }
 0x2cf   : > { %v2925_v55 = vadd.f32 %v2924_v27, %v2901_v32  ;;  %v5382_v27 = vld [vmem:[%s7854_s5 + $0x68] sm:$0xff] }
 0x2d1   : > { %v7565_v36 = vadd.f32 %v2925_v55, %v2652_v12  ;;  %2847 = vmatmul.bf16.vlgmr.msrb.gmra.mxu2 %v6728_v2  ;;  %4818 = vmatmul.msk.bf16.vlgmr.msrb.gmra.mxu3 %vm1704_vm1, %v6730_v0  ;;  %v5372_v55 = vld [vmem:[%s7854_s5 + $0x18] sm:$0xff] }
 0x2d4   : > { %v1993_v35 = vpop.f32.mrf.mxu2  ;;  %v2016_v53 = vpop.f32.mrf.mxu3 }
 0x2d5   : > { %v1994_v60 = vadd.f32 %v1993_v35, %v7415_v58  ;;  %v5387_v35 = vld [vmem:[%s7854_s5 + $0x90] sm:$0xff] }
 0x2d6   : > { %v2904_v13 = vpop.f32.mrf.mxu0  ;;  %v2927_v22 = vpop.f32.mrf.mxu1  ;;  %3104 = vmatpush.bf16.msra.mxu3 %v5387_v35 }
 0x2d7   : > { %v2017_v40 = vadd.f32 %v2016_v53, %v1994_v60  ;;  %v2928_v14 = vadd.f32 %v2927_v22, %v2904_v13  ;;  %v5381_v53 = vld [vmem:[%s7854_s5 + $0x60] sm:$0xff]  ;;  %v5371_v60 = vld [vmem:[%s7854_s5 + $0x10] sm:$0xff] }
 0x2d9   : > { %v7571_v9 = vadd.f32 %v2928_v14, %v2654_v15  ;;  %v5370_v14 = vld [vmem:[%s7854_s5 + $0x8] sm:$0xff] }
 0x2dc   : > { %v1995_v47 = vpop.f32.mrf.mxu2  ;;  %v2018_v59 = vpop.f32.mrf.mxu3 }
 0x2de   : > { %v2906_v23 = vpop.f32.mrf.mxu0  ;;  %v2929_v51 = vpop.f32.mrf.mxu1 }
 0x2df   : > { %v5396_v23 = vld [vmem:[%s7854_s5 + $0xd8] sm:$0xff]  ;;  %v5406_v51 = vld [vmem:[%s7854_s5 + $0x128] sm:$0xff] }
 0x2e1   : > { %2852 = vmatmul.bf16.gmra.mxu2 %v6765_v18  ;;  %4819 = vmatmul.msk.bf16.gmra.mxu3 %vm1704_vm1, %v6779_v44  ;;  %v1991_v18 = vadd.f32 %v1990_v54, %v7396_v1  ;;  %v5373_v54 = vld [vmem:[%s7854_s5 + $0x20] sm:$0xff] }
 0x2e3   : > { %v2014_v50 = vadd.f32 %v2013_v29, %v1991_v18  ;;  %v5398_v18 = vld [vmem:[%s7854_s5 + $0xe8] sm:$0xff] }
 0x2e4   : > { %v1998_v2 = vpop.f32.mrf.mxu2  ;;  %v2021_v0 = vpop.f32.mrf.mxu3  ;;  %3314 = vmatpush.bf16.msrb.mxu3 %v5398_v18 }
 0x2e5   : > { %v1999_v10 = vadd.f32 %v1998_v2, %v7454_v45 }
 0x2e7   : > { %v2022_v58 = vadd.f32 %v2021_v0, %v1999_v10  ;;  %v5377_v10 = vld [vmem:[%s7854_s5 + $0x40] sm:$0xff] }
 0x2e8   : > { %3199 = vmatpush.bf16.msrb.mxu1 %v5377_v10 }
 0x2ec   : > { %v2000_v17 = vpop.f32.mrf.mxu2  ;;  %v2023_v5 = vpop.f32.mrf.mxu3 }
 0x2ed   : > { %v5405_v17 = vld [vmem:[%s7854_s5 + $0x120] sm:$0xff]  ;;  %v5394_v5 = vld [vmem:[%s7854_s5 + $0xc8] sm:$0xff] }
 0x2f1   : > { %2857 = vmatmul.bf16.gmra.mxu2 %v7340_v37  ;;  %4820 = vmatmul.msk.bf16.gmra.mxu3 %vm1704_vm1, %v7336_v62  ;;  %v1996_v62 = vadd.f32 %v1995_v47, %v7437_v43  ;;  %v5386_v43 = vld [vmem:[%s7854_s5 + $0x88] sm:$0xff]  ;;  %v5379_v47 = vld [vmem:[%s7854_s5 + $0x50] sm:$0xff] }
 0x2f2   : > { %3084 = vmatpush.bf16.msra.mxu2 %v5386_v43 }
 0x2f3   : > { %v2019_v11 = vadd.f32 %v2018_v59, %v1996_v62  ;;  %v5369_v59 = vld [vmem:[%s7854_s5] sm:$0xff]  ;;  %v5391_v62 = vld [vmem:[%s7854_s5 + $0xb0] sm:$0xff] }
 0x2f4   : > { %v2270_v48 = vpop.f32.mrf.mxu2  ;;  %v2293_v57 = vpop.f32.mrf.mxu3 }
 0x2f5   : > { %v2294_v26 = vadd.f32 %v2293_v57, %v2270_v48  ;;  %v5404_v48 = vld [vmem:[%s7854_s5 + $0x118] sm:$0xff] }
 0x2f6   : > { %3085 = vmatpush.bf16.msra.mxu2 %v5385_v38 }
 0x2f7   : > { %v7580_v61 = vadd.f32 %v2294_v26, %v2012_v16  ;;  %v5374_v16 = vld [vmem:[%s7854_s5 + $0x28] sm:$0xff] }
 0x2f8   : > { %3181 = vmatpush.bf16.msrb.mxu0 %v5374_v16 }
 0x2fa   : > { %3086 = vmatpush.bf16.msra.mxu2 %v5384_v21 }
 0x2fc   : > { %v2272_v44 = vpop.f32.mrf.mxu2  ;;  %v2295_v4 = vpop.f32.mrf.mxu3  ;;  %3182 = vmatpush.bf16.msrb.mxu0 %v5373_v54 }
 0x2fd   : > { %v2296_v3 = vadd.f32 %v2295_v4, %v2272_v44  ;;  %v5393_v44 = vld [vmem:[%s7854_s5 + $0xc0] sm:$0xff]  ;;  %v5403_v4 = vld [vmem:[%s7854_s5 + $0x110] sm:$0xff] }
 0x2fe   : > { %3087 = vmatpush.bf16.msra.mxu2 %v5383_v49 }
 0x2ff   : > { %v7583_v45 = vadd.f32 %v2296_v3, %v2014_v50  ;;  %v5397_v50 = vld [vmem:[%s7854_s5 + $0xe0] sm:$0xff]  ;;  %v5392_v3 = vld [vmem:[%s7854_s5 + $0xb8] sm:$0xff] }
 0x300   : > { %3183 = vmatpush.bf16.msrb.mxu0 %v5372_v55  ;;  %3315 = vmatpush.bf16.msrb.mxu3 %v5397_v50 }
 0x302   : > { %3088 = vmatpush.bf16.msra.mxu2 %v5382_v27 }
 0x304   : > { %v2275_v31 = vpop.f32.mrf.mxu2  ;;  %v2298_v39 = vpop.f32.mrf.mxu3  ;;  %3184 = vmatpush.bf16.msrb.mxu0 %v5371_v60 }
 0x305   : > { %v2299_v41 = vadd.f32 %v2298_v39, %v2275_v31  ;;  %v5402_v31 = vld [vmem:[%s7854_s5 + $0x108] sm:$0xff] }
 0x306   : > { %3089 = vmatpush.bf16.msra.mxu2 %v5381_v53 }
 0x307   : > { %v7585_v37 = vadd.f32 %v2299_v41, %v2017_v40  ;;  %v5380_v40 = vld [vmem:[%s7854_s5 + $0x58] sm:$0xff] }
 0x308   : > { %3185 = vmatpush.bf16.msrb.mxu0 %v5370_v14 }
 0x30a   : > { %3090 = vmatpush.bf16.msra.mxu2 %v5380_v40 }
 0x30c   : > { %v2277_v12 = vpop.f32.mrf.mxu2  ;;  %v2300_v28 = vpop.f32.mrf.mxu3  ;;  %3186 = vmatpush.bf16.msrb.mxu0 %v5369_v59 }
 0x30d   : > { %v2301_v52 = vadd.f32 %v2300_v28, %v2277_v12  ;;  %v5401_v12 = vld [vmem:[%s7854_s5 + $0x100] sm:$0xff] }
 0x30e   : > { %3091 = vmatpush.bf16.msra.mxu2 %v5379_v47  ;;  %v2941_v28 = vld [vmem:[%s7853_s4] sm:$0x3] }
 0x30f   : > { %v7588_v56 = vadd.f32 %v2301_v52, %v2019_v11  ;;  %v7719_v52 = vperm.slane %v2941_v28, 1  ;;  %v7731_v20 = vperm.slane %v2941_v28, 0 }
 0x310   : > { %3412 = vmatpush.bf16.msra.mxu0 %v5406_v51 }
 0x311   : > { %v2948_v8 = vadd.f32 %v7719_v52, %v7554_v42  ;;  %v2950_v53 = vadd.f32 %v7719_v52, %v7557_v24 }
 0x312   : > { %3295 = vmatpush.bf16.msrb.mxu2 %v5396_v23 }
 0x313   : > { %v2958_v42 = vmax.f32 %v2948_v8, 0.0  ;;  %v2960_v23 = vmax.f32 %v2950_v53, 0.0 }
 0x314   : > { %v2280_v1 = vpop.f32.mrf.mxu2  ;;  %v2303_v34 = vpop.f32.mrf.mxu3  ;;  %3413 = vmatpush.bf16.msra.mxu0 %v5405_v17 }
 0x315   : > { %v2304_v63 = vadd.f32 %v2303_v34, %v2280_v1  ;;  %v5408_v1 = vld [vmem:[%s7854_s5 + $0x138] sm:$0xff]  ;;  %v5390_v34 = vld [vmem:[%s7854_s5 + $0xa8] sm:$0xff] }
 0x316   : > { %3431 = vmatpush.bf16.msra.mxu1 %v5408_v1 }
 0x317   : > { %v7590_v33 = vadd.f32 %v2304_v63, %v2022_v58  ;;  %v5395_v58 = vld [vmem:[%s7854_s5 + $0xd0] sm:$0xff]  ;;  %v5400_v63 = vld [vmem:[%s7854_s5 + $0xf8] sm:$0xff] }
 0x318   : > { %3296 = vmatpush.bf16.msrb.mxu2 %v5395_v58  ;;  %3414 = vmatpush.bf16.msra.mxu0 %v5404_v48 }
 0x31c   : > { %v2282_v15 = vpop.f32.mrf.mxu2  ;;  %v2305_v7 = vpop.f32.mrf.mxu3  ;;  %3297 = vmatpush.bf16.msrb.mxu2 %v5394_v5  ;;  %3415 = vmatpush.bf16.msra.mxu0 %v5403_v4  ;;  %v5416_v4 = vld [vmem:[%s7854_s5 + $0x178] sm:$0xff] }
 0x320   : > { %3298 = vmatpush.bf16.msrb.mxu2 %v5393_v44  ;;  %3416 = vmatpush.bf16.msra.mxu0 %v5402_v31  ;;  %v5417_v44 = vld [vmem:[%s7854_s5 + $0x180] sm:$0xff] }
 0x324   : > { %v7610_v25 = vpop.f32.mrf.mxu2  ;;  %v7612_v19 = vpop.f32.mrf.mxu3  ;;  %3299 = vmatpush.bf16.msrb.mxu2 %v5392_v3  ;;  %3417 = vmatpush.bf16.msra.mxu0 %v5401_v12  ;;  %v5415_v12 = vld [vmem:[%s7854_s5 + $0x170] sm:$0xff] }
 0x325   : > { %v2586_v11 = vadd.f32 %v7612_v19, %v7610_v25  ;;  %v5399_v25 = vld [vmem:[%s7854_s5 + $0xf0] sm:$0xff] }
 0x327   : > { %v2645_v7 = vadd.f32 %v2586_v11, %v7580_v61  ;;  %v5407_v61 = vld [vmem:[%s7854_s5 + $0x130] sm:$0xff]  ;;  %v2954_v11 = vadd.f32 %v7719_v52, %v7565_v36  ;;  %v5413_v36 = vld [vmem:[%s7854_s5 + $0x160] sm:$0xff] }
 0x328   : > { %3300 = vmatpush.bf16.msrb.mxu2 %v5391_v62  ;;  %3418 = vmatpush.bf16.msra.mxu0 %v5400_v63 }
 0x329   : > { %3432 = vmatpush.bf16.msra.mxu1 %v5407_v61 }
 0x32c   : > { %v7626_v29 = vpop.f32.mrf.mxu2  ;;  %v7628_v32 = vpop.f32.mrf.mxu3  ;;  %3301 = vmatpush.bf16.msrb.mxu2 %v5390_v34  ;;  %3419 = vmatpush.bf16.msra.mxu0 %v5399_v25  ;;  %v5414_v34 = vld [vmem:[%s7854_s5 + $0x168] sm:$0xff] }
 0x32d   : > { %v2588_v19 = vadd.f32 %v7628_v32, %v7626_v29 }
 0x32f   : > { %v2647_v27 = vadd.f32 %v2588_v19, %v7583_v45  ;;  %v5418_v45 = vld [vmem:[%s7854_s5 + $0x188] sm:$0xff] }
 0x330   : > { %3302 = vmatpush.bf16.msrb.mxu2 %v5389_v30 }
 0x334   : > { %v7645_v13 = vpop.f32.mrf.mxu2  ;;  %v7647_v22 = vpop.f32.mrf.mxu3 }
 0x335   : > { %v2591_v29 = vadd.f32 %v7647_v22, %v7645_v13  ;;  %v2952_v22 = vadd.f32 %v7719_v52, %v7563_v6 }
 0x337   : > { %v2649_v58 = vadd.f32 %v2591_v29, %v7585_v37  ;;  %v2962_v6 = vmax.f32 %v2952_v22, 0.0 }
 0x33c   : > { %v7667_v2 = vpop.f32.mrf.mxu2  ;;  %v7669_v0 = vpop.f32.mrf.mxu3 }
 0x33d   : > { %v2593_v50 = vadd.f32 %v7669_v0, %v7667_v2 }
 0x33f   : > { %v2651_v28 = vadd.f32 %v2593_v50, %v7588_v56 }
 0x344   : > { %v7686_v57 = vpop.f32.mrf.mxu2  ;;  %v7688_v26 = vpop.f32.mrf.mxu3 }
 0x345   : > { %v2596_v63 = vadd.f32 %v7688_v26, %v7686_v57  ;;  %v2956_v57 = vadd.f32 %v7719_v52, %v7571_v9 }
 0x34c   : > { %v2574_v39 = vpop.f32.mrf.mxu2  ;;  %v2597_v41 = vpop.f32.mrf.mxu3 }
 0x354   : > { %v2848_v46 = vpop.f32.mrf.mxu2  ;;  %v2871_v15 = vpop.f32.mrf.mxu3 }
 0x355   : > { %v2872_v43 = vadd.f32 %v2871_v15, %v2848_v46  ;;  %v2964_v15 = vmax.f32 %v2954_v11, 0.0 }
 0x357   : > { %v2931_v38 = vadd.f32 %v2872_v43, %v2645_v7 }
 0x359   : > { %v2947_v21 = vadd.f32 %v7731_v20, %v2931_v38  ;;  %v2653_v38 = vadd.f32 %v2596_v63, %v7590_v33  ;;  %v5412_v33 = vld [vmem:[%s7854_s5 + $0x158] sm:$0xff] }
 0x35b   : > { %v2957_v16 = vmax.f32 %v2947_v21, 0.0 }
 0x35c   : > { %v2850_v49 = vpop.f32.mrf.mxu2  ;;  %v2873_v54 = vpop.f32.mrf.mxu3 }
 0x35d   : > { %v2967_v55 = vpack.c.bf16 %v2958_v42, %v2957_v16  ;;  %v2874_v35 = vadd.f32 %v2873_v54, %v2850_v49 }
 0x35f   : > { %v3111_v60 = vunpack.c.l.b16 %v2967_v55  ;;  %v3112_v40 = vunpack.c.h.b16 %v2967_v55  ;;  %v2933_v14 = vadd.f32 %v2874_v35, %v2647_v27  ;;  %v2966_v55 = vmax.f32 %v2956_v57, 0.0 }
 0x361   : > { %v3113_v32 = vpack.c.b16 %v3111_v60, %v3111_v60  ;;  %v3114_v47 = vpack.c.b16 %v3112_v40, %v3112_v40  ;;  %v2949_v59 = vadd.f32 %v7731_v20, %v2933_v14  ;;  %v5410_v60 = vld [vmem:[%s7854_s5 + $0x148] sm:$0xff]  ;;  %v5409_v40 = vld [vmem:[%s7854_s5 + $0x140] sm:$0xff] }
 0x363   : > { %v2959_v51 = vmax.f32 %v2949_v59, 0.0  ;;  %3187 = vmatmul.bf16.vlgmr.msrb.gmra.mxu0 %v3113_v32  ;;  %4925 = vmatmul.msk.bf16.vlgmr.msrb.gmra.mxu1 %vm3080_vm2, %v3114_v47 }
 0x364   : > { %v2853_v24 = vpop.f32.mrf.mxu2  ;;  %v2876_v10 = vpop.f32.mrf.mxu3  ;;  %3548 = vmatpush.bf16.msrb.mxu1 %v5418_v45 }
 0x365   : > { %v2968_v17 = vpack.c.bf16 %v2960_v23, %v2959_v51  ;;  %v2877_v13 = vadd.f32 %v2876_v10, %v2853_v24  ;;  %v5420_v24 = vld [vmem:[%s7856_s7 + $0x8] sm:$0xff] }
 0x367   : > { %v3015_v5 = vunpack.c.l.b16 %v2968_v17  ;;  %v3016_v48 = vunpack.c.h.b16 %v2968_v17  ;;  %v2935_v18 = vadd.f32 %v2877_v13, %v2649_v58  ;;  %v5419_v17 = vld [vmem:[%s7856_s7] sm:$0xff] }
 0x368   : > { %3549 = vmatpush.bf16.msrb.mxu1 %v5417_v44 }
 0x369   : > { %v3017_v37 = vpack.c.b16 %v3015_v5, %v3015_v5  ;;  %v3018_v3 = vpack.c.b16 %v3016_v48, %v3016_v48  ;;  %v2951_v31 = vadd.f32 %v7731_v20, %v2935_v18 }
 0x36b   : > { %v2961_v39 = vmax.f32 %v2951_v31, 0.0  ;;  %3092 = vmatmul.bf16.vlgmr.msra.gmra.mxu2 %v3017_v37  ;;  %4884 = vmatmul.msk.bf16.vlgmr.msra.gmra.mxu3 %vm3080_vm2, %v3018_v3 }
 0x36c   : > { %v2855_v41 = vpop.f32.mrf.mxu2  ;;  %v2878_v62 = vpop.f32.mrf.mxu3  ;;  %3529 = vmatpush.bf16.msra.mxu3 %v5416_v4  ;;  %3591 = vmatpush.bf16.msra.mxu2 %v5420_v24 }
 0x36d   : > { %v2969_v2 = vpack.c.bf16 %v2962_v6, %v2961_v39  ;;  %v2879_v0 = vadd.f32 %v2878_v62, %v2855_v41 }
 0x36f   : > { %v2937_v1 = vadd.f32 %v2879_v0, %v2651_v28  ;;  %v3227_v43 = vunpack.c.l.b16 %v2969_v2  ;;  %v3228_v30 = vunpack.c.h.b16 %v2969_v2 }
 0x370   : > { %3530 = vmatpush.bf16.msra.mxu3 %v5415_v12  ;;  %3592 = vmatpush.bf16.msra.mxu2 %v5419_v17 }
 0x371   : > { %v2953_v46 = vadd.f32 %v7731_v20, %v2937_v1  ;;  %v3229_v42 = vpack.c.b16 %v3227_v43, %v3227_v43  ;;  %v3230_v16 = vpack.c.b16 %v3228_v30, %v3228_v30  ;;  %v5461_v1 = vld [vmem:[%s7855_s6] ss:$0 sm:$0xff] }
 0x373   : > { %v2963_v7 = vmax.f32 %v2953_v46, 0.0 }
 0x374   : > { %v2858_v56 = vpop.f32.mrf.mxu2  ;;  %v2881_v8 = vpop.f32.mrf.mxu3  ;;  %3531 = vmatpush.bf16.msra.mxu3 %v5414_v34 }
 0x375   : > { %v2970_v25 = vpack.c.bf16 %v2964_v15, %v2963_v7  ;;  %v2882_v61 = vadd.f32 %v2881_v8, %v2858_v56  ;;  %v5462_v56 = vld [vmem:[%s7857_s8] ss:$0 sm:$0xff] }
 0x377   : > { %v3344_v26 = vunpack.c.l.b16 %v2970_v25  ;;  %v3345_v19 = vunpack.c.h.b16 %v2970_v25  ;;  %v2939_v21 = vadd.f32 %v2882_v61, %v2653_v38 }
 0x378   : > { %3532 = vmatpush.bf16.msra.mxu3 %v5413_v36 }
 0x379   : > { %v3346_v49 = vpack.c.b16 %v3344_v26, %v3344_v26  ;;  %v3347_v54 = vpack.c.b16 %v3345_v19, %v3345_v19  ;;  %v2955_v27 = vadd.f32 %v7731_v20, %v2939_v21  ;;  %v5411_v20 = vld [vmem:[%s7854_s5 + $0x150] sm:$0xff] }
 0x37b   : > { %v2965_v35 = vmax.f32 %v2955_v27, 0.0  ;;  %3303 = vmatmul.bf16.vlgmr.msrb.gmra.mxu2 %v3229_v42  ;;  %4986 = vmatmul.msk.bf16.vlgmr.msrb.gmra.mxu3 %vm3080_vm2, %v3230_v16 }
 0x37c   : > { %3420 = vmatmul.bf16.vlgmr.msra.gmra.mxu0 %v3346_v49  ;;  %5047 = vmatmul.msk.bf16.vlgmr.msra.gmra.mxu1 %vm3080_vm2, %v3347_v54  ;;  %v2860_v9 = vpop.f32.mrf.mxu2  ;;  %v2883_v52 = vpop.f32.mrf.mxu3 }
 0x37d   : > { %v2971_v53 = vpack.c.bf16 %v2966_v55, %v2965_v35  ;;  %3533 = vmatpush.bf16.msra.mxu3 %v5412_v33 }
 0x37f   : > { %v3461_v14 = vunpack.c.l.b16 %v2971_v53  ;;  %v3462_v29 = vunpack.c.h.b16 %v2971_v53 }
 0x381   : > { %3534 = vmatpush.bf16.msra.mxu3 %v5411_v20  ;;  %v3463_v32 = vpack.c.b16 %v3461_v14, %v3461_v14  ;;  %v3464_v47 = vpack.c.b16 %v3462_v29, %v3462_v29 }
 0x385   : > { %3535 = vmatpush.bf16.msra.mxu3 %v5410_v60 }
 0x389   : > { %3536 = vmatpush.bf16.msra.mxu3 %v5409_v40 }
 0x38c   : > { %3537 = vmatmul.bf16.vlgmr.msra.gmra.mxu3 %v3463_v32  ;;  %5108 = vmatmul.msk.bf16.vlgmr.msrb.gmra.mxu1 %vm3080_vm2, %v3464_v47 }
 0x3e0   : > { %v3188_v59 = vpop.f32.mrf.mxu0  ;;  %v3201_v45 = vpop.f32.mrf.mxu1 }
 0x3e8   : > { %v3190_v23 = vpop.f32.mrf.mxu0  ;;  %v3203_v51 = vpop.f32.mrf.mxu1 }
 0x3ee   : > { %v3093_v10 = vpop.f32.mrf.mxu2  ;;  %v3106_v58 = vpop.f32.mrf.mxu3 }
 0x3ef   : > { %v3107_v37 = vadd.f32 %v3106_v58, %v3093_v10 }
 0x3f1   : > { %v3189_v3 = vadd.f32 %v3188_v59, %v3107_v37 }
 0x3f3   : > { %v3202_v62 = vadd.f32 %v3201_v45, %v3189_v3 }
 0x3f6   : > { %v3095_v13 = vpop.f32.mrf.mxu2  ;;  %v3108_v22 = vpop.f32.mrf.mxu3 }
 0x3f9   : > { %v3421_v5 = vpop.f32.mrf.mxu0  ;;  %v3434_v48 = vpop.f32.mrf.mxu1 }
 0x3fa   : > { %v3435_v28 = vadd.f32 %v3434_v48, %v3421_v5 }
 0x3fe   : > { %v3304_v18 = vpop.f32.mrf.mxu2  ;;  %v3317_v44 = vpop.f32.mrf.mxu3 }
 0x3ff   : > { %v3318_v39 = vadd.f32 %v3317_v44, %v3304_v18 }
 0x401   : > { %v3423_v4 = vpop.f32.mrf.mxu0  ;;  %v3436_v50 = vpop.f32.mrf.mxu1  ;;  %v3321_v12 = vadd.f32 %v3318_v39, %v3202_v62 }
 0x403   : > { %v3438_v0 = vadd.f32 %v3435_v28, %v3321_v12 }
 0x406   : > { %v3306_v31 = vpop.f32.mrf.mxu2  ;;  %v3319_v6 = vpop.f32.mrf.mxu3 }
 0x409   : > { %v3551_v41 = vpop.f32.mrf.mxu1 }
 0x40f   : > { %v3538_v2 = vpop.f32.mrf.mxu3 }
 0x410   : > { %v3552_v11 = vadd.f32 %v3551_v41, %v3538_v2 }
 0x411   : > { %v3553_v34 = vpop.f32.mrf.mxu1 }
 0x412   : > { %v3555_v63 = vadd.f32 %v3552_v11, %v3438_v0 }
 0x414   : > { %v3559_v46 = vadd.f32 %v5461_v1, %v3555_v63 }
 0x416   : > { %v3560_v15 = vmax.f32 %v3559_v46, 0.0 }
 0x417   : > { %v3540_v7 = vpop.f32.mrf.mxu3 }
 0x418   : > { %v3561_v43 = vpack.c.bf16 %v3560_v15, %v3560_v15 }
 0x41a   : > { %5117 = vmatmul.msk.bf16.vlgmr.msra.gmra.mxu2 %vm3080_vm2, %v3561_v43 }
 0x49d   : > { %v3594_v8 = vpop.f32.mrf.mxu2 }
 0x49e   : > { %v3595_v36 = vadd.f32 %v5462_v56, %v3594_v8 }
 0x4a0   : > { %3598 = vst [vmem:[%s328_s22] sm:$0xff] %v3595_v36 }
 0x4a1   : > { %5490 = shalt.err (!%p5487_p3)
}
 0x4a2   : > { %5422 = dma.vmem_to_hbm [thread:$0]  (%p5615_p5), %s3613_s25, 128, %s3615_s26, %s3600_s24  }
 0x4a5   : > { %v3596_v38 = vpop.f32.mrf.mxu2 }
 0x4a6 PF: > { %p5428_p4 = scmp.ge.s32.totalorder %s5525_s12, 2  ;;  %s3626_s27 = sand.u32 1, %s5513_s30  }
 0x4a7   : > { %s3627_s23 = scalar_lea.sflag [#allocation3], %s3626_s27 }
 0x4a8   : > { %p5425_p7 = pnand %p5428_p4, %p5619_p6 }
 0x4aa   : > { %p5426_p8 = pneg %p5425_p7 }
 0x4ac   : > { %5508 = dma.done.wait (%p5426_p8), %s3627_s23, 128  }
 0x4ad   : > { %5510 = vsyncadd (%p5426_p8), %s3627_s23, 4294967168  ;;  %p19_p9 = scmp.ge.s32.totalorder %s5602_s15, 4   ;;  %s7869_s30 = smov %s5517_s10 }
 0x4ae   : > { %s7870_s10 = smov %s5521_s11  ;;  %s7871_s11 = smov %s5613_s18 }
 0x4af   : > { %s7872_s12 = smov %s5602_s15  ;;  %21 = sbr.rel (!%p19_p9) target bundleno = 5 (0x5), region = 99 }
 0x4b4   :  { %3633 = vsyncpa [#allocation3], 1 }
 0x4b5   :  { %3635 = vsyncpa [#allocation3 + $0x1], 1 }

</bundles_post_ra>
